<compile_context>
chip_gen: v7x
topology: tpu7x:2x2x1
jax: 0.10.0
libtpu: 0.0.40
codegen_flags: <defaults>
</compile_context>

<pallas_src>
import math
from functools import partial

import jax
import jax.numpy as jnp
from jax.experimental import pallas as pl
from jax.experimental import pallas as pl  # noqa: F811 (kept single alias)
from jax.experimental.pallas import tpu as pltpu  # noqa: F401  (TPU backend module)

# ----------------------------- configuration --------------------------------
B, L = 2, 8            # batch, sequence length
D_MODEL = 32           # input_size / d_model
NLAYERS = 2
HEADS = 4              # args.num_head
D_K = 8                # args.d_k
D_V = 8                # args.d_v
D_FF = 64              # args.d_ff
MAX_REL_POS = 4        # args.max_relative_pos[0]
USE_NEG_DIST = True    # args.use_neg_dist
USE_ALL_ENC_LAYERS = True
LN_EPS = 1e-6
VOCAB = 2 * MAX_REL_POS + 1 if USE_NEG_DIST else MAX_REL_POS + 1
NEG_INF = -1e18


# ------------------------------ kernel helpers -------------------------------
def _layer_norm(x, g, b, eps=LN_EPS):
    mean = jnp.mean(x, axis=-1, keepdims=True)
    var = jnp.mean((x - mean) ** 2, axis=-1, keepdims=True)
    return (x - mean) * jax.lax.rsqrt(var + eps) * g + b


def _softmax_last(x):
    x = x - jnp.max(x, axis=-1, keepdims=True)
    e = jnp.exp(x)
    return e * pl.reciprocal(jnp.sum(e, axis=-1, keepdims=True), approx=True)


# --------------------- Pallas kernel: fused GNN encoder ----------------------
def fused_encoder_kernel(x_ref, bias_ref, onehot_ref,
                         wqkv_ref, wo_ref, w1_ref, w2_ref,
                         embk_ref, embv_ref, vec_ref, lw_ref,
                         out_ref,
                         *, nlayers, heads, d_k, d_v, vocab, use_all_enc_layers):
    x = x_ref[...]                    # (BL, D)   batch folded into rows
    bias = bias_ref[...]              # (BL, BL)  additive: 0 valid / -1e18 pad+cross-batch
    onehot = onehot_ref[...]          # (V, BL, BL) one-hot relative-position buckets

    bl = x.shape[0]
    d_model = x.shape[1]
    d_ff = w1_ref.shape[-1]
    hd_k = heads * d_k
    hd_v = heads * d_v
    qkv_width = 2 * hd_k + hd_v

    bias_b = bias[None, :, :]         # hoisted out of the layer loop (not re-broadcast)

    out = x
    layer_outs = []
    for li in range(nlayers):                         # static layer loop
        vecs_l = vec_ref[li]                          # (3, 128) packed vectors
        bqkv = vecs_l[0:1, 0:qkv_width]               # (1, 96)
        bo = vecs_l[0:1, qkv_width:qkv_width + d_model]
        ln1g = vecs_l[1:2, 0:d_model]
        ln1b = vecs_l[1:2, d_model:2 * d_model]
        ln2g = vecs_l[1:2, 2 * d_model:3 * d_model]
        ln2b = vecs_l[1:2, 3 * d_model:4 * d_model]
        b1 = vecs_l[2:3, 0:d_ff]
        b2 = vecs_l[2:3, d_ff:d_ff + d_model]

        # Fused QKV projection (1/sqrt(d_k) already folded into the Q block).
        qkv = jnp.dot(out, wqkv_ref[li], preferred_element_type=jnp.float32) + bqkv
        q = qkv[:, 0:hd_k]
        k = qkv[:, hd_k:2 * hd_k]
        v = qkv[:, 2 * hd_k:2 * hd_k + hd_v]

        qh = jnp.transpose(q.reshape(bl, heads, d_k), (1, 0, 2))   # (H, BL, dk)
        kh = jnp.transpose(k.reshape(bl, heads, d_k), (1, 0, 2))   # (H, BL, dk)
        vh = jnp.transpose(v.reshape(bl, heads, d_v), (1, 0, 2))   # (H, BL, dv)

        # content scores
        scores = jnp.einsum('hld,hmd->hlm', qh, kh,
                            preferred_element_type=jnp.float32)    # (H, BL, BL)

        # relative-position key scores: vocab-factored, unrolled over V (VPU FMAs)
        q_voc = jnp.einsum('hld,dv->hlv', qh, embk_ref[li],
                           preferred_element_type=jnp.float32)     # (H, BL, V)
        for vv in range(vocab):
            scores = scores + q_voc[:, :, vv:vv + 1] * onehot[vv][None, :, :]

        scores = scores + bias_b                 # key padding + cross-batch block mask
        attn = _softmax_last(scores)             # dropout = identity (eval)

        # content context
        ctx = jnp.einsum('hlm,hmd->hld', attn, vh,
                         preferred_element_type=jnp.float32)       # (H, BL, dv)
        # relative-position value term, unrolled over V
        emb_v_l = embv_ref[li]                                     # (V, dv)
        for vv in range(vocab):
            w_v = jnp.sum(attn * onehot[vv][None, :, :],
                          axis=-1, keepdims=True)                  # (H, BL, 1)
            ctx = ctx + w_v * emb_v_l[vv:vv + 1, :][None, :, :]

        context = jnp.transpose(ctx, (1, 0, 2)).reshape(bl, hd_v)  # (BL, H*dv)
        attn_out = jnp.dot(context, wo_ref[li],
                           preferred_element_type=jnp.float32) + bo

        # out = LayerNorm(dropout(context) + inputs)   (post-LN attention residual)
        h1 = _layer_norm(attn_out + out, ln1g, ln1b)

        # PositionwiseFeedForward: w2(relu(w1(LN(h1)))) + h1  (pre-LN FFN residual)
        h2 = _layer_norm(h1, ln2g, ln2b)
        inter = jnp.maximum(
            jnp.dot(h2, w1_ref[li], preferred_element_type=jnp.float32) + b1, 0.0)
        ff = jnp.dot(inter, w2_ref[li], preferred_element_type=jnp.float32) + b2
        out = ff + h1

        layer_outs.append(out)
        out_ref[li] = out                        # per-layer output slab rows

    if use_all_enc_layers:
        # layer_scores = Linear(D->1, no bias) over each layer output, softmax
        # across layers; done without concatenating width-1 lane columns.
        lw = lw_ref[...]                                           # (1, D)
        s = [jnp.sum(lo * lw, axis=-1, keepdims=True) for lo in layer_outs]  # (BL,1) each
        m = s[0]
        for sn in s[1:]:
            m = jnp.maximum(m, sn)
        e = [jnp.exp(sn - m) for sn in s]
        denom = e[0]
        for en in e[1:]:
            denom = denom + en
        inv = pl.reciprocal(denom, approx=True)
        mem = (e[0] * inv) * layer_outs[0]
        for n in range(1, nlayers):
            mem = mem + (e[n] * inv) * layer_outs[n]
        out_ref[nlayers] = mem
    else:
        out_ref[nlayers] = layer_outs[-1]


# ------------------------------ parameters (glue) ----------------------------
def init_params(key):
    def lin(k, out_f, in_f, scale=0.05):
        k1, k2 = jax.random.split(k)
        w = jax.random.normal(k1, (out_f, in_f), jnp.float32) * scale   # PyTorch layout
        b = jax.random.normal(k2, (1, out_f), jnp.float32) * scale
        return w, b

    params = {'layers': []}
    keys = jax.random.split(key, NLAYERS + 1)
    for i in range(NLAYERS):
        ks = jax.random.split(keys[i], 8)
        wq, bq = lin(ks[0], HEADS * D_K, D_MODEL)
        wk, bk = lin(ks[1], HEADS * D_K, D_MODEL)
        wv, bv = lin(ks[2], HEADS * D_V, D_MODEL)
        wo, bo = lin(ks[3], D_MODEL, HEADS * D_V)
        w1, b1 = lin(ks[4], D_FF, D_MODEL)
        w2, b2 = lin(ks[5], D_MODEL, D_FF)
        emb_k = jax.random.normal(ks[6], (VOCAB, D_K), jnp.float32) * 0.05
        emb_v = jax.random.normal(ks[7], (VOCAB, D_V), jnp.float32) * 0.05
        params['layers'].append(dict(
            wq=wq, bq=bq, wk=wk, bk=bk, wv=wv, bv=bv, wo=wo, bo=bo,
            w1=w1, b1=b1, w2=w2, b2=b2,
            ln1_g=jnp.ones((1, D_MODEL), jnp.float32),
            ln1_b=jnp.zeros((1, D_MODEL), jnp.float32),
            ln2_g=jnp.ones((1, D_MODEL), jnp.float32),
            ln2_b=jnp.zeros((1, D_MODEL), jnp.float32),
            emb_k=emb_k, emb_v=emb_v))
    # GNNEncoder.layer_weights : nn.Linear(input_size, 1, bias=False) -> weight (1, D)
    params['layer_weights'] = jax.random.normal(keys[-1], (1, D_MODEL), jnp.float32) * 0.05
    return params


def pack_params(params):
    """Fuse QKV, pre-transpose Linear weights to (in,out), fold 1/sqrt(d_k) into
    Wq/bq, and pack every per-layer vector into one (NL, 3, 128) slab."""
    # Packing assumptions for the 128-lane vector slab (hold for this config).
    assert 2 * HEADS * D_K + HEADS * D_V + D_MODEL == 128   # row 0: b_qkv | b_o
    assert 4 * D_MODEL == 128                               # row 1: LN params
    assert D_FF + D_MODEL <= 128                            # row 2: b1 | b2 | pad

    layers = params['layers']
    scale = 1.0 / math.sqrt(D_K)
    w_qkv, w_o, w_ff1, w_ff2, emb_kT, emb_v, vec_rows = [], [], [], [], [], [], []
    pad = jnp.zeros((128 - D_FF - D_MODEL,), jnp.float32)
    for lp in layers:
        wq_t = lp['wq'].T * scale                      # fold query scaling into Wq
        bq = lp['bq'][0] * scale
        w_qkv.append(jnp.concatenate([wq_t, lp['wk'].T, lp['wv'].T], axis=1))  # (D, 96)
        bqkv = jnp.concatenate([bq, lp['bk'][0], lp['bv'][0]])                  # (96,)
        w_o.append(lp['wo'].T)                          # (H*dv, D)
        w_ff1.append(lp['w1'].T)                        # (D, d_ff)
        w_ff2.append(lp['w2'].T)                        # (d_ff, D)
        emb_kT.append(lp['emb_k'].T)                    # (d_k, V)
        emb_v.append(lp['emb_v'])                       # (V, d_v)
        row0 = jnp.concatenate([bqkv, lp['bo'][0]])
        row1 = jnp.concatenate([lp['ln1_g'][0], lp['ln1_b'][0],
                                lp['ln2_g'][0], lp['ln2_b'][0]])
        row2 = jnp.concatenate([lp['b1'][0], lp['b2'][0], pad])
        vec_rows.append(jnp.stack([row0, row1, row2]))
    return {
        'w_qkv': jnp.stack(w_qkv),                      # (NL, D, 3*H*dk)
        'w_o': jnp.stack(w_o),                          # (NL, H*dv, D)
        'w_ff1': jnp.stack(w_ff1),                      # (NL, D, d_ff)
        'w_ff2': jnp.stack(w_ff2),                      # (NL, d_ff, D)
        'emb_kT': jnp.stack(emb_kT),                    # (NL, d_k, V)
        'emb_v': jnp.stack(emb_v),                      # (NL, V, d_v)
        'vecs': jnp.stack(vec_rows),                    # (NL, 3, 128)
        'lw': params['layer_weights'],                  # (1, D)
    }


# -------------------------------- wrapper ------------------------------------
@jax.jit
def gnn_encoder_forward(x, lengths, packed):
    Bx, Lx, Dx = x.shape
    BL = Bx * Lx
    x_flat = x.reshape(BL, Dx)

    # Block-diagonal additive bias: 0 for (same batch AND valid key), else -1e18.
    idx = jnp.arange(BL)
    batch_id = idx // Lx
    pos = idx % Lx
    key_valid = pos < lengths[batch_id]                              # (BL,)
    same_batch = batch_id[:, None] == batch_id[None, :]              # (BL, BL)
    bias = jnp.where(same_batch & key_valid[None, :], 0.0, NEG_INF).astype(jnp.float32)

    # Relative-position one-hot buckets, (V, BL, BL).  Diagonal (same-batch) blocks
    # equal the within-sequence buckets; cross-batch entries are masked out anyway.
    r = jnp.arange(BL)
    dist = jnp.clip(r[None, :] - r[:, None], -MAX_REL_POS, MAX_REL_POS)
    bucket = dist + MAX_REL_POS if USE_NEG_DIST else jnp.abs(dist)
    onehot = (bucket[None, :, :] ==
              jnp.arange(VOCAB)[:, None, None]).astype(jnp.float32)

    kernel = partial(fused_encoder_kernel, nlayers=NLAYERS, heads=HEADS,
                     d_k=D_K, d_v=D_V, vocab=VOCAB,
                     use_all_enc_layers=USE_ALL_ENC_LAYERS)

    # Single invocation (no grid): every operand lives whole in VMEM; one output
    # slab holds the NLAYERS per-layer outputs plus the combined memory bank.
    out_all = pl.pallas_call(
        kernel,
        out_shape=jax.ShapeDtypeStruct((NLAYERS + 1, BL, Dx), jnp.float32),
    )(x_flat, bias, onehot,
      packed['w_qkv'], packed['w_o'], packed['w_ff1'], packed['w_ff2'],
      packed['emb_kT'], packed['emb_v'], packed['vecs'], packed['lw'])

    memory_bank = out_all[NLAYERS].reshape(Bx, Lx, Dx)
    layer_outputs = [out_all[i].reshape(Bx, Lx, Dx) for i in range(NLAYERS)]
    return memory_bank, layer_outputs


# ----------------------------------- main ------------------------------------
if __name__ == "__main__":
    key = jax.random.PRNGKey(0)
    k_x, k_p = jax.random.split(key)
    x = jax.random.normal(k_x, (B, L, D_MODEL), jnp.float32)
    input_len = jnp.array([L, L - 3], jnp.int32)

    params = init_params(k_p)
    packed = pack_params(params)

    memory_bank, layer_outputs = gnn_encoder_forward(x, input_len, packed)
    jax.block_until_ready(memory_bank)

    assert memory_bank.shape == (B, L, D_MODEL)
    assert len(layer_outputs) == NLAYERS
    assert all(lo.shape == (B, L, D_MODEL) for lo in layer_outputs)
    assert bool(jnp.all(jnp.isfinite(memory_bank)))
    print("KERNEL_OK")
</pallas_src>

<mosaic_0001>
module attributes {stable_mosaic.version = 11 : i64} {
  func.func @fused_encoder_kernel(%arg0: memref<16x32xf32, #tpu.memory_space<vmem>>, %arg1: memref<16x16xf32, #tpu.memory_space<vmem>>, %arg2: memref<9x16x16xf32, #tpu.memory_space<vmem>>, %arg3: memref<2x32x96xf32, #tpu.memory_space<vmem>>, %arg4: memref<2x32x32xf32, #tpu.memory_space<vmem>>, %arg5: memref<2x32x64xf32, #tpu.memory_space<vmem>>, %arg6: memref<2x64x32xf32, #tpu.memory_space<vmem>>, %arg7: memref<2x8x9xf32, #tpu.memory_space<vmem>>, %arg8: memref<2x9x8xf32, #tpu.memory_space<vmem>>, %arg9: memref<2x3x128xf32, #tpu.memory_space<vmem>>, %arg10: memref<1x32xf32, #tpu.memory_space<vmem>>, %arg11: memref<3x16x32xf32, #tpu.memory_space<vmem>>) attributes {dimension_semantics = [], scalar_prefetch = 0 : i64, scratch_operands = 0 : i64, tpu.core_type = #tpu.core_type<tc>} {
    %c0 = arith.constant 0 : index
    %c0_0 = arith.constant 0 : index
    %0 = vector.load %arg0[%c0, %c0_0] : memref<16x32xf32, #tpu.memory_space<vmem>>, vector<16x32xf32>
    %c0_1 = arith.constant 0 : index
    %c0_2 = arith.constant 0 : index
    %1 = vector.load %arg1[%c0_1, %c0_2] : memref<16x16xf32, #tpu.memory_space<vmem>>, vector<16x16xf32>
    %c0_3 = arith.constant 0 : index
    %c0_4 = arith.constant 0 : index
    %c0_5 = arith.constant 0 : index
    %2 = vector.load %arg2[%c0_3, %c0_4, %c0_5] : memref<9x16x16xf32, #tpu.memory_space<vmem>>, vector<9x16x16xf32>
    %3 = vector.shape_cast %1 : vector<16x16xf32> to vector<1x16x16xf32>
    %c0_6 = arith.constant 0 : index
    %c0_7 = arith.constant 0 : index
    %c0_8 = arith.constant 0 : index
    %4 = vector.load %arg9[%c0_6, %c0_7, %c0_8] : memref<2x3x128xf32, #tpu.memory_space<vmem>>, vector<1x3x128xf32>
    %5 = vector.shape_cast %4 : vector<1x3x128xf32> to vector<3x128xf32>
    %6 = vector.extract_strided_slice %5 {offsets = [0, 0], sizes = [1, 96], strides = [1, 1]} : vector<3x128xf32> to vector<1x96xf32>
    %7 = vector.extract_strided_slice %5 {offsets = [0, 96], sizes = [1, 32], strides = [1, 1]} : vector<3x128xf32> to vector<1x32xf32>
    %8 = vector.extract_strided_slice %5 {offsets = [1, 0], sizes = [1, 32], strides = [1, 1]} : vector<3x128xf32> to vector<1x32xf32>
    %9 = vector.extract_strided_slice %5 {offsets = [1, 32], sizes = [1, 32], strides = [1, 1]} : vector<3x128xf32> to vector<1x32xf32>
    %10 = vector.extract_strided_slice %5 {offsets = [1, 64], sizes = [1, 32], strides = [1, 1]} : vector<3x128xf32> to vector<1x32xf32>
    %11 = vector.extract_strided_slice %5 {offsets = [1, 96], sizes = [1, 32], strides = [1, 1]} : vector<3x128xf32> to vector<1x32xf32>
    %12 = vector.extract_strided_slice %5 {offsets = [2, 0], sizes = [1, 64], strides = [1, 1]} : vector<3x128xf32> to vector<1x64xf32>
    %13 = vector.extract_strided_slice %5 {offsets = [2, 64], sizes = [1, 32], strides = [1, 1]} : vector<3x128xf32> to vector<1x32xf32>
    %c0_9 = arith.constant 0 : index
    %c0_10 = arith.constant 0 : index
    %c0_11 = arith.constant 0 : index
    %14 = vector.load %arg3[%c0_9, %c0_10, %c0_11] : memref<2x32x96xf32, #tpu.memory_space<vmem>>, vector<1x32x96xf32>
    %15 = vector.shape_cast %14 : vector<1x32x96xf32> to vector<32x96xf32>
    %cst = arith.constant dense<0.000000e+00> : vector<16x96xf32>
    %16 = tpu.matmul %0, %15, %cst {dimension_numbers = #tpu.dot_dimension_numbers<[1], [0], [0], [1], [0, 0, 1, 1], [], []>} : vector<16x32xf32>, vector<32x96xf32>, vector<16x96xf32> -> vector<16x96xf32>
    %17 = vector.broadcast %6 : vector<1x96xf32> to vector<16x96xf32>
    %18 = arith.addf %16, %17 : vector<16x96xf32>
    %19 = vector.extract_strided_slice %18 {offsets = [0, 0], sizes = [16, 32], strides = [1, 1]} : vector<16x96xf32> to vector<16x32xf32>
    %20 = vector.extract_strided_slice %18 {offsets = [0, 32], sizes = [16, 32], strides = [1, 1]} : vector<16x96xf32> to vector<16x32xf32>
    %21 = vector.extract_strided_slice %18 {offsets = [0, 64], sizes = [16, 32], strides = [1, 1]} : vector<16x96xf32> to vector<16x32xf32>
    %22 = vector.shape_cast %19 : vector<16x32xf32> to vector<16x4x8xf32>
    %23 = tpu.transpose %22, [1, 0, 2] : vector<16x4x8xf32> -> vector<4x16x8xf32>
    %24 = vector.shape_cast %20 : vector<16x32xf32> to vector<16x4x8xf32>
    %25 = tpu.transpose %24, [1, 0, 2] : vector<16x4x8xf32> -> vector<4x16x8xf32>
    %26 = vector.shape_cast %21 : vector<16x32xf32> to vector<16x4x8xf32>
    %27 = tpu.transpose %26, [1, 0, 2] : vector<16x4x8xf32> -> vector<4x16x8xf32>
    "tpu.trace_start"() <{level = 10 : i32, message = "hld,hmd->hlm"}> : () -> ()
    %cst_12 = arith.constant dense<0.000000e+00> : vector<4x16x16xf32>
    %28 = tpu.matmul %23, %25, %cst_12 {dimension_numbers = #tpu.dot_dimension_numbers<[2], [2], [1], [1], [0, 0, 0, 1, 1, 1], [0], [0]>} : vector<4x16x8xf32>, vector<4x16x8xf32>, vector<4x16x16xf32> -> vector<4x16x16xf32>
    "tpu.trace_stop"() : () -> ()
    %c0_13 = arith.constant 0 : index
    %c0_14 = arith.constant 0 : index
    %c0_15 = arith.constant 0 : index
    %29 = vector.load %arg7[%c0_13, %c0_14, %c0_15] : memref<2x8x9xf32, #tpu.memory_space<vmem>>, vector<1x8x9xf32>
    %30 = vector.shape_cast %29 : vector<1x8x9xf32> to vector<8x9xf32>
    "tpu.trace_start"() <{level = 10 : i32, message = "hld,dv->hlv"}> : () -> ()
    %cst_16 = arith.constant dense<0.000000e+00> : vector<4x16x9xf32>
    %31 = tpu.matmul %23, %30, %cst_16 {dimension_numbers = #tpu.dot_dimension_numbers<[2], [0], [0, 1], [1], [0, 0, 0, 1, 1, 1], [], []>} : vector<4x16x8xf32>, vector<8x9xf32>, vector<4x16x9xf32> -> vector<4x16x9xf32>
    "tpu.trace_stop"() : () -> ()
    %32 = vector.extract_strided_slice %31 {offsets = [0, 0, 0], sizes = [4, 16, 1], strides = [1, 1, 1]} : vector<4x16x9xf32> to vector<4x16x1xf32>
    %33 = vector.extract_strided_slice %2 {offsets = [0, 0, 0], sizes = [1, 16, 16], strides = [1, 1, 1]} : vector<9x16x16xf32> to vector<1x16x16xf32>
    %34 = vector.shape_cast %33 : vector<1x16x16xf32> to vector<16x16xf32>
    %35 = vector.shape_cast %34 : vector<16x16xf32> to vector<1x16x16xf32>
    %36 = vector.broadcast %32 : vector<4x16x1xf32> to vector<4x16x16xf32>
    %37 = vector.broadcast %35 : vector<1x16x16xf32> to vector<4x16x16xf32>
    %38 = arith.mulf %36, %37 : vector<4x16x16xf32>
    %39 = arith.addf %28, %38 : vector<4x16x16xf32>
    %40 = vector.extract_strided_slice %31 {offsets = [0, 0, 1], sizes = [4, 16, 1], strides = [1, 1, 1]} : vector<4x16x9xf32> to vector<4x16x1xf32>
    %41 = vector.extract_strided_slice %2 {offsets = [1, 0, 0], sizes = [1, 16, 16], strides = [1, 1, 1]} : vector<9x16x16xf32> to vector<1x16x16xf32>
    %42 = vector.shape_cast %41 : vector<1x16x16xf32> to vector<16x16xf32>
    %43 = vector.shape_cast %42 : vector<16x16xf32> to vector<1x16x16xf32>
    %44 = vector.broadcast %40 : vector<4x16x1xf32> to vector<4x16x16xf32>
    %45 = vector.broadcast %43 : vector<1x16x16xf32> to vector<4x16x16xf32>
    %46 = arith.mulf %44, %45 : vector<4x16x16xf32>
    %47 = arith.addf %39, %46 : vector<4x16x16xf32>
    %48 = vector.extract_strided_slice %31 {offsets = [0, 0, 2], sizes = [4, 16, 1], strides = [1, 1, 1]} : vector<4x16x9xf32> to vector<4x16x1xf32>
    %49 = vector.extract_strided_slice %2 {offsets = [2, 0, 0], sizes = [1, 16, 16], strides = [1, 1, 1]} : vector<9x16x16xf32> to vector<1x16x16xf32>
    %50 = vector.shape_cast %49 : vector<1x16x16xf32> to vector<16x16xf32>
    %51 = vector.shape_cast %50 : vector<16x16xf32> to vector<1x16x16xf32>
    %52 = vector.broadcast %48 : vector<4x16x1xf32> to vector<4x16x16xf32>
    %53 = vector.broadcast %51 : vector<1x16x16xf32> to vector<4x16x16xf32>
    %54 = arith.mulf %52, %53 : vector<4x16x16xf32>
    %55 = arith.addf %47, %54 : vector<4x16x16xf32>
    %56 = vector.extract_strided_slice %31 {offsets = [0, 0, 3], sizes = [4, 16, 1], strides = [1, 1, 1]} : vector<4x16x9xf32> to vector<4x16x1xf32>
    %57 = vector.extract_strided_slice %2 {offsets = [3, 0, 0], sizes = [1, 16, 16], strides = [1, 1, 1]} : vector<9x16x16xf32> to vector<1x16x16xf32>
    %58 = vector.shape_cast %57 : vector<1x16x16xf32> to vector<16x16xf32>
    %59 = vector.shape_cast %58 : vector<16x16xf32> to vector<1x16x16xf32>
    %60 = vector.broadcast %56 : vector<4x16x1xf32> to vector<4x16x16xf32>
    %61 = vector.broadcast %59 : vector<1x16x16xf32> to vector<4x16x16xf32>
    %62 = arith.mulf %60, %61 : vector<4x16x16xf32>
    %63 = arith.addf %55, %62 : vector<4x16x16xf32>
    %64 = vector.extract_strided_slice %31 {offsets = [0, 0, 4], sizes = [4, 16, 1], strides = [1, 1, 1]} : vector<4x16x9xf32> to vector<4x16x1xf32>
    %65 = vector.extract_strided_slice %2 {offsets = [4, 0, 0], sizes = [1, 16, 16], strides = [1, 1, 1]} : vector<9x16x16xf32> to vector<1x16x16xf32>
    %66 = vector.shape_cast %65 : vector<1x16x16xf32> to vector<16x16xf32>
    %67 = vector.shape_cast %66 : vector<16x16xf32> to vector<1x16x16xf32>
    %68 = vector.broadcast %64 : vector<4x16x1xf32> to vector<4x16x16xf32>
    %69 = vector.broadcast %67 : vector<1x16x16xf32> to vector<4x16x16xf32>
    %70 = arith.mulf %68, %69 : vector<4x16x16xf32>
    %71 = arith.addf %63, %70 : vector<4x16x16xf32>
    %72 = vector.extract_strided_slice %31 {offsets = [0, 0, 5], sizes = [4, 16, 1], strides = [1, 1, 1]} : vector<4x16x9xf32> to vector<4x16x1xf32>
    %73 = vector.extract_strided_slice %2 {offsets = [5, 0, 0], sizes = [1, 16, 16], strides = [1, 1, 1]} : vector<9x16x16xf32> to vector<1x16x16xf32>
    %74 = vector.shape_cast %73 : vector<1x16x16xf32> to vector<16x16xf32>
    %75 = vector.shape_cast %74 : vector<16x16xf32> to vector<1x16x16xf32>
    %76 = vector.broadcast %72 : vector<4x16x1xf32> to vector<4x16x16xf32>
    %77 = vector.broadcast %75 : vector<1x16x16xf32> to vector<4x16x16xf32>
    %78 = arith.mulf %76, %77 : vector<4x16x16xf32>
    %79 = arith.addf %71, %78 : vector<4x16x16xf32>
    %80 = vector.extract_strided_slice %31 {offsets = [0, 0, 6], sizes = [4, 16, 1], strides = [1, 1, 1]} : vector<4x16x9xf32> to vector<4x16x1xf32>
    %81 = vector.extract_strided_slice %2 {offsets = [6, 0, 0], sizes = [1, 16, 16], strides = [1, 1, 1]} : vector<9x16x16xf32> to vector<1x16x16xf32>
    %82 = vector.shape_cast %81 : vector<1x16x16xf32> to vector<16x16xf32>
    %83 = vector.shape_cast %82 : vector<16x16xf32> to vector<1x16x16xf32>
    %84 = vector.broadcast %80 : vector<4x16x1xf32> to vector<4x16x16xf32>
    %85 = vector.broadcast %83 : vector<1x16x16xf32> to vector<4x16x16xf32>
    %86 = arith.mulf %84, %85 : vector<4x16x16xf32>
    %87 = arith.addf %79, %86 : vector<4x16x16xf32>
    %88 = vector.extract_strided_slice %31 {offsets = [0, 0, 7], sizes = [4, 16, 1], strides = [1, 1, 1]} : vector<4x16x9xf32> to vector<4x16x1xf32>
    %89 = vector.extract_strided_slice %2 {offsets = [7, 0, 0], sizes = [1, 16, 16], strides = [1, 1, 1]} : vector<9x16x16xf32> to vector<1x16x16xf32>
    %90 = vector.shape_cast %89 : vector<1x16x16xf32> to vector<16x16xf32>
    %91 = vector.shape_cast %90 : vector<16x16xf32> to vector<1x16x16xf32>
    %92 = vector.broadcast %88 : vector<4x16x1xf32> to vector<4x16x16xf32>
    %93 = vector.broadcast %91 : vector<1x16x16xf32> to vector<4x16x16xf32>
    %94 = arith.mulf %92, %93 : vector<4x16x16xf32>
    %95 = arith.addf %87, %94 : vector<4x16x16xf32>
    %96 = vector.extract_strided_slice %31 {offsets = [0, 0, 8], sizes = [4, 16, 1], strides = [1, 1, 1]} : vector<4x16x9xf32> to vector<4x16x1xf32>
    %97 = vector.extract_strided_slice %2 {offsets = [8, 0, 0], sizes = [1, 16, 16], strides = [1, 1, 1]} : vector<9x16x16xf32> to vector<1x16x16xf32>
    %98 = vector.shape_cast %97 : vector<1x16x16xf32> to vector<16x16xf32>
    %99 = vector.shape_cast %98 : vector<16x16xf32> to vector<1x16x16xf32>
    %100 = vector.broadcast %96 : vector<4x16x1xf32> to vector<4x16x16xf32>
    %101 = vector.broadcast %99 : vector<1x16x16xf32> to vector<4x16x16xf32>
    %102 = arith.mulf %100, %101 : vector<4x16x16xf32>
    %103 = arith.addf %95, %102 : vector<4x16x16xf32>
    %104 = vector.broadcast %3 : vector<1x16x16xf32> to vector<4x16x16xf32>
    %105 = arith.addf %103, %104 : vector<4x16x16xf32>
    %cst_17 = arith.constant dense<0xFF800000> : vector<4x16xf32>
    %106 = vector.multi_reduction <maximumf>, %105, %cst_17 [2] : vector<4x16x16xf32> to vector<4x16xf32>
    %107 = vector.shape_cast %106 : vector<4x16xf32> to vector<4x16x1xf32>
    %108 = vector.broadcast %107 : vector<4x16x1xf32> to vector<4x16x16xf32>
    %109 = arith.subf %105, %108 : vector<4x16x16xf32>
    %110 = math.exp %109 : vector<4x16x16xf32>
    %cst_18 = arith.constant dense<0.000000e+00> : vector<4x16xf32>
    %111 = vector.multi_reduction <add>, %110, %cst_18 [2] : vector<4x16x16xf32> to vector<4x16xf32>
    %112 = vector.shape_cast %111 : vector<4x16xf32> to vector<4x16x1xf32>
    %113 = tpu.reciprocal %112 {approx = true} : vector<4x16x1xf32> -> vector<4x16x1xf32>
    %114 = vector.broadcast %113 : vector<4x16x1xf32> to vector<4x16x16xf32>
    %115 = arith.mulf %110, %114 : vector<4x16x16xf32>
    "tpu.trace_start"() <{level = 10 : i32, message = "hlm,hmd->hld"}> : () -> ()
    %cst_19 = arith.constant dense<0.000000e+00> : vector<4x16x8xf32>
    %116 = tpu.matmul %115, %27, %cst_19 {dimension_numbers = #tpu.dot_dimension_numbers<[2], [1], [1], [2], [0, 0, 0, 1, 1, 2], [0], [0]>} : vector<4x16x16xf32>, vector<4x16x8xf32>, vector<4x16x8xf32> -> vector<4x16x8xf32>
    "tpu.trace_stop"() : () -> ()
    %c0_20 = arith.constant 0 : index
    %c0_21 = arith.constant 0 : index
    %c0_22 = arith.constant 0 : index
    %117 = vector.load %arg8[%c0_20, %c0_21, %c0_22] : memref<2x9x8xf32, #tpu.memory_space<vmem>>, vector<1x9x8xf32>
    %118 = vector.shape_cast %117 : vector<1x9x8xf32> to vector<9x8xf32>
    %119 = vector.extract_strided_slice %2 {offsets = [0, 0, 0], sizes = [1, 16, 16], strides = [1, 1, 1]} : vector<9x16x16xf32> to vector<1x16x16xf32>
    %120 = vector.shape_cast %119 : vector<1x16x16xf32> to vector<16x16xf32>
    %121 = vector.shape_cast %120 : vector<16x16xf32> to vector<1x16x16xf32>
    %122 = vector.broadcast %121 : vector<1x16x16xf32> to vector<4x16x16xf32>
    %123 = arith.mulf %115, %122 : vector<4x16x16xf32>
    %cst_23 = arith.constant dense<0.000000e+00> : vector<4x16xf32>
    %124 = vector.multi_reduction <add>, %123, %cst_23 [2] : vector<4x16x16xf32> to vector<4x16xf32>
    %125 = vector.shape_cast %124 : vector<4x16xf32> to vector<4x16x1xf32>
    %126 = vector.extract_strided_slice %118 {offsets = [0, 0], sizes = [1, 8], strides = [1, 1]} : vector<9x8xf32> to vector<1x8xf32>
    %127 = vector.shape_cast %126 : vector<1x8xf32> to vector<1x1x8xf32>
    %128 = vector.broadcast %125 : vector<4x16x1xf32> to vector<4x16x8xf32>
    %129 = vector.broadcast %127 : vector<1x1x8xf32> to vector<4x16x8xf32>
    %130 = arith.mulf %128, %129 : vector<4x16x8xf32>
    %131 = arith.addf %116, %130 : vector<4x16x8xf32>
    %132 = vector.extract_strided_slice %2 {offsets = [1, 0, 0], sizes = [1, 16, 16], strides = [1, 1, 1]} : vector<9x16x16xf32> to vector<1x16x16xf32>
    %133 = vector.shape_cast %132 : vector<1x16x16xf32> to vector<16x16xf32>
    %134 = vector.shape_cast %133 : vector<16x16xf32> to vector<1x16x16xf32>
    %135 = vector.broadcast %134 : vector<1x16x16xf32> to vector<4x16x16xf32>
    %136 = arith.mulf %115, %135 : vector<4x16x16xf32>
    %cst_24 = arith.constant dense<0.000000e+00> : vector<4x16xf32>
    %137 = vector.multi_reduction <add>, %136, %cst_24 [2] : vector<4x16x16xf32> to vector<4x16xf32>
    %138 = vector.shape_cast %137 : vector<4x16xf32> to vector<4x16x1xf32>
    %139 = vector.extract_strided_slice %118 {offsets = [1, 0], sizes = [1, 8], strides = [1, 1]} : vector<9x8xf32> to vector<1x8xf32>
    %140 = vector.shape_cast %139 : vector<1x8xf32> to vector<1x1x8xf32>
    %141 = vector.broadcast %138 : vector<4x16x1xf32> to vector<4x16x8xf32>
    %142 = vector.broadcast %140 : vector<1x1x8xf32> to vector<4x16x8xf32>
    %143 = arith.mulf %141, %142 : vector<4x16x8xf32>
    %144 = arith.addf %131, %143 : vector<4x16x8xf32>
    %145 = vector.extract_strided_slice %2 {offsets = [2, 0, 0], sizes = [1, 16, 16], strides = [1, 1, 1]} : vector<9x16x16xf32> to vector<1x16x16xf32>
    %146 = vector.shape_cast %145 : vector<1x16x16xf32> to vector<16x16xf32>
    %147 = vector.shape_cast %146 : vector<16x16xf32> to vector<1x16x16xf32>
    %148 = vector.broadcast %147 : vector<1x16x16xf32> to vector<4x16x16xf32>
    %149 = arith.mulf %115, %148 : vector<4x16x16xf32>
    %cst_25 = arith.constant dense<0.000000e+00> : vector<4x16xf32>
    %150 = vector.multi_reduction <add>, %149, %cst_25 [2] : vector<4x16x16xf32> to vector<4x16xf32>
    %151 = vector.shape_cast %150 : vector<4x16xf32> to vector<4x16x1xf32>
    %152 = vector.extract_strided_slice %118 {offsets = [2, 0], sizes = [1, 8], strides = [1, 1]} : vector<9x8xf32> to vector<1x8xf32>
    %153 = vector.shape_cast %152 : vector<1x8xf32> to vector<1x1x8xf32>
    %154 = vector.broadcast %151 : vector<4x16x1xf32> to vector<4x16x8xf32>
    %155 = vector.broadcast %153 : vector<1x1x8xf32> to vector<4x16x8xf32>
    %156 = arith.mulf %154, %155 : vector<4x16x8xf32>
    %157 = arith.addf %144, %156 : vector<4x16x8xf32>
    %158 = vector.extract_strided_slice %2 {offsets = [3, 0, 0], sizes = [1, 16, 16], strides = [1, 1, 1]} : vector<9x16x16xf32> to vector<1x16x16xf32>
    %159 = vector.shape_cast %158 : vector<1x16x16xf32> to vector<16x16xf32>
    %160 = vector.shape_cast %159 : vector<16x16xf32> to vector<1x16x16xf32>
    %161 = vector.broadcast %160 : vector<1x16x16xf32> to vector<4x16x16xf32>
    %162 = arith.mulf %115, %161 : vector<4x16x16xf32>
    %cst_26 = arith.constant dense<0.000000e+00> : vector<4x16xf32>
    %163 = vector.multi_reduction <add>, %162, %cst_26 [2] : vector<4x16x16xf32> to vector<4x16xf32>
    %164 = vector.shape_cast %163 : vector<4x16xf32> to vector<4x16x1xf32>
    %165 = vector.extract_strided_slice %118 {offsets = [3, 0], sizes = [1, 8], strides = [1, 1]} : vector<9x8xf32> to vector<1x8xf32>
    %166 = vector.shape_cast %165 : vector<1x8xf32> to vector<1x1x8xf32>
    %167 = vector.broadcast %164 : vector<4x16x1xf32> to vector<4x16x8xf32>
    %168 = vector.broadcast %166 : vector<1x1x8xf32> to vector<4x16x8xf32>
    %169 = arith.mulf %167, %168 : vector<4x16x8xf32>
    %170 = arith.addf %157, %169 : vector<4x16x8xf32>
    %171 = vector.extract_strided_slice %2 {offsets = [4, 0, 0], sizes = [1, 16, 16], strides = [1, 1, 1]} : vector<9x16x16xf32> to vector<1x16x16xf32>
    %172 = vector.shape_cast %171 : vector<1x16x16xf32> to vector<16x16xf32>
    %173 = vector.shape_cast %172 : vector<16x16xf32> to vector<1x16x16xf32>
    %174 = vector.broadcast %173 : vector<1x16x16xf32> to vector<4x16x16xf32>
    %175 = arith.mulf %115, %174 : vector<4x16x16xf32>
    %cst_27 = arith.constant dense<0.000000e+00> : vector<4x16xf32>
    %176 = vector.multi_reduction <add>, %175, %cst_27 [2] : vector<4x16x16xf32> to vector<4x16xf32>
    %177 = vector.shape_cast %176 : vector<4x16xf32> to vector<4x16x1xf32>
    %178 = vector.extract_strided_slice %118 {offsets = [4, 0], sizes = [1, 8], strides = [1, 1]} : vector<9x8xf32> to vector<1x8xf32>
    %179 = vector.shape_cast %178 : vector<1x8xf32> to vector<1x1x8xf32>
    %180 = vector.broadcast %177 : vector<4x16x1xf32> to vector<4x16x8xf32>
    %181 = vector.broadcast %179 : vector<1x1x8xf32> to vector<4x16x8xf32>
    %182 = arith.mulf %180, %181 : vector<4x16x8xf32>
    %183 = arith.addf %170, %182 : vector<4x16x8xf32>
    %184 = vector.extract_strided_slice %2 {offsets = [5, 0, 0], sizes = [1, 16, 16], strides = [1, 1, 1]} : vector<9x16x16xf32> to vector<1x16x16xf32>
    %185 = vector.shape_cast %184 : vector<1x16x16xf32> to vector<16x16xf32>
    %186 = vector.shape_cast %185 : vector<16x16xf32> to vector<1x16x16xf32>
    %187 = vector.broadcast %186 : vector<1x16x16xf32> to vector<4x16x16xf32>
    %188 = arith.mulf %115, %187 : vector<4x16x16xf32>
    %cst_28 = arith.constant dense<0.000000e+00> : vector<4x16xf32>
    %189 = vector.multi_reduction <add>, %188, %cst_28 [2] : vector<4x16x16xf32> to vector<4x16xf32>
    %190 = vector.shape_cast %189 : vector<4x16xf32> to vector<4x16x1xf32>
    %191 = vector.extract_strided_slice %118 {offsets = [5, 0], sizes = [1, 8], strides = [1, 1]} : vector<9x8xf32> to vector<1x8xf32>
    %192 = vector.shape_cast %191 : vector<1x8xf32> to vector<1x1x8xf32>
    %193 = vector.broadcast %190 : vector<4x16x1xf32> to vector<4x16x8xf32>
    %194 = vector.broadcast %192 : vector<1x1x8xf32> to vector<4x16x8xf32>
    %195 = arith.mulf %193, %194 : vector<4x16x8xf32>
    %196 = arith.addf %183, %195 : vector<4x16x8xf32>
    %197 = vector.extract_strided_slice %2 {offsets = [6, 0, 0], sizes = [1, 16, 16], strides = [1, 1, 1]} : vector<9x16x16xf32> to vector<1x16x16xf32>
    %198 = vector.shape_cast %197 : vector<1x16x16xf32> to vector<16x16xf32>
    %199 = vector.shape_cast %198 : vector<16x16xf32> to vector<1x16x16xf32>
    %200 = vector.broadcast %199 : vector<1x16x16xf32> to vector<4x16x16xf32>
    %201 = arith.mulf %115, %200 : vector<4x16x16xf32>
    %cst_29 = arith.constant dense<0.000000e+00> : vector<4x16xf32>
    %202 = vector.multi_reduction <add>, %201, %cst_29 [2] : vector<4x16x16xf32> to vector<4x16xf32>
    %203 = vector.shape_cast %202 : vector<4x16xf32> to vector<4x16x1xf32>
    %204 = vector.extract_strided_slice %118 {offsets = [6, 0], sizes = [1, 8], strides = [1, 1]} : vector<9x8xf32> to vector<1x8xf32>
    %205 = vector.shape_cast %204 : vector<1x8xf32> to vector<1x1x8xf32>
    %206 = vector.broadcast %203 : vector<4x16x1xf32> to vector<4x16x8xf32>
    %207 = vector.broadcast %205 : vector<1x1x8xf32> to vector<4x16x8xf32>
    %208 = arith.mulf %206, %207 : vector<4x16x8xf32>
    %209 = arith.addf %196, %208 : vector<4x16x8xf32>
    %210 = vector.extract_strided_slice %2 {offsets = [7, 0, 0], sizes = [1, 16, 16], strides = [1, 1, 1]} : vector<9x16x16xf32> to vector<1x16x16xf32>
    %211 = vector.shape_cast %210 : vector<1x16x16xf32> to vector<16x16xf32>
    %212 = vector.shape_cast %211 : vector<16x16xf32> to vector<1x16x16xf32>
    %213 = vector.broadcast %212 : vector<1x16x16xf32> to vector<4x16x16xf32>
    %214 = arith.mulf %115, %213 : vector<4x16x16xf32>
    %cst_30 = arith.constant dense<0.000000e+00> : vector<4x16xf32>
    %215 = vector.multi_reduction <add>, %214, %cst_30 [2] : vector<4x16x16xf32> to vector<4x16xf32>
    %216 = vector.shape_cast %215 : vector<4x16xf32> to vector<4x16x1xf32>
    %217 = vector.extract_strided_slice %118 {offsets = [7, 0], sizes = [1, 8], strides = [1, 1]} : vector<9x8xf32> to vector<1x8xf32>
    %218 = vector.shape_cast %217 : vector<1x8xf32> to vector<1x1x8xf32>
    %219 = vector.broadcast %216 : vector<4x16x1xf32> to vector<4x16x8xf32>
    %220 = vector.broadcast %218 : vector<1x1x8xf32> to vector<4x16x8xf32>
    %221 = arith.mulf %219, %220 : vector<4x16x8xf32>
    %222 = arith.addf %209, %221 : vector<4x16x8xf32>
    %223 = vector.extract_strided_slice %2 {offsets = [8, 0, 0], sizes = [1, 16, 16], strides = [1, 1, 1]} : vector<9x16x16xf32> to vector<1x16x16xf32>
    %224 = vector.shape_cast %223 : vector<1x16x16xf32> to vector<16x16xf32>
    %225 = vector.shape_cast %224 : vector<16x16xf32> to vector<1x16x16xf32>
    %226 = vector.broadcast %225 : vector<1x16x16xf32> to vector<4x16x16xf32>
    %227 = arith.mulf %115, %226 : vector<4x16x16xf32>
    %cst_31 = arith.constant dense<0.000000e+00> : vector<4x16xf32>
    %228 = vector.multi_reduction <add>, %227, %cst_31 [2] : vector<4x16x16xf32> to vector<4x16xf32>
    %229 = vector.shape_cast %228 : vector<4x16xf32> to vector<4x16x1xf32>
    %230 = vector.extract_strided_slice %118 {offsets = [8, 0], sizes = [1, 8], strides = [1, 1]} : vector<9x8xf32> to vector<1x8xf32>
    %231 = vector.shape_cast %230 : vector<1x8xf32> to vector<1x1x8xf32>
    %232 = vector.broadcast %229 : vector<4x16x1xf32> to vector<4x16x8xf32>
    %233 = vector.broadcast %231 : vector<1x1x8xf32> to vector<4x16x8xf32>
    %234 = arith.mulf %232, %233 : vector<4x16x8xf32>
    %235 = arith.addf %222, %234 : vector<4x16x8xf32>
    %236 = tpu.transpose %235, [1, 0, 2] : vector<4x16x8xf32> -> vector<16x4x8xf32>
    %237 = vector.shape_cast %236 : vector<16x4x8xf32> to vector<16x32xf32>
    %c0_32 = arith.constant 0 : index
    %c0_33 = arith.constant 0 : index
    %c0_34 = arith.constant 0 : index
    %238 = vector.load %arg4[%c0_32, %c0_33, %c0_34] : memref<2x32x32xf32, #tpu.memory_space<vmem>>, vector<1x32x32xf32>
    %239 = vector.shape_cast %238 : vector<1x32x32xf32> to vector<32x32xf32>
    %cst_35 = arith.constant dense<0.000000e+00> : vector<16x32xf32>
    %240 = tpu.matmul %237, %239, %cst_35 {dimension_numbers = #tpu.dot_dimension_numbers<[1], [0], [0], [1], [0, 0, 1, 1], [], []>} : vector<16x32xf32>, vector<32x32xf32>, vector<16x32xf32> -> vector<16x32xf32>
    %241 = vector.broadcast %7 : vector<1x32xf32> to vector<16x32xf32>
    %242 = arith.addf %240, %241 : vector<16x32xf32>
    %243 = arith.addf %242, %0 : vector<16x32xf32>
    %cst_36 = arith.constant dense<0.000000e+00> : vector<16xf32>
    %244 = vector.multi_reduction <add>, %243, %cst_36 [1] : vector<16x32xf32> to vector<16xf32>
    %245 = vector.shape_cast %244 : vector<16xf32> to vector<16x1xf32>
    %cst_37 = arith.constant 3.200000e+01 : f32
    %246 = vector.broadcast %cst_37 : f32 to vector<16x1xf32>
    %247 = arith.divf %245, %246 : vector<16x1xf32>
    %248 = vector.broadcast %247 : vector<16x1xf32> to vector<16x32xf32>
    %249 = arith.subf %243, %248 : vector<16x32xf32>
    %250 = arith.mulf %249, %249 : vector<16x32xf32>
    %cst_38 = arith.constant dense<0.000000e+00> : vector<16xf32>
    %251 = vector.multi_reduction <add>, %250, %cst_38 [1] : vector<16x32xf32> to vector<16xf32>
    %252 = vector.shape_cast %251 : vector<16xf32> to vector<16x1xf32>
    %cst_39 = arith.constant 3.200000e+01 : f32
    %253 = vector.broadcast %cst_39 : f32 to vector<16x1xf32>
    %254 = arith.divf %252, %253 : vector<16x1xf32>
    %255 = vector.broadcast %247 : vector<16x1xf32> to vector<16x32xf32>
    %256 = arith.subf %243, %255 : vector<16x32xf32>
    %cst_40 = arith.constant 9.99999997E-7 : f32
    %257 = vector.broadcast %cst_40 : f32 to vector<16x1xf32>
    %258 = arith.addf %254, %257 : vector<16x1xf32>
    %259 = math.rsqrt %258 : vector<16x1xf32>
    %260 = vector.broadcast %259 : vector<16x1xf32> to vector<16x32xf32>
    %261 = arith.mulf %256, %260 : vector<16x32xf32>
    %262 = vector.broadcast %8 : vector<1x32xf32> to vector<16x32xf32>
    %263 = arith.mulf %261, %262 : vector<16x32xf32>
    %264 = vector.broadcast %9 : vector<1x32xf32> to vector<16x32xf32>
    %265 = arith.addf %263, %264 : vector<16x32xf32>
    %cst_41 = arith.constant dense<0.000000e+00> : vector<16xf32>
    %266 = vector.multi_reduction <add>, %265, %cst_41 [1] : vector<16x32xf32> to vector<16xf32>
    %267 = vector.shape_cast %266 : vector<16xf32> to vector<16x1xf32>
    %cst_42 = arith.constant 3.200000e+01 : f32
    %268 = vector.broadcast %cst_42 : f32 to vector<16x1xf32>
    %269 = arith.divf %267, %268 : vector<16x1xf32>
    %270 = vector.broadcast %269 : vector<16x1xf32> to vector<16x32xf32>
    %271 = arith.subf %265, %270 : vector<16x32xf32>
    %272 = arith.mulf %271, %271 : vector<16x32xf32>
    %cst_43 = arith.constant dense<0.000000e+00> : vector<16xf32>
    %273 = vector.multi_reduction <add>, %272, %cst_43 [1] : vector<16x32xf32> to vector<16xf32>
    %274 = vector.shape_cast %273 : vector<16xf32> to vector<16x1xf32>
    %cst_44 = arith.constant 3.200000e+01 : f32
    %275 = vector.broadcast %cst_44 : f32 to vector<16x1xf32>
    %276 = arith.divf %274, %275 : vector<16x1xf32>
    %277 = vector.broadcast %269 : vector<16x1xf32> to vector<16x32xf32>
    %278 = arith.subf %265, %277 : vector<16x32xf32>
    %cst_45 = arith.constant 9.99999997E-7 : f32
    %279 = vector.broadcast %cst_45 : f32 to vector<16x1xf32>
    %280 = arith.addf %276, %279 : vector<16x1xf32>
    %281 = math.rsqrt %280 : vector<16x1xf32>
    %282 = vector.broadcast %281 : vector<16x1xf32> to vector<16x32xf32>
    %283 = arith.mulf %278, %282 : vector<16x32xf32>
    %284 = vector.broadcast %10 : vector<1x32xf32> to vector<16x32xf32>
    %285 = arith.mulf %283, %284 : vector<16x32xf32>
    %286 = vector.broadcast %11 : vector<1x32xf32> to vector<16x32xf32>
    %287 = arith.addf %285, %286 : vector<16x32xf32>
    %c0_46 = arith.constant 0 : index
    %c0_47 = arith.constant 0 : index
    %c0_48 = arith.constant 0 : index
    %288 = vector.load %arg5[%c0_46, %c0_47, %c0_48] : memref<2x32x64xf32, #tpu.memory_space<vmem>>, vector<1x32x64xf32>
    %289 = vector.shape_cast %288 : vector<1x32x64xf32> to vector<32x64xf32>
    %cst_49 = arith.constant dense<0.000000e+00> : vector<16x64xf32>
    %290 = tpu.matmul %287, %289, %cst_49 {dimension_numbers = #tpu.dot_dimension_numbers<[1], [0], [0], [1], [0, 0, 1, 1], [], []>} : vector<16x32xf32>, vector<32x64xf32>, vector<16x64xf32> -> vector<16x64xf32>
    %291 = vector.broadcast %12 : vector<1x64xf32> to vector<16x64xf32>
    %292 = arith.addf %290, %291 : vector<16x64xf32>
    %cst_50 = arith.constant 0.000000e+00 : f32
    %293 = vector.broadcast %cst_50 : f32 to vector<16x64xf32>
    %294 = arith.maximumf %292, %293 : vector<16x64xf32>
    %c0_51 = arith.constant 0 : index
    %c0_52 = arith.constant 0 : index
    %c0_53 = arith.constant 0 : index
    %295 = vector.load %arg6[%c0_51, %c0_52, %c0_53] : memref<2x64x32xf32, #tpu.memory_space<vmem>>, vector<1x64x32xf32>
    %296 = vector.shape_cast %295 : vector<1x64x32xf32> to vector<64x32xf32>
    %cst_54 = arith.constant dense<0.000000e+00> : vector<16x32xf32>
    %297 = tpu.matmul %294, %296, %cst_54 {dimension_numbers = #tpu.dot_dimension_numbers<[1], [0], [0], [1], [0, 0, 1, 1], [], []>} : vector<16x64xf32>, vector<64x32xf32>, vector<16x32xf32> -> vector<16x32xf32>
    %298 = vector.broadcast %13 : vector<1x32xf32> to vector<16x32xf32>
    %299 = arith.addf %297, %298 : vector<16x32xf32>
    %300 = arith.addf %299, %265 : vector<16x32xf32>
    %c0_55 = arith.constant 0 : index
    %c0_56 = arith.constant 0 : index
    %c0_57 = arith.constant 0 : index
    %301 = vector.load %arg11[%c0_55, %c0_56, %c0_57] : memref<3x16x32xf32, #tpu.memory_space<vmem>>, vector<1x16x32xf32>
    %302 = vector.shape_cast %301 : vector<1x16x32xf32> to vector<16x32xf32>
    %303 = vector.shape_cast %300 : vector<16x32xf32> to vector<1x16x32xf32>
    tpu.vector_store %arg11[%c0_55, %c0_56, %c0_57], %303 {strides = array<i32>} : memref<3x16x32xf32, #tpu.memory_space<vmem>>, vector<1x16x32xf32>,
    %c1 = arith.constant 1 : index
    %c0_58 = arith.constant 0 : index
    %c0_59 = arith.constant 0 : index
    %304 = vector.load %arg9[%c1, %c0_58, %c0_59] : memref<2x3x128xf32, #tpu.memory_space<vmem>>, vector<1x3x128xf32>
    %305 = vector.shape_cast %304 : vector<1x3x128xf32> to vector<3x128xf32>
    %306 = vector.extract_strided_slice %305 {offsets = [0, 0], sizes = [1, 96], strides = [1, 1]} : vector<3x128xf32> to vector<1x96xf32>
    %307 = vector.extract_strided_slice %305 {offsets = [0, 96], sizes = [1, 32], strides = [1, 1]} : vector<3x128xf32> to vector<1x32xf32>
    %308 = vector.extract_strided_slice %305 {offsets = [1, 0], sizes = [1, 32], strides = [1, 1]} : vector<3x128xf32> to vector<1x32xf32>
    %309 = vector.extract_strided_slice %305 {offsets = [1, 32], sizes = [1, 32], strides = [1, 1]} : vector<3x128xf32> to vector<1x32xf32>
    %310 = vector.extract_strided_slice %305 {offsets = [1, 64], sizes = [1, 32], strides = [1, 1]} : vector<3x128xf32> to vector<1x32xf32>
    %311 = vector.extract_strided_slice %305 {offsets = [1, 96], sizes = [1, 32], strides = [1, 1]} : vector<3x128xf32> to vector<1x32xf32>
    %312 = vector.extract_strided_slice %305 {offsets = [2, 0], sizes = [1, 64], strides = [1, 1]} : vector<3x128xf32> to vector<1x64xf32>
    %313 = vector.extract_strided_slice %305 {offsets = [2, 64], sizes = [1, 32], strides = [1, 1]} : vector<3x128xf32> to vector<1x32xf32>
    %c1_60 = arith.constant 1 : index
    %c0_61 = arith.constant 0 : index
    %c0_62 = arith.constant 0 : index
    %314 = vector.load %arg3[%c1_60, %c0_61, %c0_62] : memref<2x32x96xf32, #tpu.memory_space<vmem>>, vector<1x32x96xf32>
    %315 = vector.shape_cast %314 : vector<1x32x96xf32> to vector<32x96xf32>
    %cst_63 = arith.constant dense<0.000000e+00> : vector<16x96xf32>
    %316 = tpu.matmul %300, %315, %cst_63 {dimension_numbers = #tpu.dot_dimension_numbers<[1], [0], [0], [1], [0, 0, 1, 1], [], []>} : vector<16x32xf32>, vector<32x96xf32>, vector<16x96xf32> -> vector<16x96xf32>
    %317 = vector.broadcast %306 : vector<1x96xf32> to vector<16x96xf32>
    %318 = arith.addf %316, %317 : vector<16x96xf32>
    %319 = vector.extract_strided_slice %318 {offsets = [0, 0], sizes = [16, 32], strides = [1, 1]} : vector<16x96xf32> to vector<16x32xf32>
    %320 = vector.extract_strided_slice %318 {offsets = [0, 32], sizes = [16, 32], strides = [1, 1]} : vector<16x96xf32> to vector<16x32xf32>
    %321 = vector.extract_strided_slice %318 {offsets = [0, 64], sizes = [16, 32], strides = [1, 1]} : vector<16x96xf32> to vector<16x32xf32>
    %322 = vector.shape_cast %319 : vector<16x32xf32> to vector<16x4x8xf32>
    %323 = tpu.transpose %322, [1, 0, 2] : vector<16x4x8xf32> -> vector<4x16x8xf32>
    %324 = vector.shape_cast %320 : vector<16x32xf32> to vector<16x4x8xf32>
    %325 = tpu.transpose %324, [1, 0, 2] : vector<16x4x8xf32> -> vector<4x16x8xf32>
    %326 = vector.shape_cast %321 : vector<16x32xf32> to vector<16x4x8xf32>
    %327 = tpu.transpose %326, [1, 0, 2] : vector<16x4x8xf32> -> vector<4x16x8xf32>
    "tpu.trace_start"() <{level = 10 : i32, message = "hld,hmd->hlm"}> : () -> ()
    %cst_64 = arith.constant dense<0.000000e+00> : vector<4x16x16xf32>
    %328 = tpu.matmul %323, %325, %cst_64 {dimension_numbers = #tpu.dot_dimension_numbers<[2], [2], [1], [1], [0, 0, 0, 1, 1, 1], [0], [0]>} : vector<4x16x8xf32>, vector<4x16x8xf32>, vector<4x16x16xf32> -> vector<4x16x16xf32>
    "tpu.trace_stop"() : () -> ()
    %c1_65 = arith.constant 1 : index
    %c0_66 = arith.constant 0 : index
    %c0_67 = arith.constant 0 : index
    %329 = vector.load %arg7[%c1_65, %c0_66, %c0_67] : memref<2x8x9xf32, #tpu.memory_space<vmem>>, vector<1x8x9xf32>
    %330 = vector.shape_cast %329 : vector<1x8x9xf32> to vector<8x9xf32>
    "tpu.trace_start"() <{level = 10 : i32, message = "hld,dv->hlv"}> : () -> ()
    %cst_68 = arith.constant dense<0.000000e+00> : vector<4x16x9xf32>
    %331 = tpu.matmul %323, %330, %cst_68 {dimension_numbers = #tpu.dot_dimension_numbers<[2], [0], [0, 1], [1], [0, 0, 0, 1, 1, 1], [], []>} : vector<4x16x8xf32>, vector<8x9xf32>, vector<4x16x9xf32> -> vector<4x16x9xf32>
    "tpu.trace_stop"() : () -> ()
    %332 = vector.extract_strided_slice %331 {offsets = [0, 0, 0], sizes = [4, 16, 1], strides = [1, 1, 1]} : vector<4x16x9xf32> to vector<4x16x1xf32>
    %333 = vector.extract_strided_slice %2 {offsets = [0, 0, 0], sizes = [1, 16, 16], strides = [1, 1, 1]} : vector<9x16x16xf32> to vector<1x16x16xf32>
    %334 = vector.shape_cast %333 : vector<1x16x16xf32> to vector<16x16xf32>
    %335 = vector.shape_cast %334 : vector<16x16xf32> to vector<1x16x16xf32>
    %336 = vector.broadcast %332 : vector<4x16x1xf32> to vector<4x16x16xf32>
    %337 = vector.broadcast %335 : vector<1x16x16xf32> to vector<4x16x16xf32>
    %338 = arith.mulf %336, %337 : vector<4x16x16xf32>
    %339 = arith.addf %328, %338 : vector<4x16x16xf32>
    %340 = vector.extract_strided_slice %331 {offsets = [0, 0, 1], sizes = [4, 16, 1], strides = [1, 1, 1]} : vector<4x16x9xf32> to vector<4x16x1xf32>
    %341 = vector.extract_strided_slice %2 {offsets = [1, 0, 0], sizes = [1, 16, 16], strides = [1, 1, 1]} : vector<9x16x16xf32> to vector<1x16x16xf32>
    %342 = vector.shape_cast %341 : vector<1x16x16xf32> to vector<16x16xf32>
    %343 = vector.shape_cast %342 : vector<16x16xf32> to vector<1x16x16xf32>
    %344 = vector.broadcast %340 : vector<4x16x1xf32> to vector<4x16x16xf32>
    %345 = vector.broadcast %343 : vector<1x16x16xf32> to vector<4x16x16xf32>
    %346 = arith.mulf %344, %345 : vector<4x16x16xf32>
    %347 = arith.addf %339, %346 : vector<4x16x16xf32>
    %348 = vector.extract_strided_slice %331 {offsets = [0, 0, 2], sizes = [4, 16, 1], strides = [1, 1, 1]} : vector<4x16x9xf32> to vector<4x16x1xf32>
    %349 = vector.extract_strided_slice %2 {offsets = [2, 0, 0], sizes = [1, 16, 16], strides = [1, 1, 1]} : vector<9x16x16xf32> to vector<1x16x16xf32>
    %350 = vector.shape_cast %349 : vector<1x16x16xf32> to vector<16x16xf32>
    %351 = vector.shape_cast %350 : vector<16x16xf32> to vector<1x16x16xf32>
    %352 = vector.broadcast %348 : vector<4x16x1xf32> to vector<4x16x16xf32>
    %353 = vector.broadcast %351 : vector<1x16x16xf32> to vector<4x16x16xf32>
    %354 = arith.mulf %352, %353 : vector<4x16x16xf32>
    %355 = arith.addf %347, %354 : vector<4x16x16xf32>
    %356 = vector.extract_strided_slice %331 {offsets = [0, 0, 3], sizes = [4, 16, 1], strides = [1, 1, 1]} : vector<4x16x9xf32> to vector<4x16x1xf32>
    %357 = vector.extract_strided_slice %2 {offsets = [3, 0, 0], sizes = [1, 16, 16], strides = [1, 1, 1]} : vector<9x16x16xf32> to vector<1x16x16xf32>
    %358 = vector.shape_cast %357 : vector<1x16x16xf32> to vector<16x16xf32>
    %359 = vector.shape_cast %358 : vector<16x16xf32> to vector<1x16x16xf32>
    %360 = vector.broadcast %356 : vector<4x16x1xf32> to vector<4x16x16xf32>
    %361 = vector.broadcast %359 : vector<1x16x16xf32> to vector<4x16x16xf32>
    %362 = arith.mulf %360, %361 : vector<4x16x16xf32>
    %363 = arith.addf %355, %362 : vector<4x16x16xf32>
    %364 = vector.extract_strided_slice %331 {offsets = [0, 0, 4], sizes = [4, 16, 1], strides = [1, 1, 1]} : vector<4x16x9xf32> to vector<4x16x1xf32>
    %365 = vector.extract_strided_slice %2 {offsets = [4, 0, 0], sizes = [1, 16, 16], strides = [1, 1, 1]} : vector<9x16x16xf32> to vector<1x16x16xf32>
    %366 = vector.shape_cast %365 : vector<1x16x16xf32> to vector<16x16xf32>
    %367 = vector.shape_cast %366 : vector<16x16xf32> to vector<1x16x16xf32>
    %368 = vector.broadcast %364 : vector<4x16x1xf32> to vector<4x16x16xf32>
    %369 = vector.broadcast %367 : vector<1x16x16xf32> to vector<4x16x16xf32>
    %370 = arith.mulf %368, %369 : vector<4x16x16xf32>
    %371 = arith.addf %363, %370 : vector<4x16x16xf32>
    %372 = vector.extract_strided_slice %331 {offsets = [0, 0, 5], sizes = [4, 16, 1], strides = [1, 1, 1]} : vector<4x16x9xf32> to vector<4x16x1xf32>
    %373 = vector.extract_strided_slice %2 {offsets = [5, 0, 0], sizes = [1, 16, 16], strides = [1, 1, 1]} : vector<9x16x16xf32> to vector<1x16x16xf32>
    %374 = vector.shape_cast %373 : vector<1x16x16xf32> to vector<16x16xf32>
    %375 = vector.shape_cast %374 : vector<16x16xf32> to vector<1x16x16xf32>
    %376 = vector.broadcast %372 : vector<4x16x1xf32> to vector<4x16x16xf32>
    %377 = vector.broadcast %375 : vector<1x16x16xf32> to vector<4x16x16xf32>
    %378 = arith.mulf %376, %377 : vector<4x16x16xf32>
    %379 = arith.addf %371, %378 : vector<4x16x16xf32>
    %380 = vector.extract_strided_slice %331 {offsets = [0, 0, 6], sizes = [4, 16, 1], strides = [1, 1, 1]} : vector<4x16x9xf32> to vector<4x16x1xf32>
    %381 = vector.extract_strided_slice %2 {offsets = [6, 0, 0], sizes = [1, 16, 16], strides = [1, 1, 1]} : vector<9x16x16xf32> to vector<1x16x16xf32>
    %382 = vector.shape_cast %381 : vector<1x16x16xf32> to vector<16x16xf32>
    %383 = vector.shape_cast %382 : vector<16x16xf32> to vector<1x16x16xf32>
    %384 = vector.broadcast %380 : vector<4x16x1xf32> to vector<4x16x16xf32>
    %385 = vector.broadcast %383 : vector<1x16x16xf32> to vector<4x16x16xf32>
    %386 = arith.mulf %384, %385 : vector<4x16x16xf32>
    %387 = arith.addf %379, %386 : vector<4x16x16xf32>
    %388 = vector.extract_strided_slice %331 {offsets = [0, 0, 7], sizes = [4, 16, 1], strides = [1, 1, 1]} : vector<4x16x9xf32> to vector<4x16x1xf32>
    %389 = vector.extract_strided_slice %2 {offsets = [7, 0, 0], sizes = [1, 16, 16], strides = [1, 1, 1]} : vector<9x16x16xf32> to vector<1x16x16xf32>
    %390 = vector.shape_cast %389 : vector<1x16x16xf32> to vector<16x16xf32>
    %391 = vector.shape_cast %390 : vector<16x16xf32> to vector<1x16x16xf32>
    %392 = vector.broadcast %388 : vector<4x16x1xf32> to vector<4x16x16xf32>
    %393 = vector.broadcast %391 : vector<1x16x16xf32> to vector<4x16x16xf32>
    %394 = arith.mulf %392, %393 : vector<4x16x16xf32>
    %395 = arith.addf %387, %394 : vector<4x16x16xf32>
    %396 = vector.extract_strided_slice %331 {offsets = [0, 0, 8], sizes = [4, 16, 1], strides = [1, 1, 1]} : vector<4x16x9xf32> to vector<4x16x1xf32>
    %397 = vector.extract_strided_slice %2 {offsets = [8, 0, 0], sizes = [1, 16, 16], strides = [1, 1, 1]} : vector<9x16x16xf32> to vector<1x16x16xf32>
    %398 = vector.shape_cast %397 : vector<1x16x16xf32> to vector<16x16xf32>
    %399 = vector.shape_cast %398 : vector<16x16xf32> to vector<1x16x16xf32>
    %400 = vector.broadcast %396 : vector<4x16x1xf32> to vector<4x16x16xf32>
    %401 = vector.broadcast %399 : vector<1x16x16xf32> to vector<4x16x16xf32>
    %402 = arith.mulf %400, %401 : vector<4x16x16xf32>
    %403 = arith.addf %395, %402 : vector<4x16x16xf32>
    %404 = vector.broadcast %3 : vector<1x16x16xf32> to vector<4x16x16xf32>
    %405 = arith.addf %403, %404 : vector<4x16x16xf32>
    %cst_69 = arith.constant dense<0xFF800000> : vector<4x16xf32>
    %406 = vector.multi_reduction <maximumf>, %405, %cst_69 [2] : vector<4x16x16xf32> to vector<4x16xf32>
    %407 = vector.shape_cast %406 : vector<4x16xf32> to vector<4x16x1xf32>
    %408 = vector.broadcast %407 : vector<4x16x1xf32> to vector<4x16x16xf32>
    %409 = arith.subf %405, %408 : vector<4x16x16xf32>
    %410 = math.exp %409 : vector<4x16x16xf32>
    %cst_70 = arith.constant dense<0.000000e+00> : vector<4x16xf32>
    %411 = vector.multi_reduction <add>, %410, %cst_70 [2] : vector<4x16x16xf32> to vector<4x16xf32>
    %412 = vector.shape_cast %411 : vector<4x16xf32> to vector<4x16x1xf32>
    %413 = tpu.reciprocal %412 {approx = true} : vector<4x16x1xf32> -> vector<4x16x1xf32>
    %414 = vector.broadcast %413 : vector<4x16x1xf32> to vector<4x16x16xf32>
    %415 = arith.mulf %410, %414 : vector<4x16x16xf32>
    "tpu.trace_start"() <{level = 10 : i32, message = "hlm,hmd->hld"}> : () -> ()
    %cst_71 = arith.constant dense<0.000000e+00> : vector<4x16x8xf32>
    %416 = tpu.matmul %415, %327, %cst_71 {dimension_numbers = #tpu.dot_dimension_numbers<[2], [1], [1], [2], [0, 0, 0, 1, 1, 2], [0], [0]>} : vector<4x16x16xf32>, vector<4x16x8xf32>, vector<4x16x8xf32> -> vector<4x16x8xf32>
    "tpu.trace_stop"() : () -> ()
    %c1_72 = arith.constant 1 : index
    %c0_73 = arith.constant 0 : index
    %c0_74 = arith.constant 0 : index
    %417 = vector.load %arg8[%c1_72, %c0_73, %c0_74] : memref<2x9x8xf32, #tpu.memory_space<vmem>>, vector<1x9x8xf32>
    %418 = vector.shape_cast %417 : vector<1x9x8xf32> to vector<9x8xf32>
    %419 = vector.extract_strided_slice %2 {offsets = [0, 0, 0], sizes = [1, 16, 16], strides = [1, 1, 1]} : vector<9x16x16xf32> to vector<1x16x16xf32>
    %420 = vector.shape_cast %419 : vector<1x16x16xf32> to vector<16x16xf32>
    %421 = vector.shape_cast %420 : vector<16x16xf32> to vector<1x16x16xf32>
    %422 = vector.broadcast %421 : vector<1x16x16xf32> to vector<4x16x16xf32>
    %423 = arith.mulf %415, %422 : vector<4x16x16xf32>
    %cst_75 = arith.constant dense<0.000000e+00> : vector<4x16xf32>
    %424 = vector.multi_reduction <add>, %423, %cst_75 [2] : vector<4x16x16xf32> to vector<4x16xf32>
    %425 = vector.shape_cast %424 : vector<4x16xf32> to vector<4x16x1xf32>
    %426 = vector.extract_strided_slice %418 {offsets = [0, 0], sizes = [1, 8], strides = [1, 1]} : vector<9x8xf32> to vector<1x8xf32>
    %427 = vector.shape_cast %426 : vector<1x8xf32> to vector<1x1x8xf32>
    %428 = vector.broadcast %425 : vector<4x16x1xf32> to vector<4x16x8xf32>
    %429 = vector.broadcast %427 : vector<1x1x8xf32> to vector<4x16x8xf32>
    %430 = arith.mulf %428, %429 : vector<4x16x8xf32>
    %431 = arith.addf %416, %430 : vector<4x16x8xf32>
    %432 = vector.extract_strided_slice %2 {offsets = [1, 0, 0], sizes = [1, 16, 16], strides = [1, 1, 1]} : vector<9x16x16xf32> to vector<1x16x16xf32>
    %433 = vector.shape_cast %432 : vector<1x16x16xf32> to vector<16x16xf32>
    %434 = vector.shape_cast %433 : vector<16x16xf32> to vector<1x16x16xf32>
    %435 = vector.broadcast %434 : vector<1x16x16xf32> to vector<4x16x16xf32>
    %436 = arith.mulf %415, %435 : vector<4x16x16xf32>
    %cst_76 = arith.constant dense<0.000000e+00> : vector<4x16xf32>
    %437 = vector.multi_reduction <add>, %436, %cst_76 [2] : vector<4x16x16xf32> to vector<4x16xf32>
    %438 = vector.shape_cast %437 : vector<4x16xf32> to vector<4x16x1xf32>
    %439 = vector.extract_strided_slice %418 {offsets = [1, 0], sizes = [1, 8], strides = [1, 1]} : vector<9x8xf32> to vector<1x8xf32>
    %440 = vector.shape_cast %439 : vector<1x8xf32> to vector<1x1x8xf32>
    %441 = vector.broadcast %438 : vector<4x16x1xf32> to vector<4x16x8xf32>
    %442 = vector.broadcast %440 : vector<1x1x8xf32> to vector<4x16x8xf32>
    %443 = arith.mulf %441, %442 : vector<4x16x8xf32>
    %444 = arith.addf %431, %443 : vector<4x16x8xf32>
    %445 = vector.extract_strided_slice %2 {offsets = [2, 0, 0], sizes = [1, 16, 16], strides = [1, 1, 1]} : vector<9x16x16xf32> to vector<1x16x16xf32>
    %446 = vector.shape_cast %445 : vector<1x16x16xf32> to vector<16x16xf32>
    %447 = vector.shape_cast %446 : vector<16x16xf32> to vector<1x16x16xf32>
    %448 = vector.broadcast %447 : vector<1x16x16xf32> to vector<4x16x16xf32>
    %449 = arith.mulf %415, %448 : vector<4x16x16xf32>
    %cst_77 = arith.constant dense<0.000000e+00> : vector<4x16xf32>
    %450 = vector.multi_reduction <add>, %449, %cst_77 [2] : vector<4x16x16xf32> to vector<4x16xf32>
    %451 = vector.shape_cast %450 : vector<4x16xf32> to vector<4x16x1xf32>
    %452 = vector.extract_strided_slice %418 {offsets = [2, 0], sizes = [1, 8], strides = [1, 1]} : vector<9x8xf32> to vector<1x8xf32>
    %453 = vector.shape_cast %452 : vector<1x8xf32> to vector<1x1x8xf32>
    %454 = vector.broadcast %451 : vector<4x16x1xf32> to vector<4x16x8xf32>
    %455 = vector.broadcast %453 : vector<1x1x8xf32> to vector<4x16x8xf32>
    %456 = arith.mulf %454, %455 : vector<4x16x8xf32>
    %457 = arith.addf %444, %456 : vector<4x16x8xf32>
    %458 = vector.extract_strided_slice %2 {offsets = [3, 0, 0], sizes = [1, 16, 16], strides = [1, 1, 1]} : vector<9x16x16xf32> to vector<1x16x16xf32>
    %459 = vector.shape_cast %458 : vector<1x16x16xf32> to vector<16x16xf32>
    %460 = vector.shape_cast %459 : vector<16x16xf32> to vector<1x16x16xf32>
    %461 = vector.broadcast %460 : vector<1x16x16xf32> to vector<4x16x16xf32>
    %462 = arith.mulf %415, %461 : vector<4x16x16xf32>
    %cst_78 = arith.constant dense<0.000000e+00> : vector<4x16xf32>
    %463 = vector.multi_reduction <add>, %462, %cst_78 [2] : vector<4x16x16xf32> to vector<4x16xf32>
    %464 = vector.shape_cast %463 : vector<4x16xf32> to vector<4x16x1xf32>
    %465 = vector.extract_strided_slice %418 {offsets = [3, 0], sizes = [1, 8], strides = [1, 1]} : vector<9x8xf32> to vector<1x8xf32>
    %466 = vector.shape_cast %465 : vector<1x8xf32> to vector<1x1x8xf32>
    %467 = vector.broadcast %464 : vector<4x16x1xf32> to vector<4x16x8xf32>
    %468 = vector.broadcast %466 : vector<1x1x8xf32> to vector<4x16x8xf32>
    %469 = arith.mulf %467, %468 : vector<4x16x8xf32>
    %470 = arith.addf %457, %469 : vector<4x16x8xf32>
    %471 = vector.extract_strided_slice %2 {offsets = [4, 0, 0], sizes = [1, 16, 16], strides = [1, 1, 1]} : vector<9x16x16xf32> to vector<1x16x16xf32>
    %472 = vector.shape_cast %471 : vector<1x16x16xf32> to vector<16x16xf32>
    %473 = vector.shape_cast %472 : vector<16x16xf32> to vector<1x16x16xf32>
    %474 = vector.broadcast %473 : vector<1x16x16xf32> to vector<4x16x16xf32>
    %475 = arith.mulf %415, %474 : vector<4x16x16xf32>
    %cst_79 = arith.constant dense<0.000000e+00> : vector<4x16xf32>
    %476 = vector.multi_reduction <add>, %475, %cst_79 [2] : vector<4x16x16xf32> to vector<4x16xf32>
    %477 = vector.shape_cast %476 : vector<4x16xf32> to vector<4x16x1xf32>
    %478 = vector.extract_strided_slice %418 {offsets = [4, 0], sizes = [1, 8], strides = [1, 1]} : vector<9x8xf32> to vector<1x8xf32>
    %479 = vector.shape_cast %478 : vector<1x8xf32> to vector<1x1x8xf32>
    %480 = vector.broadcast %477 : vector<4x16x1xf32> to vector<4x16x8xf32>
    %481 = vector.broadcast %479 : vector<1x1x8xf32> to vector<4x16x8xf32>
    %482 = arith.mulf %480, %481 : vector<4x16x8xf32>
    %483 = arith.addf %470, %482 : vector<4x16x8xf32>
    %484 = vector.extract_strided_slice %2 {offsets = [5, 0, 0], sizes = [1, 16, 16], strides = [1, 1, 1]} : vector<9x16x16xf32> to vector<1x16x16xf32>
    %485 = vector.shape_cast %484 : vector<1x16x16xf32> to vector<16x16xf32>
    %486 = vector.shape_cast %485 : vector<16x16xf32> to vector<1x16x16xf32>
    %487 = vector.broadcast %486 : vector<1x16x16xf32> to vector<4x16x16xf32>
    %488 = arith.mulf %415, %487 : vector<4x16x16xf32>
    %cst_80 = arith.constant dense<0.000000e+00> : vector<4x16xf32>
    %489 = vector.multi_reduction <add>, %488, %cst_80 [2] : vector<4x16x16xf32> to vector<4x16xf32>
    %490 = vector.shape_cast %489 : vector<4x16xf32> to vector<4x16x1xf32>
    %491 = vector.extract_strided_slice %418 {offsets = [5, 0], sizes = [1, 8], strides = [1, 1]} : vector<9x8xf32> to vector<1x8xf32>
    %492 = vector.shape_cast %491 : vector<1x8xf32> to vector<1x1x8xf32>
    %493 = vector.broadcast %490 : vector<4x16x1xf32> to vector<4x16x8xf32>
    %494 = vector.broadcast %492 : vector<1x1x8xf32> to vector<4x16x8xf32>
    %495 = arith.mulf %493, %494 : vector<4x16x8xf32>
    %496 = arith.addf %483, %495 : vector<4x16x8xf32>
    %497 = vector.extract_strided_slice %2 {offsets = [6, 0, 0], sizes = [1, 16, 16], strides = [1, 1, 1]} : vector<9x16x16xf32> to vector<1x16x16xf32>
    %498 = vector.shape_cast %497 : vector<1x16x16xf32> to vector<16x16xf32>
    %499 = vector.shape_cast %498 : vector<16x16xf32> to vector<1x16x16xf32>
    %500 = vector.broadcast %499 : vector<1x16x16xf32> to vector<4x16x16xf32>
    %501 = arith.mulf %415, %500 : vector<4x16x16xf32>
    %cst_81 = arith.constant dense<0.000000e+00> : vector<4x16xf32>
    %502 = vector.multi_reduction <add>, %501, %cst_81 [2] : vector<4x16x16xf32> to vector<4x16xf32>
    %503 = vector.shape_cast %502 : vector<4x16xf32> to vector<4x16x1xf32>
    %504 = vector.extract_strided_slice %418 {offsets = [6, 0], sizes = [1, 8], strides = [1, 1]} : vector<9x8xf32> to vector<1x8xf32>
    %505 = vector.shape_cast %504 : vector<1x8xf32> to vector<1x1x8xf32>
    %506 = vector.broadcast %503 : vector<4x16x1xf32> to vector<4x16x8xf32>
    %507 = vector.broadcast %505 : vector<1x1x8xf32> to vector<4x16x8xf32>
    %508 = arith.mulf %506, %507 : vector<4x16x8xf32>
    %509 = arith.addf %496, %508 : vector<4x16x8xf32>
    %510 = vector.extract_strided_slice %2 {offsets = [7, 0, 0], sizes = [1, 16, 16], strides = [1, 1, 1]} : vector<9x16x16xf32> to vector<1x16x16xf32>
    %511 = vector.shape_cast %510 : vector<1x16x16xf32> to vector<16x16xf32>
    %512 = vector.shape_cast %511 : vector<16x16xf32> to vector<1x16x16xf32>
    %513 = vector.broadcast %512 : vector<1x16x16xf32> to vector<4x16x16xf32>
    %514 = arith.mulf %415, %513 : vector<4x16x16xf32>
    %cst_82 = arith.constant dense<0.000000e+00> : vector<4x16xf32>
    %515 = vector.multi_reduction <add>, %514, %cst_82 [2] : vector<4x16x16xf32> to vector<4x16xf32>
    %516 = vector.shape_cast %515 : vector<4x16xf32> to vector<4x16x1xf32>
    %517 = vector.extract_strided_slice %418 {offsets = [7, 0], sizes = [1, 8], strides = [1, 1]} : vector<9x8xf32> to vector<1x8xf32>
    %518 = vector.shape_cast %517 : vector<1x8xf32> to vector<1x1x8xf32>
    %519 = vector.broadcast %516 : vector<4x16x1xf32> to vector<4x16x8xf32>
    %520 = vector.broadcast %518 : vector<1x1x8xf32> to vector<4x16x8xf32>
    %521 = arith.mulf %519, %520 : vector<4x16x8xf32>
    %522 = arith.addf %509, %521 : vector<4x16x8xf32>
    %523 = vector.extract_strided_slice %2 {offsets = [8, 0, 0], sizes = [1, 16, 16], strides = [1, 1, 1]} : vector<9x16x16xf32> to vector<1x16x16xf32>
    %524 = vector.shape_cast %523 : vector<1x16x16xf32> to vector<16x16xf32>
    %525 = vector.shape_cast %524 : vector<16x16xf32> to vector<1x16x16xf32>
    %526 = vector.broadcast %525 : vector<1x16x16xf32> to vector<4x16x16xf32>
    %527 = arith.mulf %415, %526 : vector<4x16x16xf32>
    %cst_83 = arith.constant dense<0.000000e+00> : vector<4x16xf32>
    %528 = vector.multi_reduction <add>, %527, %cst_83 [2] : vector<4x16x16xf32> to vector<4x16xf32>
    %529 = vector.shape_cast %528 : vector<4x16xf32> to vector<4x16x1xf32>
    %530 = vector.extract_strided_slice %418 {offsets = [8, 0], sizes = [1, 8], strides = [1, 1]} : vector<9x8xf32> to vector<1x8xf32>
    %531 = vector.shape_cast %530 : vector<1x8xf32> to vector<1x1x8xf32>
    %532 = vector.broadcast %529 : vector<4x16x1xf32> to vector<4x16x8xf32>
    %533 = vector.broadcast %531 : vector<1x1x8xf32> to vector<4x16x8xf32>
    %534 = arith.mulf %532, %533 : vector<4x16x8xf32>
    %535 = arith.addf %522, %534 : vector<4x16x8xf32>
    %536 = tpu.transpose %535, [1, 0, 2] : vector<4x16x8xf32> -> vector<16x4x8xf32>
    %537 = vector.shape_cast %536 : vector<16x4x8xf32> to vector<16x32xf32>
    %c1_84 = arith.constant 1 : index
    %c0_85 = arith.constant 0 : index
    %c0_86 = arith.constant 0 : index
    %538 = vector.load %arg4[%c1_84, %c0_85, %c0_86] : memref<2x32x32xf32, #tpu.memory_space<vmem>>, vector<1x32x32xf32>
    %539 = vector.shape_cast %538 : vector<1x32x32xf32> to vector<32x32xf32>
    %cst_87 = arith.constant dense<0.000000e+00> : vector<16x32xf32>
    %540 = tpu.matmul %537, %539, %cst_87 {dimension_numbers = #tpu.dot_dimension_numbers<[1], [0], [0], [1], [0, 0, 1, 1], [], []>} : vector<16x32xf32>, vector<32x32xf32>, vector<16x32xf32> -> vector<16x32xf32>
    %541 = vector.broadcast %307 : vector<1x32xf32> to vector<16x32xf32>
    %542 = arith.addf %540, %541 : vector<16x32xf32>
    %543 = arith.addf %542, %300 : vector<16x32xf32>
    %cst_88 = arith.constant dense<0.000000e+00> : vector<16xf32>
    %544 = vector.multi_reduction <add>, %543, %cst_88 [1] : vector<16x32xf32> to vector<16xf32>
    %545 = vector.shape_cast %544 : vector<16xf32> to vector<16x1xf32>
    %cst_89 = arith.constant 3.200000e+01 : f32
    %546 = vector.broadcast %cst_89 : f32 to vector<16x1xf32>
    %547 = arith.divf %545, %546 : vector<16x1xf32>
    %548 = vector.broadcast %547 : vector<16x1xf32> to vector<16x32xf32>
    %549 = arith.subf %543, %548 : vector<16x32xf32>
    %550 = arith.mulf %549, %549 : vector<16x32xf32>
    %cst_90 = arith.constant dense<0.000000e+00> : vector<16xf32>
    %551 = vector.multi_reduction <add>, %550, %cst_90 [1] : vector<16x32xf32> to vector<16xf32>
    %552 = vector.shape_cast %551 : vector<16xf32> to vector<16x1xf32>
    %cst_91 = arith.constant 3.200000e+01 : f32
    %553 = vector.broadcast %cst_91 : f32 to vector<16x1xf32>
    %554 = arith.divf %552, %553 : vector<16x1xf32>
    %555 = vector.broadcast %547 : vector<16x1xf32> to vector<16x32xf32>
    %556 = arith.subf %543, %555 : vector<16x32xf32>
    %cst_92 = arith.constant 9.99999997E-7 : f32
    %557 = vector.broadcast %cst_92 : f32 to vector<16x1xf32>
    %558 = arith.addf %554, %557 : vector<16x1xf32>
    %559 = math.rsqrt %558 : vector<16x1xf32>
    %560 = vector.broadcast %559 : vector<16x1xf32> to vector<16x32xf32>
    %561 = arith.mulf %556, %560 : vector<16x32xf32>
    %562 = vector.broadcast %308 : vector<1x32xf32> to vector<16x32xf32>
    %563 = arith.mulf %561, %562 : vector<16x32xf32>
    %564 = vector.broadcast %309 : vector<1x32xf32> to vector<16x32xf32>
    %565 = arith.addf %563, %564 : vector<16x32xf32>
    %cst_93 = arith.constant dense<0.000000e+00> : vector<16xf32>
    %566 = vector.multi_reduction <add>, %565, %cst_93 [1] : vector<16x32xf32> to vector<16xf32>
    %567 = vector.shape_cast %566 : vector<16xf32> to vector<16x1xf32>
    %cst_94 = arith.constant 3.200000e+01 : f32
    %568 = vector.broadcast %cst_94 : f32 to vector<16x1xf32>
    %569 = arith.divf %567, %568 : vector<16x1xf32>
    %570 = vector.broadcast %569 : vector<16x1xf32> to vector<16x32xf32>
    %571 = arith.subf %565, %570 : vector<16x32xf32>
    %572 = arith.mulf %571, %571 : vector<16x32xf32>
    %cst_95 = arith.constant dense<0.000000e+00> : vector<16xf32>
    %573 = vector.multi_reduction <add>, %572, %cst_95 [1] : vector<16x32xf32> to vector<16xf32>
    %574 = vector.shape_cast %573 : vector<16xf32> to vector<16x1xf32>
    %cst_96 = arith.constant 3.200000e+01 : f32
    %575 = vector.broadcast %cst_96 : f32 to vector<16x1xf32>
    %576 = arith.divf %574, %575 : vector<16x1xf32>
    %577 = vector.broadcast %569 : vector<16x1xf32> to vector<16x32xf32>
    %578 = arith.subf %565, %577 : vector<16x32xf32>
    %cst_97 = arith.constant 9.99999997E-7 : f32
    %579 = vector.broadcast %cst_97 : f32 to vector<16x1xf32>
    %580 = arith.addf %576, %579 : vector<16x1xf32>
    %581 = math.rsqrt %580 : vector<16x1xf32>
    %582 = vector.broadcast %581 : vector<16x1xf32> to vector<16x32xf32>
    %583 = arith.mulf %578, %582 : vector<16x32xf32>
    %584 = vector.broadcast %310 : vector<1x32xf32> to vector<16x32xf32>
    %585 = arith.mulf %583, %584 : vector<16x32xf32>
    %586 = vector.broadcast %311 : vector<1x32xf32> to vector<16x32xf32>
    %587 = arith.addf %585, %586 : vector<16x32xf32>
    %c1_98 = arith.constant 1 : index
    %c0_99 = arith.constant 0 : index
    %c0_100 = arith.constant 0 : index
    %588 = vector.load %arg5[%c1_98, %c0_99, %c0_100] : memref<2x32x64xf32, #tpu.memory_space<vmem>>, vector<1x32x64xf32>
    %589 = vector.shape_cast %588 : vector<1x32x64xf32> to vector<32x64xf32>
    %cst_101 = arith.constant dense<0.000000e+00> : vector<16x64xf32>
    %590 = tpu.matmul %587, %589, %cst_101 {dimension_numbers = #tpu.dot_dimension_numbers<[1], [0], [0], [1], [0, 0, 1, 1], [], []>} : vector<16x32xf32>, vector<32x64xf32>, vector<16x64xf32> -> vector<16x64xf32>
    %591 = vector.broadcast %312 : vector<1x64xf32> to vector<16x64xf32>
    %592 = arith.addf %590, %591 : vector<16x64xf32>
    %cst_102 = arith.constant 0.000000e+00 : f32
    %593 = vector.broadcast %cst_102 : f32 to vector<16x64xf32>
    %594 = arith.maximumf %592, %593 : vector<16x64xf32>
    %c1_103 = arith.constant 1 : index
    %c0_104 = arith.constant 0 : index
    %c0_105 = arith.constant 0 : index
    %595 = vector.load %arg6[%c1_103, %c0_104, %c0_105] : memref<2x64x32xf32, #tpu.memory_space<vmem>>, vector<1x64x32xf32>
    %596 = vector.shape_cast %595 : vector<1x64x32xf32> to vector<64x32xf32>
    %cst_106 = arith.constant dense<0.000000e+00> : vector<16x32xf32>
    %597 = tpu.matmul %594, %596, %cst_106 {dimension_numbers = #tpu.dot_dimension_numbers<[1], [0], [0], [1], [0, 0, 1, 1], [], []>} : vector<16x64xf32>, vector<64x32xf32>, vector<16x32xf32> -> vector<16x32xf32>
    %598 = vector.broadcast %313 : vector<1x32xf32> to vector<16x32xf32>
    %599 = arith.addf %597, %598 : vector<16x32xf32>
    %600 = arith.addf %599, %565 : vector<16x32xf32>
    %c1_107 = arith.constant 1 : index
    %c0_108 = arith.constant 0 : index
    %c0_109 = arith.constant 0 : index
    %601 = vector.load %arg11[%c1_107, %c0_108, %c0_109] : memref<3x16x32xf32, #tpu.memory_space<vmem>>, vector<1x16x32xf32>
    %602 = vector.shape_cast %601 : vector<1x16x32xf32> to vector<16x32xf32>
    %603 = vector.shape_cast %600 : vector<16x32xf32> to vector<1x16x32xf32>
    tpu.vector_store %arg11[%c1_107, %c0_108, %c0_109], %603 {strides = array<i32>} : memref<3x16x32xf32, #tpu.memory_space<vmem>>, vector<1x16x32xf32>,
    %c0_110 = arith.constant 0 : index
    %c0_111 = arith.constant 0 : index
    %604 = vector.load %arg10[%c0_110, %c0_111] : memref<1x32xf32, #tpu.memory_space<vmem>>, vector<1x32xf32>
    %605 = vector.broadcast %604 : vector<1x32xf32> to vector<16x32xf32>
    %606 = arith.mulf %300, %605 : vector<16x32xf32>
    %cst_112 = arith.constant dense<0.000000e+00> : vector<16xf32>
    %607 = vector.multi_reduction <add>, %606, %cst_112 [1] : vector<16x32xf32> to vector<16xf32>
    %608 = vector.shape_cast %607 : vector<16xf32> to vector<16x1xf32>
    %609 = vector.broadcast %604 : vector<1x32xf32> to vector<16x32xf32>
    %610 = arith.mulf %600, %609 : vector<16x32xf32>
    %cst_113 = arith.constant dense<0.000000e+00> : vector<16xf32>
    %611 = vector.multi_reduction <add>, %610, %cst_113 [1] : vector<16x32xf32> to vector<16xf32>
    %612 = vector.shape_cast %611 : vector<16xf32> to vector<16x1xf32>
    %613 = arith.maximumf %608, %612 : vector<16x1xf32>
    %614 = arith.subf %608, %613 : vector<16x1xf32>
    %615 = math.exp %614 : vector<16x1xf32>
    %616 = arith.subf %612, %613 : vector<16x1xf32>
    %617 = math.exp %616 : vector<16x1xf32>
    %618 = arith.addf %615, %617 : vector<16x1xf32>
    %619 = tpu.reciprocal %618 {approx = true} : vector<16x1xf32> -> vector<16x1xf32>
    %620 = arith.mulf %615, %619 : vector<16x1xf32>
    %621 = vector.broadcast %620 : vector<16x1xf32> to vector<16x32xf32>
    %622 = arith.mulf %621, %300 : vector<16x32xf32>
    %623 = arith.mulf %617, %619 : vector<16x1xf32>
    %624 = vector.broadcast %623 : vector<16x1xf32> to vector<16x32xf32>
    %625 = arith.mulf %624, %600 : vector<16x32xf32>
    %626 = arith.addf %622, %625 : vector<16x32xf32>
    %c2 = arith.constant 2 : index
    %c0_114 = arith.constant 0 : index
    %c0_115 = arith.constant 0 : index
    %627 = vector.load %arg11[%c2, %c0_114, %c0_115] : memref<3x16x32xf32, #tpu.memory_space<vmem>>, vector<1x16x32xf32>
    %628 = vector.shape_cast %627 : vector<1x16x32xf32> to vector<16x32xf32>
    %629 = vector.shape_cast %626 : vector<16x32xf32> to vector<1x16x32xf32>
    tpu.vector_store %arg11[%c2, %c0_114, %c0_115], %629 {strides = array<i32>} : memref<3x16x32xf32, #tpu.memory_space<vmem>>, vector<1x16x32xf32>,
    return
  }
}

</mosaic_0001>

<bundles_post_ra>
// kernel: gnn_encoder_forward.1
= control target key start
LH: loop header
LB: loop body
LE: loop exit
PB: predicated region body
PF: predicated region fallthrough
CT: control target
= control target key end

     0   :  { %vm69_vm0 = vcmask 261120   ;;  %v65_v8 = vlaneseq  ;;  %s7922_s12 = smov 112   ;;  %s7923_s13 = smov 120   ;;  %v7926_v18 = vmov 1983009808   ;;  %vm1036_vm1 = vcmask 64512   ;;  %s10892_s3 = inlined_call_operand.vmem [shape: f32[2,32,96], index: 3, kind: input, shape index: {}]   ;;  %s10893_s0 = inlined_call_operand.vmem [shape: f32[16,32], index: 0, kind: input, shape index: {}]   ;;  %s10894_s9 = inlined_call_operand.vmem [shape: f32[2,3,128], index: 9, kind: input, shape index: {}]   ;;  %s10895_s7 = inlined_call_operand.vmem [shape: f32[2,8,9], index: 7, kind: input, shape index: {}]   ;;  %s10896_s2 = inlined_call_operand.vmem [shape: f32[9,16,16], index: 2, kind: input, shape index: {}]   ;;  %s10897_s1 = inlined_call_operand.vmem [shape: f32[16,16], index: 1, kind: input, shape index: {}]   ;;  %s10898_s8 = inlined_call_operand.vmem [shape: f32[2,9,8], index: 8, kind: input, shape index: {}]   ;;  %s10899_s4 = inlined_call_operand.vmem [shape: f32[2,32,32], index: 4, kind: input, shape index: {}]   ;;  %s10900_s5 = inlined_call_operand.vmem [shape: f32[2,32,64], index: 5, kind: input, shape index: {}]   ;;  %s10901_s6 = inlined_call_operand.vmem [shape: f32[2,64,32], index: 6, kind: input, shape index: {}]   ;;  %s10902_s11 = inlined_call_operand.vmem [shape: f32[3,16,32], index: 11, kind: output, shape index: {}]   ;;  %s10903_s10 = inlined_call_operand.vmem [shape: f32[1,32], index: 10, kind: input, shape index: {}]  }
   0x1   :  { %v61_v0 = vld [vmem:[%s10892_s3] sm:$0xff]  ;;  %v62_v1 = vld [vmem:[%s10892_s3 + $0x8] sm:$0xff]  ;;  %v63_v2 = vld [vmem:[%s10892_s3 + $0x10] sm:$0xff]  ;;  %s7924_s16 = smov 104   ;;  %s7925_s17 = smov 96   ;;  %v174_v19 = vunpack.c.l.s4 %v7926_v18  ;;  %vm1930_vm3 = vcmask 130048  }
   0x2   :  { %v7451_v3 = vpack.c.bf16 %v62_v1, %v61_v0  ;;  %v64_v4 = vld [vmem:[%s10892_s3 + $0x18] sm:$0xff]  ;;  %v38_v5 = vld [vmem:[%s10893_s0] sm:$0xff]  ;;  %v39_v7 = vld [vmem:[%s10893_s0 + $0x8] sm:$0xff]  ;;  %v8022_v9 = vshrl.u32 %v65_v8, 7  ;;  %v7927_v23 = vmov 1934713408  }
   0x3   :  { %v7455_v6 = vpack.c.bf16 %v64_v4, %v63_v2  ;;  %7215 = vmatprep.mubr.msk.f32.mxu0 %vm69_vm0, %v38_v5  ;;  %v60_v11 = vld [vmem:[%s10894_s9] sm:$0x7]  ;;  %v175_v22 = vunpack.c.0.s8 %v174_v19  ;;  %v206_v24 = vunpack.c.l.s4 %v7927_v23  ;;  %vm8200_vm2 = vmpackc.low %vm1036_vm1, %vm1036_vm1  ;;  %s7937_s28 = smov 64   ;;  %s7938_s20 = smov 16   ;;  %vm3105_vm4 = vcmask 195584  }
   0x4   :  { %7452 = vmatprep.subr.bf16.mxu0 %v7451_v3  ;;  %10971 = vst [vmem:[#allocation2_spill] sm:$0xff] %v8022_v9  ;;  %v8025_v10 = vsub.s32 0, %v8022_v9  ;;  %v1035_v17 = vld [vmem:[%s10895_s7] sm:$0xff]  ;;  %s7939_s21 = smov 8   ;;  %s7940_s22 = smov 24   ;;  %vm3377_vm5 = vcmask 523264  }
   0x5   :  { %7454 = vmatpush3.bf16.msra.mxu0 %v7451_v3  ;;  %7611 = vmatprep.subr.mxu1 %v1035_v17  ;;  %v8073_v27 = vsub.s32 %v175_v22, %v8022_v9  ;;  %v207_v30 = vunpack.c.0.s8 %v206_v24  ;;  %s7941_s23 = smov 32  }
   0x6   :  { %7456 = vmatprep.subr.bf16.mxu0 %v7455_v6  ;;  %10972 = vst [vmem:[#allocation3_spill] sm:$0xff] %v8025_v10  ;;  %v8031_v12 = vrot.slane %v60_v11, %v8025_v10  ;;  %7612 = vmatpush3.msra.mxu1 %v1035_v17 }
   0x7   :  { %10980 = vst [vmem:[#allocation11_spill] sm:$0xff] %v8073_v27  ;;  %v8100_v41 = vsub.s32 %v207_v30, %v8022_v9 }
   0x8   :  { %10973 = vst [vmem:[#allocation4_spill] sm:$0xff] %v8031_v12 }
   0x9   :  { %7458 = vmatpush3.bf16.msra.mxu0 %v7455_v6  ;;  %10983 = vst [vmem:[#allocation14_spill] sm:$0xff] %v8100_v41 }
   0xa   :  { %7218 = vmatprep.subr.mxu0 %v1035_v17 }
   0xc   :  { %7216 = vmatmul.mubr.msk.f32.vlgmr.msra.gmra.mrb[0].mxu0 %vm69_vm0, %v39_v7 }
   0xd   :  { %7219 = vmatpush3.msra.mxu0 %v1035_v17 }
  0xdf   :  { %v7217_v13 = vpop.f32.mrb[0].mxu0 }
  0xe0   :  { %v8034_v14 = vadd.f32 %v7217_v13, %v8031_v12  ;;  %v142_v15 = vpop.f32.mrb[1].mxu0 }
  0xe1   :  { %v8041_v16 = vadd.f32 %v142_v15, %v8031_v12 }
  0xe2   :  { %10974 = vst [vmem:[#allocation5_spill] sm:$0xff] %v8034_v14  ;;  %161 = vrot.lane.b32.xlu1 %v8034_v14, %s7922_s12  ;;  %155 = vrot.lane.b32.xlu0 %v8034_v14, %s7923_s13 }
  0xe3   :  { %10975 = vst [vmem:[#allocation6_spill] sm:$0xff] %v8041_v16 }
  0xe6   :  { %159 = vrot.lane.b32.xlu1 %v8041_v16, %s7922_s12  ;;  %153 = vrot.lane.b32.xlu0 %v8041_v16, %s7923_s13 }
  0xea   :  { %167 = vrot.lane.b32.xlu1 %v8034_v14, %s7924_s16  ;;  %165 = vrot.lane.b32.xlu0 %v8041_v16, %s7924_s16 }
  0xee   :  { %445 = vrot.lane.b32.xlu1 %v8034_v14, %s7925_s17  ;;  %443 = vrot.lane.b32.xlu0 %v8041_v16, %s7925_s17 }
 0x154   :  { %v8058_v20 = vpop.permute.xlu1 %161  ;;  %v8060_v21 = vpop.permute.xlu0 %155 }
 0x155   :  { %10976 = vst [vmem:[#allocation7_spill] sm:$0xff] %v8058_v20  ;;  %10977 = vst [vmem:[#allocation8_spill] sm:$0xff] %v8060_v21  ;;  %449 = vrot.lane.b32.xlu1 %v8060_v21, %s7925_s17  ;;  %v239_v28 = vcombine.low %v8034_v14, %v8058_v20  ;;  %v240_v29 = vcombine.high %v8034_v14, %v8058_v20 }
 0x157   :  { %v247_v39 = vrot.slane %v239_v28, %v8073_v27  ;;  %v254_v40 = vrot.slane %v240_v29, %v8073_v27 }
 0x158   :  { %v8064_v25 = vpop.permute.xlu1 %159  ;;  %v8066_v26 = vpop.permute.xlu0 %153 }
 0x159   :  { %10978 = vst [vmem:[#allocation9_spill] sm:$0xff] %v8064_v25  ;;  %10979 = vst [vmem:[#allocation10_spill] sm:$0xff] %v8066_v26  ;;  %453 = vrot.lane.b32.xlu1 %v8058_v20, %s7925_s17  ;;  %447 = vrot.lane.b32.xlu0 %v8066_v26, %s7925_s17  ;;  %v171_v31 = vcombine.low %v8041_v16, %v8064_v25  ;;  %v172_v32 = vcombine.high %v8041_v16, %v8064_v25 }
 0x15b   :  { %v179_v46 = vrot.slane %v171_v31, %v8073_v27  ;;  %v186_v47 = vrot.slane %v172_v32, %v8073_v27 }
 0x15c   :  { %v8083_v33 = vpop.permute.xlu1 %167  ;;  %v8085_v34 = vpop.permute.xlu0 %165 }
 0x15d   :  { %10981 = vst [vmem:[#allocation12_spill] sm:$0xff] %v8083_v33  ;;  %10982 = vst [vmem:[#allocation13_spill] sm:$0xff] %v8085_v34  ;;  %v255_v35 = vcombine.low %v8060_v21, %v8083_v33  ;;  %v256_v36 = vcombine.high %v8060_v21, %v8083_v33  ;;  %v187_v37 = vcombine.low %v8066_v26, %v8085_v34  ;;  %457 = vrot.lane.b32.xlu1 %v8083_v33, %s7925_s17 }
 0x15e   :  { %v188_v38 = vcombine.high %v8066_v26, %v8085_v34  ;;  %451 = vrot.lane.b32.xlu0 %v8064_v25, %s7925_s17 }
 0x15f   :  { %v263_v42 = vrot.slane %v255_v35, %v8073_v27  ;;  %v270_v43 = vrot.slane %v256_v36, %v8073_v27  ;;  %v195_v44 = vrot.slane %v187_v37, %v8073_v27 }
 0x160   :  { %v202_v45 = vrot.slane %v188_v38, %v8073_v27 }
 0x161   :  { %v271_v48 = vcombine.low %v247_v39, %v263_v42  ;;  %v272_v49 = vcombine.high %v247_v39, %v263_v42  ;;  %v287_v50 = vcombine.low %v254_v40, %v270_v43  ;;  %v288_v51 = vcombine.high %v254_v40, %v270_v43 }
 0x162   :  { %v203_v52 = vcombine.low %v179_v46, %v195_v44  ;;  %v204_v53 = vcombine.high %v179_v46, %v195_v44  ;;  %v219_v54 = vcombine.low %v186_v47, %v202_v45  ;;  %v220_v55 = vcombine.high %v186_v47, %v202_v45  ;;  %455 = vrot.lane.b32.xlu0 %v8085_v34, %s7925_s17 }
 0x163   :  { %v279_v56 = vrot.slane %v271_v48, %v8100_v41  ;;  %v286_v57 = vrot.slane %v272_v49, %v8100_v41  ;;  %v295_v58 = vrot.slane %v287_v50, %v8100_v41  ;;  %v302_v59 = vrot.slane %v288_v51, %v8100_v41 }
 0x164   :  { %v211_v60 = vrot.slane %v203_v52, %v8100_v41  ;;  %v218_v61 = vrot.slane %v204_v53, %v8100_v41  ;;  %v227_v62 = vrot.slane %v219_v54, %v8100_v41  ;;  %v234_v63 = vrot.slane %v220_v55, %v8100_v41  ;;  %v446_v55 = vpop.permute.xlu1 %445 }
 0x165   :  { %v375_v0 = vcombine.low %v279_v56, %v286_v57  ;;  %v6930_v1 = vcombine.high %v279_v56, %v286_v57  ;;  %v391_v2 = vcombine.low %v295_v58, %v302_v59  ;;  %v6931_v3 = vcombine.high %v295_v58, %v302_v59  ;;  %v444_v56 = vpop.permute.xlu0 %443 }
 0x166   :  { %v307_v4 = vcombine.low %v211_v60, %v218_v61  ;;  %v6928_v5 = vcombine.high %v211_v60, %v218_v61  ;;  %v323_v6 = vcombine.low %v227_v62, %v234_v63  ;;  %v6929_v7 = vcombine.high %v227_v62, %v234_v63 }
 0x167   :  { %v382_v8 = vrot.slane %v375_v0, %v8073_v27  ;;  %v390_v11 = vrot.slane %v6930_v1, %v8073_v27  ;;  %v398_v13 = vrot.slane %v391_v2, %v8073_v27  ;;  %v406_v15 = vrot.slane %v6931_v3, %v8073_v27 }
 0x168   :  { %v314_v17 = vrot.slane %v307_v4, %v8073_v27  ;;  %v322_v18 = vrot.slane %v6928_v5, %v8073_v27  ;;  %v330_v19 = vrot.slane %v323_v6, %v8073_v27  ;;  %v338_v22 = vrot.slane %v6929_v7, %v8073_v27 }
 0x169   :  { %v407_v23 = vcombine.low %v382_v8, %v390_v11  ;;  %v423_v24 = vcombine.low %v398_v13, %v406_v15  ;;  %v408_v28 = vcombine.high %v382_v8, %v390_v11  ;;  %v424_v29 = vcombine.high %v398_v13, %v406_v15 }
 0x16a   :  { %v339_v30 = vcombine.low %v314_v17, %v322_v18  ;;  %v355_v31 = vcombine.low %v330_v19, %v338_v22  ;;  %v340_v32 = vcombine.high %v314_v17, %v322_v18  ;;  %v356_v35 = vcombine.high %v330_v19, %v338_v22 }
 0x16b   :  { %v415_v36 = vrot.slane %v407_v23, %v8100_v41  ;;  %v431_v37 = vrot.slane %v423_v24, %v8100_v41  ;;  %v422_v38 = vrot.slane %v408_v28, %v8100_v41  ;;  %v438_v39 = vrot.slane %v424_v29, %v8100_v41 }
 0x16c   :  { %v347_v40 = vrot.slane %v339_v30, %v8100_v41  ;;  %v363_v42 = vrot.slane %v355_v31, %v8100_v41  ;;  %v354_v43 = vrot.slane %v340_v32, %v8100_v41  ;;  %v370_v44 = vrot.slane %v356_v35, %v8100_v41 }
 0x16d   :  { %v8136_v45 = vcombine.low %v415_v36, %v431_v37  ;;  %v8138_v46 = vcombine.low %v422_v38, %v438_v39  ;;  %v8154_v51 = vcombine.high %v415_v36, %v431_v37  ;;  %v8156_v52 = vcombine.high %v422_v38, %v438_v39 }
 0x16e   :  { %v371_v47 = vcombine.low %v347_v40, %v363_v42  ;;  %v8140_v48 = vcombine.low %v354_v43, %v370_v44  ;;  %v8143_v49 = vcombine.high %v354_v43, %v370_v44  ;;  %v372_v50 = vcombine.high %v347_v40, %v363_v42 }
 0x16f   :  { %v10912_v53 = vmov 2   ;;  %v10904_v54 = vmov 0  }
 0x170   :  { %7220 = vmatprep.mubr.msk.f32.mxu0 %vm1036_vm1, %v371_v47  ;;  %7226 = vmatprep.mubr.msk.f32.mxu1 %vm1036_vm1, %v8140_v48 }
 0x171   :  { %7221 = vmatmul.mubr.msk.f32.vlgmr.msra.gmra.mrb[2].mxu0 %vm1036_vm1, %v8136_v45  ;;  %7227 = vmatmul.mubr.msk.f32.vlgmr.msra.gmra.mrb[0].mxu1 %vm1036_vm1, %v8138_v46 }
 0x172   :  { %7223 = vmatprep.mubr.msk.f32.mxu0 %vm1036_vm1, %v372_v50  ;;  %7229 = vmatprep.mubr.msk.f32.mxu1 %vm1036_vm1, %v8143_v49 }
 0x173   :  { %7636 = vset.pattern.permute.xlu0 %v10912_v53  ;;  %7633 = vset.pattern.permute.xlu1 %v10904_v54 }
 0x175   :  { %7224 = vmatmul.mubr.msk.f32.gmra.mrb[4].mxu0 %vm1036_vm1, %v8154_v51  ;;  %7230 = vmatmul.mubr.msk.f32.gmra.mrb[2].mxu1 %vm1036_vm1, %v8156_v52 }
 0x176   :  { %7236 = vmatprep.mubr.msk.f32.mxu0 %vm1036_vm1, %v371_v47  ;;  %7243 = vmatprep.mubr.msk.f32.mxu1 %vm1036_vm1, %v372_v50 }
 0x1c7   :  { %v450_v57 = vpop.permute.xlu1 %449 }
 0x1cb   :  { %v454_v58 = vpop.permute.xlu1 %453  ;;  %v448_v59 = vpop.permute.xlu0 %447 }
 0x1cc   :  { %v535_v60 = vcombine.low %v446_v55, %v454_v58  ;;  %v536_v61 = vcombine.high %v446_v55, %v454_v58 }
 0x1ce   :  { %v543_v2 = vrot.slane %v535_v60, %v8073_v27  ;;  %v550_v3 = vrot.slane %v536_v61, %v8073_v27 }
 0x1cf   :  { %v458_v62 = vpop.permute.xlu1 %457 }
 0x1d0   :  { %v551_v63 = vcombine.low %v450_v57, %v458_v62  ;;  %v552_v0 = vcombine.high %v450_v57, %v458_v62  ;;  %v452_v1 = vpop.permute.xlu0 %451 }
 0x1d1   :  { %v467_v6 = vcombine.low %v444_v56, %v452_v1  ;;  %v468_v7 = vcombine.high %v444_v56, %v452_v1 }
 0x1d2   :  { %v559_v4 = vrot.slane %v551_v63, %v8073_v27  ;;  %v566_v5 = vrot.slane %v552_v0, %v8073_v27 }
 0x1d3   :  { %v475_v29 = vrot.slane %v467_v6, %v8073_v27  ;;  %v482_v30 = vrot.slane %v468_v7, %v8073_v27 }
 0x1d4   :  { %v567_v8 = vcombine.low %v543_v2, %v559_v4  ;;  %v568_v11 = vcombine.high %v543_v2, %v559_v4  ;;  %v583_v13 = vcombine.low %v550_v3, %v566_v5  ;;  %v584_v15 = vcombine.high %v550_v3, %v566_v5  ;;  %v456_v17 = vpop.permute.xlu0 %455 }
 0x1d5   :  { %v483_v18 = vcombine.low %v448_v59, %v456_v17  ;;  %v484_v19 = vcombine.high %v448_v59, %v456_v17 }
 0x1d6   :  { %v575_v22 = vrot.slane %v567_v8, %v8100_v41  ;;  %v582_v23 = vrot.slane %v568_v11, %v8100_v41  ;;  %v591_v24 = vrot.slane %v583_v13, %v8100_v41  ;;  %v598_v28 = vrot.slane %v584_v15, %v8100_v41 }
 0x1d7   :  { %v491_v31 = vrot.slane %v483_v18, %v8073_v27  ;;  %v498_v32 = vrot.slane %v484_v19, %v8073_v27 }
 0x1d8   :  { %v671_v35 = vcombine.low %v575_v22, %v582_v23  ;;  %v6934_v36 = vcombine.high %v575_v22, %v582_v23  ;;  %v687_v37 = vcombine.low %v591_v24, %v598_v28  ;;  %v6935_v38 = vcombine.high %v591_v24, %v598_v28 }
 0x1d9   :  { %v499_v39 = vcombine.low %v475_v29, %v491_v31  ;;  %v500_v40 = vcombine.high %v475_v29, %v491_v31  ;;  %v515_v42 = vcombine.low %v482_v30, %v498_v32  ;;  %v516_v43 = vcombine.high %v482_v30, %v498_v32 }
 0x1da   :  { %v678_v44 = vrot.slane %v671_v35, %v8073_v27  ;;  %v686_v47 = vrot.slane %v6934_v36, %v8073_v27  ;;  %v694_v50 = vrot.slane %v687_v37, %v8073_v27  ;;  %v702_v55 = vrot.slane %v6935_v38, %v8073_v27 }
 0x1db   :  { %v507_v56 = vrot.slane %v499_v39, %v8100_v41  ;;  %v514_v57 = vrot.slane %v500_v40, %v8100_v41  ;;  %v523_v58 = vrot.slane %v515_v42, %v8100_v41  ;;  %v530_v59 = vrot.slane %v516_v43, %v8100_v41 }
 0x1dc   :  { %v703_v60 = vcombine.low %v678_v44, %v686_v47  ;;  %v719_v61 = vcombine.low %v694_v50, %v702_v55  ;;  %v704_v2 = vcombine.high %v678_v44, %v686_v47  ;;  %v720_v3 = vcombine.high %v694_v50, %v702_v55 }
 0x1dd   :  { %v603_v62 = vcombine.low %v507_v56, %v514_v57  ;;  %v6932_v63 = vcombine.high %v507_v56, %v514_v57  ;;  %v619_v0 = vcombine.low %v523_v58, %v530_v59  ;;  %v6933_v1 = vcombine.high %v523_v58, %v530_v59 }
 0x1de   :  { %v711_v8 = vrot.slane %v703_v60, %v8100_v41  ;;  %v727_v11 = vrot.slane %v719_v61, %v8100_v41  ;;  %v718_v19 = vrot.slane %v704_v2, %v8100_v41  ;;  %v734_v22 = vrot.slane %v720_v3, %v8100_v41 }
 0x1df   :  { %v610_v4 = vrot.slane %v603_v62, %v8073_v27  ;;  %v618_v5 = vrot.slane %v6932_v63, %v8073_v27  ;;  %v626_v6 = vrot.slane %v619_v0, %v8073_v27  ;;  %v634_v7 = vrot.slane %v6933_v1, %v8073_v27 }
 0x1e0   :  { %v735_v30 = vcombine.low %v711_v8, %v727_v11  ;;  %v736_v31 = vcombine.high %v711_v8, %v727_v11  ;;  %v10984_v38 = vmov 0  ;;  %v737_v42 = vcombine.low %v718_v19, %v734_v22  ;;  %v8355_v8 = vld [vmem:[%s10896_s2 + $0x18] sm:$0xff] }
 0x1e1   :  { %v635_v13 = vcombine.low %v610_v4, %v618_v5  ;;  %v651_v15 = vcombine.low %v626_v6, %v634_v7  ;;  %v636_v17 = vcombine.high %v610_v4, %v618_v5  ;;  %v652_v18 = vcombine.high %v626_v6, %v634_v7  ;;  %v8349_v5 = vld [vmem:[%s10896_s2 + $0x8] sm:$0xff] }
 0x1e2   :  { %v10985_v38 = vsel %vm8200_vm2, 4294967295, %v10984_v38  ;;  %v738_v43 = vcombine.high %v718_v19, %v734_v22  ;;  %v10918_v57 = vmov 1   ;;  %v10906_v58 = vmov 4  }
 0x1e3   :  { %v643_v23 = vrot.slane %v635_v13, %v8100_v41  ;;  %v659_v24 = vrot.slane %v651_v15, %v8100_v41  ;;  %v650_v28 = vrot.slane %v636_v17, %v8100_v41  ;;  %v666_v29 = vrot.slane %v652_v18, %v8100_v41  ;;  %10986 = vst [vmem:[#allocation15_spill] sm:$0xff] %v10985_v38 }
 0x1e4   :  { %v10908_v59 = vmov 5   ;;  %v10914_v60 = vmov 6   ;;  %v10916_v61 = vmov 7   ;;  %v10920_v62 = vmov 8  }
 0x1e5   :  { %v667_v32 = vcombine.low %v643_v23, %v659_v24  ;;  %v668_v35 = vcombine.high %v643_v23, %v659_v24  ;;  %v669_v36 = vcombine.low %v650_v28, %v666_v29  ;;  %v670_v37 = vcombine.high %v650_v28, %v666_v29  ;;  %v8375_v28 = vld [vmem:[%s10896_s2 + $0x28] sm:$0xff] }
 0x1e7   :  { %v7459_v39 = vpack.c.bf16 %v735_v30, %v667_v32  ;;  %v7465_v40 = vpack.c.bf16 %v736_v31, %v668_v35  ;;  %v7471_v44 = vpack.c.bf16 %v737_v42, %v669_v36  ;;  %v7477_v47 = vpack.c.bf16 %v738_v43, %v670_v37  ;;  %v8384_v35 = vld [vmem:[%s10896_s2 + $0x38] sm:$0xff]  ;;  %v8391_v37 = vld [vmem:[%s10896_s2 + $0x48] sm:$0xff] }
 0x1e9   :  { %7461 = vmatprep.subr.msk.bf16.mxu0 %vm8200_vm2, %v7459_v39  ;;  %7467 = vmatprep.subr.msk.bf16.mxu1 %vm8200_vm2, %v7465_v40 }
 0x1ea   :  { %7464 = vmatpush3.bf16.xpose.msk.msra.mxu0 %vm8200_vm2, %v7459_v39  ;;  %7470 = vmatpush3.bf16.xpose.msk.msra.mxu1 %vm8200_vm2, %v7465_v40  ;;  %v8397_v40 = vld [vmem:[%s10896_s2 + $0x58] sm:$0xff] }
 0x1eb   :  { %7473 = vmatprep.subr.msk.bf16.mxu0 %vm8200_vm2, %v7471_v44  ;;  %7479 = vmatprep.subr.msk.bf16.mxu1 %vm8200_vm2, %v7477_v47 }
 0x1f1   :  { %7237 = vmatmul.mubr.msk.f32.vlgmr.msra.gmra.mrb[6].mxu0 %vm1036_vm1, %v8136_v45  ;;  %7244 = vmatmul.mubr.msk.f32.vlgmr.msra.gmra.mrb[4].mxu1 %vm1036_vm1, %v8154_v51 }
 0x1f2   :  { %7476 = vmatpush3.bf16.xpose.msk.msra.mxu0 %vm8200_vm2, %v7471_v44  ;;  %7250 = vmatprep.mubr.msk.f32.mxu0 %vm1036_vm1, %v8140_v48 }
 0x1f3   :  { %7482 = vmatpush3.bf16.xpose.msk.msra.mxu1 %vm8200_vm2, %v7477_v47  ;;  %7257 = vmatprep.mubr.msk.f32.mxu1 %vm1036_vm1, %v8143_v49 }
 0x1f9   :  { %7251 = vmatmul.mubr.msk.f32.vlgmr.msra.gmra.mrb[8].mxu0 %vm1036_vm1, %v8138_v46 }
 0x1fa   :  { %7258 = vmatmul.mubr.msk.f32.vlgmr.msra.gmra.mrb[6].mxu1 %vm1036_vm1, %v8156_v52  ;;  %v10910_v52 = vmov 3  }
 0x244   :  { %v7222_v45 = vpop.f32.mrb[2].mxu0  ;;  %v8232_v51 = vpop.f32.mrb[0].mxu1 }
 0x245   :  { %v8234_v50 = vpop.f32.mrb[1].mxu1  ;;  %1173 = vperm.xlu1 %7633, %v7222_v45   ;;  %v8236_v55 = vpop.f32.mrb[3].mxu0  ;;  %1591 = vperm.xlu0 %7636, %v7222_v45  }
 0x248   :  { %v8238_v48 = vpop.f32.mrb[4].mxu0  ;;  %v8240_v56 = vpop.f32.mrb[2].mxu1 }
 0x249   :  { %v8242_v49 = vpop.f32.mrb[3].mxu1  ;;  %7634 = vset.pattern.permute.xlu1 %v10918_v57  ;;  %v8245_v46 = vpop.f32.mrb[5].mxu0  ;;  %7638 = vset.pattern.permute.xlu0 %v10910_v52 }
 0x24a   :  { %1543 = vperm.xlu1 %7634, %v7222_v45   ;;  %1639 = vperm.xlu0 %7638, %v7222_v45  }
 0x24e   :  { %7635 = vset.pattern.permute.xlu1 %v10904_v54  ;;  %7640 = vset.pattern.permute.xlu0 %v10906_v58 }
 0x24f   :  { %1193 = vperm.xlu1 %7635, %v8232_v51   ;;  %1687 = vperm.xlu0 %7640, %v7222_v45  }
 0x253   :  { %7637 = vset.pattern.permute.xlu1 %v10918_v57  ;;  %7642 = vset.pattern.permute.xlu0 %v10908_v59 }
 0x254   :  { %1559 = vperm.xlu1 %7637, %v8232_v51   ;;  %1735 = vperm.xlu0 %7642, %v7222_v45  }
 0x258   :  { %7639 = vset.pattern.permute.xlu1 %v10912_v53  ;;  %7644 = vset.pattern.permute.xlu0 %v10914_v60 }
 0x259   :  { %1607 = vperm.xlu1 %7639, %v8232_v51   ;;  %1783 = vperm.xlu0 %7644, %v7222_v45  }
 0x25d   :  { %7641 = vset.pattern.permute.xlu1 %v10910_v52  ;;  %7646 = vset.pattern.permute.xlu0 %v10916_v61 }
 0x25e   :  { %1655 = vperm.xlu1 %7641, %v8232_v51   ;;  %1831 = vperm.xlu0 %7646, %v7222_v45  }
 0x262   :  { %7643 = vset.pattern.permute.xlu1 %v10906_v58  ;;  %7648 = vset.pattern.permute.xlu0 %v10920_v62 }
 0x263   :  { %1703 = vperm.xlu1 %7643, %v8232_v51   ;;  %1879 = vperm.xlu0 %7648, %v7222_v45   ;;  %v8406_v45 = vld [vmem:[%s10896_s2 + $0x68] sm:$0xff] }
 0x267   :  { %7645 = vset.pattern.permute.xlu1 %v10908_v59  ;;  %7650 = vset.pattern.permute.xlu0 %v10904_v54 }
 0x268   :  { %1751 = vperm.xlu1 %7645, %v8232_v51   ;;  %1168 = vperm.xlu0 %7650, %v8236_v55  }
 0x26c   :  { %7647 = vset.pattern.permute.xlu1 %v10914_v60  ;;  %1188 = vperm.xlu0 %7650, %v8234_v50  }
 0x26d   :  { %1799 = vperm.xlu1 %7647, %v8232_v51  }
 0x270   :  { %7653 = vset.pattern.permute.xlu0 %v10918_v57 }
 0x271   :  { %7649 = vset.pattern.permute.xlu1 %v10916_v61  ;;  %1555 = vperm.xlu0 %7653, %v8234_v50  }
 0x272   :  { %1847 = vperm.xlu1 %7649, %v8232_v51  }
 0x275   :  { %7655 = vset.pattern.permute.xlu0 %v10912_v53 }
 0x276   :  { %7651 = vset.pattern.permute.xlu1 %v10918_v57  ;;  %1603 = vperm.xlu0 %7655, %v8234_v50  }
 0x277   :  { %1539 = vperm.xlu1 %7651, %v8236_v55  }
 0x27a   :  { %7657 = vset.pattern.permute.xlu0 %v10910_v52 }
 0x27b   :  { %7652 = vset.pattern.permute.xlu1 %v10912_v53  ;;  %1651 = vperm.xlu0 %7657, %v8234_v50  }
 0x27c   :  { %1587 = vperm.xlu1 %7652, %v8236_v55  }
 0x27f   :  { %7659 = vset.pattern.permute.xlu0 %v10906_v58 }
 0x280   :  { %7654 = vset.pattern.permute.xlu1 %v10910_v52  ;;  %1699 = vperm.xlu0 %7659, %v8234_v50  }
 0x281   :  { %1635 = vperm.xlu1 %7654, %v8236_v55  }
 0x284   :  { %7661 = vset.pattern.permute.xlu0 %v10908_v59 }
 0x285   :  { %7656 = vset.pattern.permute.xlu1 %v10906_v58  ;;  %1747 = vperm.xlu0 %7661, %v8234_v50  }
 0x286   :  { %1683 = vperm.xlu1 %7656, %v8236_v55  }
 0x289   :  { %7663 = vset.pattern.permute.xlu0 %v10914_v60 }
 0x28a   :  { %7658 = vset.pattern.permute.xlu1 %v10908_v59  ;;  %1795 = vperm.xlu0 %7663, %v8234_v50  }
 0x28b   :  { %1731 = vperm.xlu1 %7658, %v8236_v55  }
 0x28e   :  { %7665 = vset.pattern.permute.xlu0 %v10916_v61 }
 0x28f   :  { %7660 = vset.pattern.permute.xlu1 %v10914_v60  ;;  %1843 = vperm.xlu0 %7665, %v8234_v50  }
 0x290   :  { %1779 = vperm.xlu1 %7660, %v8236_v55  }
 0x293   :  { %7666 = vset.pattern.permute.xlu0 %v10904_v54 }
 0x294   :  { %7662 = vset.pattern.permute.xlu1 %v10916_v61  ;;  %1183 = vperm.xlu0 %7666, %v8238_v48  }
 0x295   :  { %1827 = vperm.xlu1 %7662, %v8236_v55  }
 0x298   :  { %7682 = vset.pattern.permute.xlu0 %v10916_v61 }
 0x299   :  { %7664 = vset.pattern.permute.xlu1 %v10920_v62  ;;  %1855 = vperm.xlu0 %7682, %v8240_v56  }
 0x29a   :  { %1875 = vperm.xlu1 %7664, %v8236_v55   ;;  %v8413_v55 = vld [vmem:[%s10896_s2 + $0x78] sm:$0xff] }
 0x29d   :  { %7684 = vset.pattern.permute.xlu0 %v10918_v57 }
 0x29e   :  { %1891 = vperm.xlu1 %7664, %v8234_v50   ;;  %1547 = vperm.xlu0 %7684, %v8245_v46  }
 0x2a2   :  { %7667 = vset.pattern.permute.xlu1 %v10918_v57  ;;  %7685 = vset.pattern.permute.xlu0 %v10912_v53 }
 0x2a3   :  { %1551 = vperm.xlu1 %7667, %v8238_v48   ;;  %1595 = vperm.xlu0 %7685, %v8245_v46  }
 0x2a7   :  { %7668 = vset.pattern.permute.xlu1 %v10904_v54  ;;  %7687 = vset.pattern.permute.xlu0 %v10910_v52 }
 0x2a8   :  { %1203 = vperm.xlu1 %7668, %v8240_v56   ;;  %1643 = vperm.xlu0 %7687, %v8245_v46  }
 0x2ac   :  { %7669 = vset.pattern.permute.xlu1 %v10912_v53  ;;  %7689 = vset.pattern.permute.xlu0 %v10906_v58 }
 0x2ad   :  { %1599 = vperm.xlu1 %7669, %v8238_v48   ;;  %1691 = vperm.xlu0 %7689, %v8245_v46  }
 0x2b1   :  { %7670 = vset.pattern.permute.xlu1 %v10918_v57  ;;  %7691 = vset.pattern.permute.xlu0 %v10908_v59 }
 0x2b2   :  { %1567 = vperm.xlu1 %7670, %v8240_v56   ;;  %1739 = vperm.xlu0 %7691, %v8245_v46  }
 0x2b6   :  { %7671 = vset.pattern.permute.xlu1 %v10910_v52  ;;  %7693 = vset.pattern.permute.xlu0 %v10914_v60 }
 0x2b7   :  { %1647 = vperm.xlu1 %7671, %v8238_v48   ;;  %1787 = vperm.xlu0 %7693, %v8245_v46  }
 0x2bb   :  { %7672 = vset.pattern.permute.xlu1 %v10912_v53  ;;  %7695 = vset.pattern.permute.xlu0 %v10916_v61 }
 0x2bc   :  { %1615 = vperm.xlu1 %7672, %v8240_v56   ;;  %1835 = vperm.xlu0 %7695, %v8245_v46  }
 0x2c0   :  { %7673 = vset.pattern.permute.xlu1 %v10906_v58  ;;  %7697 = vset.pattern.permute.xlu0 %v10920_v62 }
 0x2c1   :  { %1695 = vperm.xlu1 %7673, %v8238_v48   ;;  %1883 = vperm.xlu0 %7697, %v8245_v46  }
 0x2c4   :  { %v1174_v63 = vpop.permute.xlu1 %1173  ;;  %v7238_v0 = vpop.f32.mrb[6].mxu0 }
 0x2c5   :  { %v8337_v1 = vpop.f32.mrb[4].mxu1  ;;  %v1592_v2 = vpop.permute.xlu0 %1591  ;;  %7674 = vset.pattern.permute.xlu1 %v10910_v52  ;;  %1899 = vperm.xlu0 %7697, %v8242_v49   ;;  %v1207_v11 = vmul.f32 %v1174_v63, %v8349_v5 }
 0x2c6   :  { %v8341_v3 = vpop.f32.mrb[7].mxu0  ;;  %v8343_v4 = vpop.f32.mrb[5].mxu1  ;;  %1663 = vperm.xlu1 %7674, %v8240_v56   ;;  %v1619_v30 = vmul.f32 %v1592_v2, %v8375_v28 }
 0x2c7   :  { %v1292_v23 = vadd.f32 %v7238_v0, %v1207_v11 }
 0x2c9   :  { %v1544_v6 = vpop.permute.xlu1 %1543  ;;  %v1640_v7 = vpop.permute.xlu0 %1639  ;;  %7700 = vset.pattern.permute.xlu0 %v10904_v54 }
 0x2ca   :  { %7675 = vset.pattern.permute.xlu1 %v10908_v59  ;;  %v1571_v15 = vmul.f32 %v1544_v6, %v8355_v8  ;;  %v1667_v39 = vmul.f32 %v1640_v7, %v8384_v35 }
 0x2cb   :  { %1743 = vperm.xlu1 %7675, %v8238_v48  }
 0x2cc   :  { %v8360_v13 = vpop.f32.mrb[8].mxu0  ;;  %v1579_v29 = vadd.f32 %v1571_v15, %v1292_v23  ;;  %v8424_v15 = vld [vmem:[%s10896_s2 + $0x88] sm:$0xff] }
 0x2cd   :  { %v8363_v17 = vpop.f32.mrb[6].mxu1  ;;  %v8365_v18 = vpop.f32.mrb[9].mxu0 }
 0x2ce   :  { %v8367_v19 = vpop.f32.mrb[7].mxu1  ;;  %v8369_v22 = vpop.permute.xlu1 %1193  ;;  %v1627_v36 = vadd.f32 %v1619_v30, %v1579_v29 }
 0x2cf   :  { %v1688_v24 = vpop.permute.xlu0 %1687  ;;  %7676 = vset.pattern.permute.xlu1 %v10906_v58 }
 0x2d0   :  { %1711 = vperm.xlu1 %7676, %v8240_v56   ;;  %v1675_v44 = vadd.f32 %v1667_v39, %v1627_v36  ;;  %v1715_v47 = vmul.f32 %v1688_v24, %v8391_v37  ;;  %v8434_v36 = vld [vmem:[%s10897_s1 + $0x8] sm:$0xff] }
 0x2d2   :  { %v1723_v63 = vadd.f32 %v1715_v47, %v1675_v44 }
 0x2d3   :  { %v8379_v31 = vpop.permute.xlu1 %1559  ;;  %v1736_v32 = vpop.permute.xlu0 %1735 }
 0x2d4   :  { %7677 = vset.pattern.permute.xlu1 %v10914_v60  ;;  %v1763_v50 = vmul.f32 %v1736_v32, %v8397_v40 }
 0x2d5   :  { %1791 = vperm.xlu1 %7677, %v8238_v48  }
 0x2d6   :  { %v1771_v7 = vadd.f32 %v1763_v50, %v1723_v63 }
 0x2d8   :  { %v8399_v42 = vpop.permute.xlu1 %1607  ;;  %v1784_v43 = vpop.permute.xlu0 %1783 }
 0x2d9   :  { %7678 = vset.pattern.permute.xlu1 %v10908_v59  ;;  %v1811_v0 = vmul.f32 %v1784_v43, %v8406_v45 }
 0x2da   :  { %1759 = vperm.xlu1 %7678, %v8240_v56  }
 0x2db   :  { %v1819_v23 = vadd.f32 %v1811_v0, %v1771_v7 }
 0x2dd   :  { %v8416_v2 = vpop.permute.xlu1 %1655  ;;  %v1832_v6 = vpop.permute.xlu0 %1831 }
 0x2de   :  { %7679 = vset.pattern.permute.xlu1 %v10916_v61  ;;  %v1859_v11 = vmul.f32 %v1832_v6, %v8413_v55 }
 0x2df   :  { %1839 = vperm.xlu1 %7679, %v8238_v48  }
 0x2e0   :  { %v1867_v30 = vadd.f32 %v1859_v11, %v1819_v23 }
 0x2e2   :  { %v8426_v24 = vpop.permute.xlu1 %1703  ;;  %v1880_v29 = vpop.permute.xlu0 %1879 }
 0x2e3   :  { %10987 = vst [vmem:[#allocation16_spill] sm:$0xff] %v8426_v24  ;;  %v1907_v32 = vmul.f32 %v1880_v29, %v8424_v15  ;;  %7680 = vset.pattern.permute.xlu1 %v10914_v60  ;;  %v8469_v29 = vld [vmem:[%s10896_s2 + $0x10] sm:$0xff] }
 0x2e4   :  { %1807 = vperm.xlu1 %7680, %v8240_v56  }
 0x2e5   :  { %v1915_v39 = vadd.f32 %v1907_v32, %v1867_v30 }
 0x2e7   :  { %v8436_v43 = vpop.permute.xlu1 %1751  ;;  %v8439_v44 = vadd.f32 %v1915_v39, %v8434_v36  ;;  %v1169_v7 = vpop.permute.xlu0 %1168  ;;  %v8476_v39 = vld [vmem:[%s10896_s2 + $0x20] sm:$0xff] }
 0x2e8   :  { %10988 = vst [vmem:[#allocation17_spill] sm:$0xff] %v8436_v43  ;;  %7681 = vset.pattern.permute.xlu1 %v10920_v62 }
 0x2e9   :  { %10989 = vst [vmem:[#allocation18_spill] sm:$0xff] %v8439_v44  ;;  %1887 = vperm.xlu1 %7681, %v8238_v48   ;;  %v1934_v47 = vsel %vm1930_vm3, %v8439_v44, -inf }
 0x2ea   :  { %1935 = vmax.xlane.f32.xlu0 %v1934_v47 }
 0x2ec   :  { %v8445_v50 = vpop.permute.xlu1 %1799 }
 0x2ed   :  { %10990 = vst [vmem:[#allocation19_spill] sm:$0xff] %v8445_v50  ;;  %7683 = vset.pattern.permute.xlu1 %v10904_v54  ;;  %v8484_v54 = vld [vmem:[%s10896_s2 + $0x30] sm:$0xff] }
 0x2ee   :  { %1178 = vperm.xlu1 %7683, %v8245_v46   ;;  %v8461_v46 = vld [vmem:[%s10896_s2] sm:$0xff] }
 0x2ef   :  { %v1206_v23 = vmul.f32 %v1169_v7, %v8461_v46 }
 0x2f1   :  { %v8449_v63 = vpop.permute.xlu1 %1847  ;;  %v1287_v47 = vadd.f32 %v8341_v3, %v1206_v23 }
 0x2f2   :  { %10991 = vst [vmem:[#allocation20_spill] sm:$0xff] %v8449_v63  ;;  %1198 = vperm.xlu1 %7683, %v8242_v49  }
 0x2f6   :  { %v1540_v0 = vpop.permute.xlu1 %1539  ;;  %7686 = vset.pattern.permute.xlu1 %v10918_v57 }
 0x2f7   :  { %1563 = vperm.xlu1 %7686, %v8242_v49   ;;  %v1570_v30 = vmul.f32 %v1540_v0, %v8469_v29 }
 0x2f9   :  { %v1578_v0 = vadd.f32 %v1570_v30, %v1287_v47  ;;  %v8504_v30 = vld [vmem:[%s10896_s2 + $0x60] sm:$0xff] }
 0x2fb   :  { %v1588_v48 = vpop.permute.xlu1 %1587  ;;  %7688 = vset.pattern.permute.xlu1 %v10912_v53 }
 0x2fc   :  { %1611 = vperm.xlu1 %7688, %v8242_v49   ;;  %v1618_v7 = vmul.f32 %v1588_v48, %v8476_v39  ;;  %v8498_v48 = vld [vmem:[%s10896_s2 + $0x50] sm:$0xff] }
 0x2fe   :  { %v1626_v53 = vadd.f32 %v1618_v7, %v1578_v0 }
 0x300   :  { %v1636_v6 = vpop.permute.xlu1 %1635  ;;  %7690 = vset.pattern.permute.xlu1 %v10910_v52 }
 0x301   :  { %1659 = vperm.xlu1 %7690, %v8242_v49  }
 0x305   :  { %v1684_v11 = vpop.permute.xlu1 %1683  ;;  %7692 = vset.pattern.permute.xlu1 %v10906_v58  ;;  %v1666_v58 = vmul.f32 %v1636_v6, %v8484_v54 }
 0x306   :  { %1707 = vperm.xlu1 %7692, %v8242_v49  }
 0x307   :  { %v1674_v23 = vadd.f32 %v1666_v58, %v1626_v53 }
 0x30a   :  { %v1732_v32 = vpop.permute.xlu1 %1731  ;;  %7694 = vset.pattern.permute.xlu1 %v10908_v59  ;;  %v8490_v59 = vld [vmem:[%s10896_s2 + $0x40] sm:$0xff] }
 0x30b   :  { %1755 = vperm.xlu1 %7694, %v8242_v49   ;;  %v1714_v3 = vmul.f32 %v1684_v11, %v8490_v59  ;;  %v1762_v6 = vmul.f32 %v1732_v32, %v8498_v48  ;;  %v8508_v11 = vpop.permute.xlu0 %1188  ;;  %v8520_v32 = vld [vmem:[%s10896_s2 + $0x80] sm:$0xff] }
 0x30d   :  { %v1722_v47 = vadd.f32 %v1714_v3, %v1674_v23 }
 0x30f   :  { %v1780_v52 = vpop.permute.xlu1 %1779  ;;  %7696 = vset.pattern.permute.xlu1 %v10914_v60  ;;  %v8513_v60 = vld [vmem:[%s10896_s2 + $0x70] sm:$0xff]  ;;  %v1770_v53 = vadd.f32 %v1762_v6, %v1722_v47  ;;  %v1556_v57 = vpop.permute.xlu0 %1555 }
 0x310   :  { %1803 = vperm.xlu1 %7696, %v8242_v49   ;;  %v1810_v7 = vmul.f32 %v1780_v52, %v8504_v30 }
 0x312   :  { %v1818_v52 = vadd.f32 %v1810_v7, %v1770_v53 }
 0x313   :  { %v1604_v53 = vpop.permute.xlu0 %1603 }
 0x314   :  { %v1828_v0 = vpop.permute.xlu1 %1827  ;;  %7698 = vset.pattern.permute.xlu1 %v10916_v61 }
 0x315   :  { %1851 = vperm.xlu1 %7698, %v8242_v49   ;;  %v1858_v58 = vmul.f32 %v1828_v0, %v8513_v60  ;;  %v8528_v49 = vld [vmem:[%s10897_s1] sm:$0xff] }
 0x317   :  { %v1866_v23 = vadd.f32 %v1858_v58, %v1818_v52  ;;  %v10993_v58 = vmov 1   ;;  %v1652_v52 = vpop.permute.xlu0 %1651 }
 0x319   :  { %v1876_v3 = vpop.permute.xlu1 %1875  ;;  %7699 = vset.pattern.permute.xlu1 %v10920_v62 }
 0x31a   :  { %v1906_v61 = vmul.f32 %v1876_v3, %v8520_v32  ;;  %1895 = vperm.xlu1 %7699, %v8232_v51  }
 0x31c   :  { %v1914_v6 = vadd.f32 %v1906_v61, %v1866_v23  ;;  %v1700_v61 = vpop.permute.xlu0 %1699 }
 0x31d   :  { %v8530_v47 = vpop.permute.xlu1 %1891 }
 0x31e   :  { %1903 = vperm.xlu1 %7699, %v8240_v56   ;;  %v8534_v7 = vadd.f32 %v1914_v6, %v8528_v49 }
 0x320   :  { %10992 = vst [vmem:[#allocation21_spill] sm:$0xff] %v8534_v7  ;;  %v1931_v0 = vsel %vm1930_vm3, %v8534_v7, -inf  ;;  %v1748_v38 = vpop.permute.xlu0 %1747 }
 0x321   :  { %1932 = vmax.xlane.f32.xlu0 %v1931_v0 }
 0x322   :  { %v1552_v51 = vpop.permute.xlu1 %1551  ;;  %7701 = vset.pattern.permute.xlu1 %v10993_v58 }
 0x323   :  { %v1573_v20 = vmul.f32 %v1552_v51, %v8355_v8 }
 0x324   :  { %v8543_v12 = vpop.permute.xlu0 %1795 }
 0x327   :  { %v8539_v3 = vpop.permute.xlu1 %1203 }
 0x328   :  { %v8547_v9 = vpop.permute.xlu0 %1843 }
 0x32c   :  { %v1600_v62 = vpop.permute.xlu1 %1599  ;;  %v1184_v0 = vpop.permute.xlu0 %1183 }
 0x32d   :  { %v1209_v33 = vmul.f32 %v1184_v0, %v8349_v5  ;;  %v1621_v26 = vmul.f32 %v1600_v62, %v8375_v28 }
 0x32f   :  { %v1373_v21 = vadd.f32 %v8337_v1, %v1209_v33 }
 0x330   :  { %v8551_v27 = vpop.permute.xlu0 %1855 }
 0x331   :  { %v8541_v23 = vpop.permute.xlu1 %1567  ;;  %10996 = vst [vmem:[#allocation24_spill] sm:$0xff] %v8551_v27  ;;  %v1581_v16 = vadd.f32 %v1573_v20, %v1373_v21 }
 0x333   :  { %v1629_v43 = vadd.f32 %v1621_v26, %v1581_v16 }
 0x334   :  { %v1548_v44 = vpop.permute.xlu0 %1547 }
 0x336   :  { %v1648_v56 = vpop.permute.xlu1 %1647 }
 0x337   :  { %v1669_v50 = vmul.f32 %v1648_v56, %v8384_v35 }
 0x338   :  { %v1596_v25 = vpop.permute.xlu0 %1595 }
 0x33b   :  { %v8545_v6 = vpop.permute.xlu1 %1615 }
 0x33c   :  { %10994 = vst [vmem:[#allocation22_spill] sm:$0xff] %v8545_v6  ;;  %v1644_v63 = vpop.permute.xlu0 %1643 }
 0x340   :  { %v1696_v10 = vpop.permute.xlu1 %1695  ;;  %v1692_v24 = vpop.permute.xlu0 %1691 }
 0x344   :  { %v1740_v1 = vpop.permute.xlu0 %1739 }
 0x345   :  { %v8549_v41 = vpop.permute.xlu1 %1663 }
 0x346   :  { %10995 = vst [vmem:[#allocation23_spill] sm:$0xff] %v8549_v41  ;;  %v1677_v41 = vadd.f32 %v1669_v50, %v1629_v43 }
 0x34a   :  { %v1744_v58 = vpop.permute.xlu1 %1743 }
 0x34b   :  { %v1765_v0 = vmul.f32 %v1744_v58, %v8397_v40 }
 0x34f   :  { %v8553_v7 = vpop.permute.xlu1 %1711 }
 0x350   :  { %10997 = vst [vmem:[#allocation25_spill] sm:$0xff] %v8553_v7  ;;  %v1717_v7 = vmul.f32 %v1696_v10, %v8391_v37  ;;  %v1210_v10 = vmul.f32 %v8508_v11, %v8461_v46 }
 0x352   :  { %v1725_v6 = vadd.f32 %v1717_v7, %v1677_v41  ;;  %v1788_v7 = vpop.permute.xlu0 %1787  ;;  %v1449_v58 = vadd.f32 %v8365_v18, %v1210_v10 }
 0x354   :  { %v1792_v34 = vpop.permute.xlu1 %1791  ;;  %v1773_v33 = vadd.f32 %v1765_v0, %v1725_v6  ;;  %v1622_v6 = vmul.f32 %v1604_v53, %v8476_v39  ;;  %v1572_v0 = vmul.f32 %v1548_v44, %v8469_v29  ;;  %v1766_v44 = vmul.f32 %v1748_v38, %v8498_v48 }
 0x355   :  { %v1813_v51 = vmul.f32 %v1792_v34, %v8406_v45  ;;  %v1574_v34 = vmul.f32 %v1556_v57, %v8469_v29  ;;  %v1620_v57 = vmul.f32 %v1596_v25, %v8476_v39  ;;  %v1764_v25 = vmul.f32 %v1740_v1, %v8498_v48 }
 0x357   :  { %v1821_v20 = vadd.f32 %v1813_v51, %v1773_v33  ;;  %v1582_v33 = vadd.f32 %v1574_v34, %v1449_v58 }
 0x359   :  { %v8557_v14 = vpop.permute.xlu1 %1759 }
 0x35a   :  { %10998 = vst [vmem:[#allocation26_spill] sm:$0xff] %v8557_v14 }
 0x35e   :  { %v1840_v27 = vpop.permute.xlu1 %1839 }
 0x35f   :  { %v1861_v62 = vmul.f32 %v1840_v27, %v8413_v55 }
 0x361   :  { %v1869_v56 = vadd.f32 %v1861_v62, %v1821_v20  ;;  %v1670_v62 = vmul.f32 %v1652_v52, %v8484_v54  ;;  %v1814_v52 = vmul.f32 %v8543_v12, %v8504_v30 }
 0x363   :  { %v8565_v14 = vpop.permute.xlu1 %1807 }
 0x368   :  { %v1888_v21 = vpop.permute.xlu1 %1887 }
 0x369   :  { %v1909_v16 = vmul.f32 %v1888_v21, %v8424_v15  ;;  %v1630_v21 = vadd.f32 %v1622_v6, %v1582_v33 }
 0x36b   :  { %v1917_v26 = vadd.f32 %v1909_v16, %v1869_v56  ;;  %v1718_v56 = vmul.f32 %v1700_v61, %v8490_v59  ;;  %v1668_v16 = vmul.f32 %v1644_v63, %v8484_v54  ;;  %v1678_v53 = vadd.f32 %v1670_v62, %v1630_v21 }
 0x36c   :  { %v1862_v63 = vmul.f32 %v8547_v9, %v8513_v60  ;;  %v1812_v61 = vmul.f32 %v1788_v7, %v8504_v30 }
 0x36d   :  { %v1179_v43 = vpop.permute.xlu1 %1178  ;;  %v8572_v41 = vadd.f32 %v1917_v26, %v8434_v36  ;;  %v1836_v26 = vpop.permute.xlu0 %1835  ;;  %v1726_v34 = vadd.f32 %v1718_v56, %v1678_v53 }
 0x36e   :  { %v1208_v50 = vmul.f32 %v1179_v43, %v8461_v46 }
 0x36f   :  { %v1940_v27 = vsel %vm1930_vm3, %v8572_v41, -inf }
 0x370   :  { %v1368_v11 = vadd.f32 %v8343_v4, %v1208_v50  ;;  %1941 = vmax.xlane.f32.xlu0 %v1940_v27  ;;  %v1716_v4 = vmul.f32 %v1692_v24, %v8490_v59  ;;  %v1774_v27 = vadd.f32 %v1766_v44, %v1726_v34  ;;  %v1910_v24 = vmul.f32 %v8530_v47, %v8520_v32 }
 0x371   :  { %v1199_v51 = vpop.permute.xlu1 %1198  ;;  %v1884_v6 = vpop.permute.xlu0 %1883 }
 0x372   :  { %v1580_v20 = vadd.f32 %v1572_v0, %v1368_v11  ;;  %v1822_v0 = vadd.f32 %v1814_v52, %v1774_v27  ;;  %v1860_v11 = vmul.f32 %v1836_v26, %v8513_v60  ;;  %v1908_v1 = vmul.f32 %v1884_v6, %v8520_v32 }
 0x373   :  { %v1212_v47 = vmul.f32 %v1199_v51, %v8461_v46  ;;  %v1211_v26 = vmul.f32 %v8369_v22, %v8349_v5  ;;  %v1213_v51 = vmul.f32 %v8539_v3, %v8349_v5 }
 0x374   :  { %v1628_v18 = vadd.f32 %v1620_v57, %v1580_v20  ;;  %v1870_v12 = vadd.f32 %v1862_v63, %v1822_v0  ;;  %v11000_v0 = vld [vmem:[#allocation16_spill] sm:$0xff] }
 0x375   :  { %v1530_v44 = vadd.f32 %v8367_v19, %v1212_v47  ;;  %v1454_v22 = vadd.f32 %v8360_v13, %v1211_v26  ;;  %v1577_v19 = vmul.f32 %v8541_v23, %v8355_v8  ;;  %v1535_v3 = vadd.f32 %v8363_v17, %v1213_v51  ;;  %v11002_v17 = vld [vmem:[#allocation17_spill] sm:$0xff]  ;;  %v1900_v26 = vpop.permute.xlu0 %1899 }
 0x376   :  { %v1676_v10 = vadd.f32 %v1668_v16, %v1628_v18  ;;  %v1564_v43 = vpop.permute.xlu1 %1563  ;;  %v1918_v57 = vadd.f32 %v1910_v24, %v1870_v12  ;;  %v1719_v23 = vmul.f32 %v11000_v0, %v8391_v37 }
 0x377   :  { %v1576_v18 = vmul.f32 %v1564_v43, %v8469_v29  ;;  %v1585_v24 = vadd.f32 %v1577_v19, %v1535_v3  ;;  %v1817_v19 = vmul.f32 %v8565_v14, %v8406_v45 }
 0x378   :  { %v1724_v50 = vadd.f32 %v1716_v4, %v1676_v10  ;;  %v8604_v56 = vadd.f32 %v1918_v57, %v8528_v49  ;;  %v1575_v10 = vmul.f32 %v8379_v31, %v8355_v8  ;;  %v1671_v31 = vmul.f32 %v8416_v2, %v8384_v35 }
 0x379   :  { %v1584_v52 = vadd.f32 %v1576_v18, %v1530_v44  ;;  %v11005_v44 = vld [vmem:[#allocation26_spill] sm:$0xff] }
 0x37a   :  { %v1772_v58 = vadd.f32 %v1764_v25, %v1724_v50  ;;  %v1943_v53 = vsel %vm1930_vm3, %v8604_v56, -inf  ;;  %v1623_v25 = vmul.f32 %v8399_v42, %v8375_v28  ;;  %v1583_v63 = vadd.f32 %v1575_v10, %v1454_v22 }
 0x37b   :  { %v1612_v38 = vpop.permute.xlu1 %1611 }
 0x37c   :  { %v1820_v33 = vadd.f32 %v1812_v61, %v1772_v58  ;;  %v1624_v4 = vmul.f32 %v1612_v38, %v8476_v39  ;;  %v10999_v61 = vld [vmem:[#allocation22_spill] sm:$0xff]  ;;  %v1631_v42 = vadd.f32 %v1623_v25, %v1583_v63 }
 0x37d   :  { %v1625_v58 = vmul.f32 %v10999_v61, %v8375_v28 }
 0x37e   :  { %v1868_v62 = vadd.f32 %v1860_v11, %v1820_v33  ;;  %v1632_v50 = vadd.f32 %v1624_v4, %v1584_v52  ;;  %v11001_v11 = vld [vmem:[#allocation23_spill] sm:$0xff]  ;;  %v1769_v4 = vmul.f32 %v11005_v44, %v8397_v40 }
 0x37f   :  { %v1673_v33 = vmul.f32 %v11001_v11, %v8384_v35  ;;  %v1633_v57 = vadd.f32 %v1625_v58, %v1585_v24 }
 0x380   :  { %v1660_v20 = vpop.permute.xlu1 %1659  ;;  %v1916_v21 = vadd.f32 %v1908_v1, %v1868_v62  ;;  %v1679_v1 = vadd.f32 %v1671_v31, %v1631_v42  ;;  %v1767_v62 = vmul.f32 %v11002_v17, %v8397_v40  ;;  %v11007_v42 = vld [vmem:[#allocation24_spill] sm:$0xff] }
 0x381   :  { %v1672_v43 = vmul.f32 %v1660_v20, %v8484_v54  ;;  %v11003_v20 = vld [vmem:[#allocation25_spill] sm:$0xff]  ;;  %v1865_v0 = vmul.f32 %v11007_v42, %v8413_v55 }
 0x382   :  { %v8599_v9 = vadd.f32 %v1916_v21, %v8528_v49  ;;  %v1721_v21 = vmul.f32 %v11003_v20, %v8391_v37  ;;  %v1727_v47 = vadd.f32 %v1719_v23, %v1679_v1  ;;  %v11010_v20 = vld [vmem:[#allocation8_spill] sm:$0xff] }
 0x383   :  { %v1680_v6 = vadd.f32 %v1672_v43, %v1632_v50  ;;  %v11006_v43 = vld [vmem:[#allocation20_spill] sm:$0xff]  ;;  %v1912_v50 = vmul.f32 %v1900_v26, %v8520_v32  ;;  %v11016_v26 = vld [vmem:[#allocation18_spill] sm:$0xff] }
 0x384   :  { %v1937_v7 = vsel %vm1930_vm3, %v8599_v9, -inf  ;;  %v1775_v52 = vadd.f32 %v1767_v62, %v1727_v47  ;;  %v1863_v22 = vmul.f32 %v11006_v43, %v8413_v55  ;;  %v11008_v62 = vld [vmem:[#allocation6_spill] sm:$0xff]  ;;  %v11014_v47 = vld [vmem:[#allocation12_spill] sm:$0xff] }
 0x385   :  { %v1708_v16 = vpop.permute.xlu1 %1707  ;;  %1938 = vmax.xlane.f32.xlu1 %v1937_v7 }
 0x386   :  { %v1720_v27 = vmul.f32 %v1708_v16, %v8490_v59  ;;  %v11004_v16 = vld [vmem:[#allocation19_spill] sm:$0xff] }
 0x387   :  { %v1815_v18 = vmul.f32 %v11004_v16, %v8406_v45  ;;  %v11015_v16 = vld [vmem:[#allocation13_spill] sm:$0xff] }
 0x388   :  { %v1728_v12 = vadd.f32 %v1720_v27, %v1680_v6 }
 0x389   :  { %1944 = vmax.xlane.f32.xlu1 %v1943_v53  ;;  %v1681_v53 = vadd.f32 %v1673_v33, %v1633_v57  ;;  %v1823_v63 = vadd.f32 %v1815_v18, %v1775_v52  ;;  %v11009_v57 = vld [vmem:[#allocation10_spill] sm:$0xff]  ;;  %v1936_v18 = vpop.xlane.xlu0 %1935 }
 0x38a   :  { %v1756_v34 = vpop.permute.xlu1 %1755 }
 0x38b   :  { %v1768_v13 = vmul.f32 %v1756_v34, %v8498_v48  ;;  %v1729_v25 = vadd.f32 %v1721_v21, %v1681_v53  ;;  %v1871_v58 = vadd.f32 %v1863_v22, %v1823_v63  ;;  %v11011_v21 = vld [vmem:[#allocation5_spill] sm:$0xff]  ;;  %v1956_v53 = vsub.f32 %v11016_v26, %v1936_v18 }
 0x38d   :  { %v1776_v7 = vadd.f32 %v1768_v13, %v1728_v12  ;;  %v1777_v31 = vadd.f32 %v1769_v4, %v1729_v25  ;;  %v1965_v4 = vmul.f32 1.442695, %v1956_v53 }
 0x38f   :  { %v1804_v38 = vpop.permute.xlu1 %1803  ;;  %v1825_v6 = vadd.f32 %v1817_v19, %v1777_v31  ;;  %7770 = vpow2.f32 %v1965_v4 }
 0x390   :  { %v1816_v2 = vmul.f32 %v1804_v38, %v8504_v30 }
 0x391   :  { %v1873_v11 = vadd.f32 %v1865_v0, %v1825_v6 }
 0x392   :  { %v1824_v51 = vadd.f32 %v1816_v2, %v1776_v7  ;;  %v11012_v7 = vld [vmem:[#allocation7_spill] sm:$0xff] }
 0x394   :  { %v1852_v10 = vpop.permute.xlu1 %1851 }
 0x395   :  { %v1864_v34 = vmul.f32 %v1852_v10, %v8513_v60  ;;  %v11017_v10 = vld [vmem:[#allocation21_spill] sm:$0xff] }
 0x397   :  { %v1872_v27 = vadd.f32 %v1864_v34, %v1824_v51 }
 0x399   :  { %v1896_v3 = vpop.permute.xlu1 %1895  ;;  %v1920_v61 = vadd.f32 %v1912_v50, %v1872_v27  ;;  %v8678_v52 = vpop.eup %7770 }
 0x39a   :  { %v1911_v13 = vmul.f32 %v1896_v3, %v8424_v15  ;;  %v1982_v43 = vsel %vm1930_vm3, %v8678_v52, 0.0 }
 0x39b   :  { %v1928_v38 = vadd.f32 %v1920_v61, %v8528_v49 }
 0x39c   :  { %v1919_v23 = vadd.f32 %v1911_v13, %v1871_v58 }
 0x39d   :  { %v1904_v24 = vpop.permute.xlu1 %1903  ;;  %v1949_v14 = vsel %vm1930_vm3, %v1928_v38, -inf }
 0x39e   :  { %v1913_v33 = vmul.f32 %v1904_v24, %v8424_v15  ;;  %1950 = vmax.xlane.f32.xlu0 %v1949_v14  ;;  %v1927_v12 = vadd.f32 %v1919_v23, %v8434_v36 }
 0x3a0   :  { %v1921_v2 = vadd.f32 %v1913_v33, %v1873_v11  ;;  %v1946_v1 = vsel %vm1930_vm3, %v1927_v12, -inf }
 0x3a1   :  { %1947 = vmax.xlane.f32.xlu1 %v1946_v1 }
 0x3a2   :  { %v1929_v17 = vadd.f32 %v1921_v2, %v8434_v36  ;;  %v11013_v36 = vld [vmem:[#allocation9_spill] sm:$0xff] }
 0x3a4   :  { %v1952_v49 = vsel %vm1930_vm3, %v1929_v17, -inf }
 0x3a5   :  { %1953 = vmax.xlane.f32.xlu0 %v1952_v49 }
 0x3ae   :  { %v1933_v44 = vpop.xlane.xlu0 %1932 }
 0x3af   :  { %v1955_v51 = vsub.f32 %v11017_v10, %v1933_v44 }
 0x3b1   :  { %v1963_v34 = vmul.f32 1.442695, %v1955_v51  ;;  %v11018_v51 = vld [vmem:[#allocation11_spill] sm:$0xff] }
 0x3b2   :  { %739 = vrot.lane.b32.xlu1 %v11008_v62, %s7937_s28 }
 0x3b3   :  { %7772 = vpow2.f32 %v1963_v34 }
 0x3b6   :  { %743 = vrot.lane.b32.xlu1 %v11009_v57, %s7937_s28 }
 0x3ba   :  { %745 = vrot.lane.b32.xlu1 %v11010_v20, %s7937_s28 }
 0x3bb   :  { %741 = vrot.lane.b32.xlu0 %v11011_v21, %s7937_s28 }
 0x3bd   :  { %v8682_v22 = vpop.eup %7772 }
 0x3be   :  { %749 = vrot.lane.b32.xlu1 %v11012_v7, %s7937_s28  ;;  %v1979_v25 = vsel %vm1930_vm3, %v8682_v22, 0.0 }
 0x3bf   :  { %747 = vrot.lane.b32.xlu0 %v11013_v36, %s7937_s28 }
 0x3c2   :  { %753 = vrot.lane.b32.xlu1 %v11014_v47, %s7937_s28 }
 0x3c3   :  { %751 = vrot.lane.b32.xlu0 %v11015_v16, %s7937_s28 }
 0x3e6   :  { %1983 = vadd.xlane.f32.xlu1 %v1982_v43 }
 0x3ea   :  { %1980 = vadd.xlane.f32.xlu1 %v1979_v25 }
 0x3fd   :  { %v1942_v19 = vpop.xlane.xlu0 %1941 }
 0x3fe   :  { %v1958_v27 = vsub.f32 %v8572_v41, %v1942_v19 }
 0x400   :  { %v1969_v3 = vmul.f32 1.442695, %v1958_v27 }
 0x412   :  { %v1939_v50 = vpop.xlane.xlu1 %1938 }
 0x413   :  { %v1957_v61 = vsub.f32 %v8599_v9, %v1939_v50 }
 0x415   :  { %v1967_v6 = vmul.f32 1.442695, %v1957_v61 }
 0x416   :  { %v1945_v63 = vpop.xlane.xlu1 %1944 }
 0x417   :  { %v1959_v31 = vsub.f32 %v8604_v56, %v1945_v63 }
 0x419   :  { %v1971_v58 = vmul.f32 1.442695, %v1959_v31 }
 0x41b   :  { %7774 = vpow2.f32 %v1971_v58 }
 0x41c   :  { %7776 = vpow2.f32 %v1969_v3 }
 0x41d   :  { %7778 = vpow2.f32 %v1967_v6 }
 0x425   :  { %v8689_v13 = vpop.eup %7774 }
 0x426   :  { %v1991_v42 = vsel %vm1930_vm3, %v8689_v13, 0.0  ;;  %v8693_v0 = vpop.eup %7776 }
 0x427   :  { %1992 = vadd.xlane.f32.xlu0 %v1991_v42  ;;  %v1988_v41 = vsel %vm1930_vm3, %v8693_v0, 0.0  ;;  %v8697_v56 = vpop.eup %7778 }
 0x428   :  { %v1985_v11 = vsel %vm1930_vm3, %v8697_v56, 0.0 }
 0x42b   :  { %1989 = vadd.xlane.f32.xlu0 %v1988_v41  ;;  %v1951_v9 = vpop.xlane.xlu0 %1950 }
 0x42c   :  { %v1961_v23 = vsub.f32 %v1928_v38, %v1951_v9  ;;  %v11019_v9 = vld [vmem:[#allocation14_spill] sm:$0xff] }
 0x42e   :  { %v1975_v24 = vmul.f32 1.442695, %v1961_v23  ;;  %v1948_v14 = vpop.xlane.xlu1 %1947 }
 0x42f   :  { %v1960_v33 = vsub.f32 %v1927_v12, %v1948_v14  ;;  %1986 = vadd.xlane.f32.xlu0 %v1985_v11 }
 0x430   :  { %7780 = vpow2.f32 %v1975_v24 }
 0x431   :  { %v1973_v2 = vmul.f32 1.442695, %v1960_v33 }
 0x432   :  { %v740_v1 = vpop.permute.xlu1 %739  ;;  %v1954_v49 = vpop.xlane.xlu0 %1953 }
 0x433   :  { %7782 = vpow2.f32 %v1973_v2  ;;  %v1962_v62 = vsub.f32 %v1929_v17, %v1954_v49 }
 0x435   :  { %v1977_v57 = vmul.f32 1.442695, %v1962_v62 }
 0x436   :  { %v744_v20 = vpop.permute.xlu1 %743  ;;  %v742_v21 = vpop.permute.xlu0 %741 }
 0x437   :  { %7784 = vpow2.f32 %v1977_v57 }
 0x43a   :  { %v8701_v7 = vpop.eup %7780  ;;  %v746_v38 = vpop.permute.xlu1 %745 }
 0x43b   :  { %v748_v36 = vpop.permute.xlu0 %747  ;;  %v1997_v47 = vsel %vm1930_vm3, %v8701_v7, 0.0 }
 0x43c   :  { %1998 = vadd.xlane.f32.xlu1 %v1997_v47  ;;  %v763_v16 = vcombine.low %v740_v1, %v748_v36  ;;  %v764_v18 = vcombine.high %v740_v1, %v748_v36 }
 0x43d   :  { %v8705_v12 = vpop.eup %7782 }
 0x43e   :  { %v750_v26 = vpop.permute.xlu1 %749  ;;  %v1994_v17 = vsel %vm1930_vm3, %v8705_v12, 0.0  ;;  %v771_v34 = vrot.slane %v763_v16, %v11018_v51  ;;  %v778_v43 = vrot.slane %v764_v18, %v11018_v51 }
 0x43f   :  { %v752_v53 = vpop.permute.xlu0 %751  ;;  %1995 = vadd.xlane.f32.xlu0 %v1994_v17  ;;  %v831_v50 = vcombine.low %v742_v21, %v750_v26  ;;  %v832_v27 = vcombine.high %v742_v21, %v750_v26 }
 0x440   :  { %v779_v44 = vcombine.low %v744_v20, %v752_v53  ;;  %v780_v4 = vcombine.high %v744_v20, %v752_v53 }
 0x441   :  { %v8709_v10 = vpop.eup %7784  ;;  %v839_v33 = vrot.slane %v831_v50, %v11018_v51  ;;  %v846_v2 = vrot.slane %v832_v27, %v11018_v51 }
 0x442   :  { %v787_v25 = vrot.slane %v779_v44, %v11018_v51  ;;  %v794_v19 = vrot.slane %v780_v4, %v11018_v51  ;;  %v754_v63 = vpop.permute.xlu1 %753  ;;  %v2000_v31 = vsel %vm1930_vm3, %v8709_v10, 0.0 }
 0x443   :  { %2001 = vadd.xlane.f32.xlu0 %v2000_v31  ;;  %v847_v42 = vcombine.low %v746_v38, %v754_v63  ;;  %v848_v41 = vcombine.high %v746_v38, %v754_v63 }
 0x444   :  { %v795_v3 = vcombine.low %v771_v34, %v787_v25  ;;  %v796_v61 = vcombine.high %v771_v34, %v787_v25  ;;  %v811_v58 = vcombine.low %v778_v43, %v794_v19  ;;  %v812_v6 = vcombine.high %v778_v43, %v794_v19 }
 0x445   :  { %v855_v1 = vrot.slane %v847_v42, %v11018_v51  ;;  %v862_v49 = vrot.slane %v848_v41, %v11018_v51 }
 0x446   :  { %v803_v23 = vrot.slane %v795_v3, %v11019_v9  ;;  %v810_v24 = vrot.slane %v796_v61, %v11019_v9  ;;  %v819_v14 = vrot.slane %v811_v58, %v11019_v9  ;;  %v826_v11 = vrot.slane %v812_v6, %v11019_v9 }
 0x447   :  { %v863_v38 = vcombine.low %v839_v33, %v855_v1  ;;  %v864_v36 = vcombine.high %v839_v33, %v855_v1  ;;  %v879_v47 = vcombine.low %v846_v2, %v862_v49  ;;  %v880_v16 = vcombine.high %v846_v2, %v862_v49 }
 0x448   :  { %v899_v62 = vcombine.low %v803_v23, %v810_v24  ;;  %v6936_v57 = vcombine.high %v803_v23, %v810_v24  ;;  %v915_v20 = vcombine.low %v819_v14, %v826_v11  ;;  %v6937_v21 = vcombine.high %v819_v14, %v826_v11 }
 0x449   :  { %v871_v44 = vrot.slane %v863_v38, %v11019_v9  ;;  %v878_v4 = vrot.slane %v864_v36, %v11019_v9  ;;  %v887_v34 = vrot.slane %v879_v47, %v11019_v9  ;;  %v894_v43 = vrot.slane %v880_v16, %v11019_v9 }
 0x44a   :  { %v906_v18 = vrot.slane %v899_v62, %v11018_v51  ;;  %v914_v26 = vrot.slane %v6936_v57, %v11018_v51  ;;  %v922_v53 = vrot.slane %v915_v20, %v11018_v51  ;;  %v930_v17 = vrot.slane %v6937_v21, %v11018_v51 }
 0x44b   :  { %v967_v50 = vcombine.low %v871_v44, %v878_v4  ;;  %v6938_v27 = vcombine.high %v871_v44, %v878_v4  ;;  %v983_v63 = vcombine.low %v887_v34, %v894_v43  ;;  %v6939_v31 = vcombine.high %v887_v34, %v894_v43 }
 0x44c   :  { %v931_v25 = vcombine.low %v906_v18, %v914_v26  ;;  %v947_v19 = vcombine.low %v922_v53, %v930_v17  ;;  %v932_v3 = vcombine.high %v906_v18, %v914_v26  ;;  %v948_v61 = vcombine.high %v922_v53, %v930_v17 }
 0x44d   :  { %v974_v58 = vrot.slane %v967_v50, %v11018_v51  ;;  %v982_v6 = vrot.slane %v6938_v27, %v11018_v51  ;;  %v990_v42 = vrot.slane %v983_v63, %v11018_v51  ;;  %v998_v41 = vrot.slane %v6939_v31, %v11018_v51 }
 0x44e   :  { %v939_v23 = vrot.slane %v931_v25, %v11019_v9  ;;  %v955_v24 = vrot.slane %v947_v19, %v11019_v9  ;;  %v946_v1 = vrot.slane %v932_v3, %v11019_v9  ;;  %v962_v49 = vrot.slane %v948_v61, %v11019_v9 }
 0x44f   :  { %v999_v14 = vcombine.low %v974_v58, %v982_v6  ;;  %v1015_v11 = vcombine.low %v990_v42, %v998_v41  ;;  %v1000_v33 = vcombine.high %v974_v58, %v982_v6  ;;  %v1016_v2 = vcombine.high %v990_v42, %v998_v41 }
 0x450   :  { %v963_v38 = vcombine.low %v939_v23, %v955_v24  ;;  %v964_v36 = vcombine.high %v939_v23, %v955_v24  ;;  %v965_v44 = vcombine.low %v946_v1, %v962_v49  ;;  %v966_v4 = vcombine.high %v946_v1, %v962_v49 }
 0x451   :  { %v1007_v62 = vrot.slane %v999_v14, %v11019_v9  ;;  %v1023_v57 = vrot.slane %v1015_v11, %v11019_v9  ;;  %v1014_v20 = vrot.slane %v1000_v33, %v11019_v9  ;;  %v1030_v21 = vrot.slane %v1016_v2, %v11019_v9 }
 0x453   :  { %v1031_v47 = vcombine.low %v1007_v62, %v1023_v57  ;;  %v1032_v16 = vcombine.high %v1007_v62, %v1023_v57  ;;  %v1033_v18 = vcombine.low %v1014_v20, %v1030_v21  ;;  %v1034_v26 = vcombine.high %v1014_v20, %v1030_v21 }
 0x455   :  { %v7483_v53 = vpack.c.bf16 %v1031_v47, %v963_v38  ;;  %v7487_v17 = vpack.c.bf16 %v1032_v16, %v964_v36  ;;  %v7491_v34 = vpack.c.bf16 %v1033_v18, %v965_v44  ;;  %v8745_v43 = vpack.c.bf16 %v1034_v26, %v966_v4 }
 0x457   :  { %7484 = vmatprep.subr.bf16.mxu0 %v7483_v53  ;;  %7488 = vmatprep.subr.bf16.mxu1 %v7487_v17 }
 0x458   :  { %7486 = vmatpush3.bf16.msra.mxu0 %v7483_v53  ;;  %7490 = vmatpush3.bf16.msra.mxu1 %v7487_v17 }
 0x459   :  { %7492 = vmatprep.subr.bf16.mxu0 %v7491_v34  ;;  %7496 = vmatprep.subr.bf16.mxu1 %v8745_v43 }
 0x473   :  { %v1984_v25 = vpop.xlane.xlu1 %1983 }
 0x474   :  { %7786 = vrcp.f32 %v1984_v25 }
 0x477   :  { %v1981_v19 = vpop.xlane.xlu1 %1980 }
 0x478   :  { %7788 = vrcp.f32 %v1981_v19 }
 0x47e   :  { %v7787_v50 = vpop.eup %7786 }
 0x47f   :  { %v2012_v27 = vmul.f32 %v7787_v50, %v8678_v52 }
 0x481   :  { %v2022_v63 = vmul.f32 %v2012_v27, %v8349_v5  ;;  %v2390_v58 = vmul.f32 %v2012_v27, %v8355_v8  ;;  %v2442_v52 = vmul.f32 %v2012_v27, %v8375_v28  ;;  %v2546_v8 = vmul.f32 %v2012_v27, %v8391_v37 }
 0x482   :  { %v7789_v31 = vpop.eup %7788  ;;  %v2598_v23 = vmul.f32 %v2012_v27, %v8397_v40  ;;  %v2650_v28 = vmul.f32 %v2012_v27, %v8406_v45  ;;  %v2754_v37 = vmul.f32 %v2012_v27, %v8424_v15 }
 0x483   :  { %v8751_v3 = vmul.f32 %v7789_v31, %v8682_v22  ;;  %v2032_v61 = vsel %vm1930_vm3, %v2022_v63, 0.0  ;;  %v2400_v6 = vsel %vm1930_vm3, %v2390_v58, 0.0  ;;  %v2452_v5 = vsel %vm1930_vm3, %v2442_v52, 0.0 }
 0x484   :  { %2033 = vadd.xlane.f32.xlu1 %v2032_v61  ;;  %v2494_v22 = vmul.f32 %v2012_v27, %v8384_v35  ;;  %v2556_v41 = vsel %vm1930_vm3, %v2546_v8, 0.0  ;;  %v2608_v24 = vsel %vm1930_vm3, %v2598_v23, 0.0  ;;  %v2660_v14 = vsel %vm1930_vm3, %v2650_v28, 0.0  ;;  %v7866_v28 = vld [vmem:[%s10896_s2 + $0x48] sm:$0xff] }
 0x485   :  { %7264 = vmatprep.mubr.msk.f32.mxu0 %vm1930_vm3, %v8751_v3  ;;  %v2702_v35 = vmul.f32 %v2012_v27, %v8413_v55  ;;  %v2764_v33 = vsel %vm1930_vm3, %v2754_v37, 0.0  ;;  %v2021_v40 = vmul.f32 %v8751_v3, %v8461_v46  ;;  %v2389_v45 = vmul.f32 %v8751_v3, %v8469_v29 }
 0x486   :  { %7265 = vmatmul.mubr.msk.f32.vlgmr.msra.gmra.mrb[10].mxu0 %vm1930_vm3, %v2012_v27  ;;  %v2504_v42 = vsel %vm1930_vm3, %v2494_v22, 0.0  ;;  %v2441_v1 = vmul.f32 %v8751_v3, %v8476_v39  ;;  %v2493_v49 = vmul.f32 %v8751_v3, %v8484_v54  ;;  %v2545_v62 = vmul.f32 %v8751_v3, %v8490_v59 }
 0x487   :  { %7494 = vmatpush3.bf16.msra.mxu0 %v7491_v34  ;;  %v2712_v11 = vsel %vm1930_vm3, %v2702_v35, 0.0  ;;  %v2029_v2 = vsel %vm1930_vm3, %v2021_v40, 0.0  ;;  %v2397_v55 = vsel %vm1930_vm3, %v2389_v45, 0.0  ;;  %v2597_v39 = vmul.f32 %v8751_v3, %v8498_v48 }
 0x488   :  { %2401 = vadd.xlane.f32.xlu1 %v2400_v6  ;;  %v2449_v15 = vsel %vm1930_vm3, %v2441_v1, 0.0  ;;  %v2501_v46 = vsel %vm1930_vm3, %v2493_v49, 0.0  ;;  %v2553_v57 = vsel %vm1930_vm3, %v2545_v62, 0.0  ;;  %v2649_v54 = vmul.f32 %v8751_v3, %v8504_v30  ;;  %v7868_v1 = vld [vmem:[%s10896_s2 + $0x68] sm:$0xff] }
 0x489   :  { %v2605_v21 = vsel %vm1930_vm3, %v2597_v39, 0.0  ;;  %v2701_v47 = vmul.f32 %v8751_v3, %v8513_v60  ;;  %v2753_v30 = vmul.f32 %v8751_v3, %v8520_v32  ;;  %v7862_v60 = vld [vmem:[%s10896_s2 + $0x8] sm:$0xff] }
 0x48a   :  { %v2657_v36 = vsel %vm1930_vm3, %v2649_v54, 0.0  ;;  %v8890_v54 = vld [vmem:[%s10896_s2] sm:$0xff] }
 0x48b   :  { %v2709_v18 = vsel %vm1930_vm3, %v2701_v47, 0.0  ;;  %v2761_v17 = vsel %vm1930_vm3, %v2753_v30, 0.0 }
 0x48c   :  { %2453 = vadd.xlane.f32.xlu1 %v2452_v5 }
 0x490   :  { %2505 = vadd.xlane.f32.xlu1 %v2504_v42  ;;  %v7865_v42 = vld [vmem:[%s10896_s2 + $0x38] sm:$0xff] }
 0x494   :  { %2557 = vadd.xlane.f32.xlu1 %v2556_v41 }
 0x498   :  { %2609 = vadd.xlane.f32.xlu1 %v2608_v24 }
 0x49c   :  { %2661 = vadd.xlane.f32.xlu1 %v2660_v14 }
 0x4a0   :  { %2713 = vadd.xlane.f32.xlu1 %v2712_v11 }
 0x4a4   :  { %2765 = vadd.xlane.f32.xlu1 %v2764_v33  ;;  %v7867_v33 = vld [vmem:[%s10896_s2 + $0x58] sm:$0xff] }
 0x4a8   :  { %2030 = vadd.xlane.f32.xlu1 %v2029_v2 }
 0x4ac   :  { %2398 = vadd.xlane.f32.xlu1 %v2397_v55 }
 0x4b0   :  { %2450 = vadd.xlane.f32.xlu1 %v2449_v15 }
 0x4b4   :  { %2502 = vadd.xlane.f32.xlu1 %v2501_v46  ;;  %v1993_v29 = vpop.xlane.xlu0 %1992 }
 0x4b5   :  { %7790 = vrcp.f32 %v1993_v29  ;;  %v7869_v29 = vld [vmem:[%s10896_s2 + $0x78] sm:$0xff] }
 0x4b8   :  { %2554 = vadd.xlane.f32.xlu1 %v2553_v57  ;;  %v1990_v20 = vpop.xlane.xlu0 %1989 }
 0x4b9   :  { %7792 = vrcp.f32 %v1990_v20 }
 0x4bc   :  { %2606 = vadd.xlane.f32.xlu1 %v2605_v21  ;;  %v1987_v38 = vpop.xlane.xlu0 %1986 }
 0x4bd   :  { %7794 = vrcp.f32 %v1987_v38 }
 0x4bf   :  { %v7791_v59 = vpop.eup %7790 }
 0x4c0   :  { %v8797_v16 = vmul.f32 %v7791_v59, %v8689_v13  ;;  %2658 = vadd.xlane.f32.xlu1 %v2657_v36 }
 0x4c2   :  { %7278 = vmatprep.mubr.msk.f32.mxu0 %vm1930_vm3, %v8797_v16  ;;  %v2025_v38 = vmul.f32 %v8890_v54, %v8797_v16 }
 0x4c3   :  { %v7793_v48 = vpop.eup %7792 }
 0x4c4   :  { %v8805_v26 = vmul.f32 %v7793_v48, %v8693_v0  ;;  %2710 = vadd.xlane.f32.xlu1 %v2709_v18  ;;  %v2041_v36 = vsel %vm1930_vm3, %v2025_v38, 0.0  ;;  %v8900_v48 = vld [vmem:[%s10896_s2 + $0x10] sm:$0xff] }
 0x4c5   :  { %v2393_v18 = vmul.f32 %v8900_v48, %v8797_v16 }
 0x4c6   :  { %v2024_v13 = vmul.f32 %v7862_v60, %v8805_v26  ;;  %v2496_v49 = vmul.f32 %v7865_v42, %v8805_v26  ;;  %v2548_v59 = vmul.f32 %v7866_v28, %v8805_v26 }
 0x4c7   :  { %v7795_v53 = vpop.eup %7794 }
 0x4c8   :  { %v8813_v44 = vmul.f32 %v7795_v53, %v8697_v56  ;;  %2762 = vadd.xlane.f32.xlu1 %v2761_v17  ;;  %v2038_v4 = vsel %vm1930_vm3, %v2024_v13, 0.0  ;;  %v2510_v62 = vsel %vm1930_vm3, %v2496_v49, 0.0  ;;  %v2562_v47 = vsel %vm1930_vm3, %v2548_v59, 0.0  ;;  %v8910_v53 = vld [vmem:[%s10896_s2 + $0x20] sm:$0xff] }
 0x4c9   :  { %v1999_v32 = vpop.xlane.xlu1 %1998  ;;  %2039 = vadd.xlane.f32.xlu0 %v2038_v4  ;;  %v2445_v17 = vmul.f32 %v8910_v53, %v8797_v16  ;;  %v2600_v4 = vmul.f32 %v7867_v33, %v8805_v26 }
 0x4ca   :  { %7796 = vrcp.f32 %v1999_v32  ;;  %7271 = vmatprep.mubr.msk.f32.mxu1 %vm1930_vm3, %v8813_v44 }
 0x4cb   :  { %7272 = vmatmul.mubr.msk.f32.vlgmr.msra.gmra.mrb[8].mxu1 %vm1930_vm3, %v8805_v26  ;;  %v2461_v32 = vsel %vm1930_vm3, %v2445_v17, 0.0 }
 0x4cc   :  { %7498 = vmatpush3.bf16.msra.mxu1 %v8745_v43  ;;  %v1996_v0 = vpop.xlane.xlu0 %1995 }
 0x4cd   :  { %7798 = vrcp.f32 %v1996_v0  ;;  %v2614_v0 = vsel %vm1930_vm3, %v2600_v4, 0.0 }
 0x4d0   :  { %v2002_v34 = vpop.xlane.xlu0 %2001 }
 0x4d1   :  { %7800 = vrcp.f32 %v2002_v34  ;;  %v8920_v34 = vld [vmem:[%s10896_s2 + $0x30] sm:$0xff] }
 0x4d2   :  { %v2495_v17 = vmul.f32 %v8920_v34, %v8813_v44 }
 0x4d4   :  { %v7797_v56 = vpop.eup %7796 }
 0x4d5   :  { %v8822_v25 = vmul.f32 %v7797_v56, %v8701_v7  ;;  %v7863_v7 = vld [vmem:[%s10896_s2 + $0x18] sm:$0xff]  ;;  %v2497_v56 = vmul.f32 %v8920_v34, %v8797_v16 }
 0x4d6   :  { %v2392_v52 = vmul.f32 %v7863_v7, %v8805_v26 }
 0x4d7   :  { %v7799_v19 = vpop.eup %7798  ;;  %7285 = vmatprep.mubr.msk.f32.mxu1 %vm1930_vm3, %v8822_v25  ;;  %v2395_v59 = vmul.f32 %v8900_v48, %v8822_v25 }
 0x4d8   :  { %v8827_v50 = vmul.f32 %v7799_v19, %v8705_v12  ;;  %v2406_v22 = vsel %vm1930_vm3, %v2392_v52, 0.0 }
 0x4da   :  { %7279 = vmatmul.mubr.msk.f32.vlgmr.msra.gmra.mrb[12].mxu0 %vm1930_vm3, %v8827_v50  ;;  %v2026_v43 = vmul.f32 %v7862_v60, %v8827_v50  ;;  %v2394_v3 = vmul.f32 %v7863_v7, %v8827_v50  ;;  %v2498_v8 = vmul.f32 %v7865_v42, %v8827_v50  ;;  %v2550_v14 = vmul.f32 %v7866_v28, %v8827_v50 }
 0x4db   :  { %v7801_v27 = vpop.eup %7800  ;;  %v2602_v40 = vmul.f32 %v7867_v33, %v8827_v50  ;;  %v2654_v15 = vmul.f32 %v7868_v1, %v8827_v50  ;;  %v2706_v57 = vmul.f32 %v7869_v29, %v8827_v50 }
 0x4dc   :  { %v8833_v63 = vmul.f32 %v7801_v27, %v8709_v10  ;;  %v2044_v31 = vsel %vm1930_vm3, %v2026_v43, 0.0  ;;  %v2412_v61 = vsel %vm1930_vm3, %v2394_v3, 0.0  ;;  %v7864_v10 = vld [vmem:[%s10896_s2 + $0x28] sm:$0xff]  ;;  %v2516_v23 = vsel %vm1930_vm3, %v2498_v8, 0.0 }
 0x4dd   :  { %2045 = vadd.xlane.f32.xlu1 %v2044_v31  ;;  %v2446_v6 = vmul.f32 %v7864_v10, %v8827_v50  ;;  %v2444_v35 = vmul.f32 %v7864_v10, %v8805_v26  ;;  %v2568_v11 = vsel %vm1930_vm3, %v2550_v14, 0.0  ;;  %v2620_v45 = vsel %vm1930_vm3, %v2602_v40, 0.0  ;;  %v8930_v31 = vld [vmem:[%s10896_s2 + $0x40] sm:$0xff] }
 0x4de   :  { %7286 = vmatmul.mubr.msk.f32.vlgmr.msra.gmra.mrb[10].mxu1 %vm1930_vm3, %v8833_v63  ;;  %v2028_v12 = vmul.f32 %v7862_v60, %v8833_v63  ;;  %v2396_v41 = vmul.f32 %v7863_v7, %v8833_v63  ;;  %v2448_v2 = vmul.f32 %v7864_v10, %v8833_v63  ;;  %v2672_v46 = vsel %vm1930_vm3, %v2654_v15, 0.0  ;;  %v8974_v40 = vld [vmem:[%s10896_s2 + $0x80] sm:$0xff] }
 0x4df   :  { %v2464_v5 = vsel %vm1930_vm3, %v2446_v6, 0.0  ;;  %v2458_v37 = vsel %vm1930_vm3, %v2444_v35, 0.0  ;;  %v2500_v39 = vmul.f32 %v7865_v42, %v8833_v63  ;;  %v2724_v20 = vsel %vm1930_vm3, %v2706_v57, 0.0 }
 0x4e0   :  { %v2050_v58 = vsel %vm1930_vm3, %v2028_v12, 0.0  ;;  %v2418_v24 = vsel %vm1930_vm3, %v2396_v41, 0.0  ;;  %v2470_v55 = vsel %vm1930_vm3, %v2448_v2, 0.0  ;;  %v2552_v30 = vmul.f32 %v7866_v28, %v8833_v63  ;;  %v8962_v28 = vld [vmem:[%s10896_s2 + $0x70] sm:$0xff] }
 0x4e1   :  { %2413 = vadd.xlane.f32.xlu1 %v2412_v61  ;;  %2051 = vadd.xlane.f32.xlu0 %v2050_v58  ;;  %v2522_v21 = vsel %vm1930_vm3, %v2500_v39, 0.0  ;;  %v2409_v60 = vsel %vm1930_vm3, %v2393_v18, 0.0  ;;  %v2604_v19 = vmul.f32 %v7867_v33, %v8833_v63  ;;  %v2513_v43 = vsel %vm1930_vm3, %v2497_v56, 0.0  ;;  %v8940_v58 = vld [vmem:[%s10896_s2 + $0x50] sm:$0xff] }
 0x4e2   :  { %v2574_v13 = vsel %vm1930_vm3, %v2552_v30, 0.0  ;;  %v2549_v7 = vmul.f32 %v8930_v31, %v8797_v16  ;;  %v2652_v3 = vmul.f32 %v7868_v1, %v8805_v26  ;;  %v2601_v10 = vmul.f32 %v8940_v58, %v8797_v16 }
 0x4e3   :  { %v2626_v27 = vsel %vm1930_vm3, %v2604_v19, 0.0  ;;  %v2656_v6 = vmul.f32 %v7868_v1, %v8833_v63  ;;  %v2704_v8 = vmul.f32 %v7869_v29, %v8805_v26  ;;  %v2705_v14 = vmul.f32 %v8962_v28, %v8797_v16 }
 0x4e4   :  { %v2565_v12 = vsel %vm1930_vm3, %v2549_v7, 0.0  ;;  %v2666_v61 = vsel %vm1930_vm3, %v2652_v3, 0.0  ;;  %v2617_v52 = vsel %vm1930_vm3, %v2601_v10, 0.0  ;;  %v2708_v35 = vmul.f32 %v7869_v29, %v8833_v63 }
 0x4e5   :  { %2465 = vadd.xlane.f32.xlu1 %v2464_v5  ;;  %2407 = vadd.xlane.f32.xlu0 %v2406_v22  ;;  %v2678_v5 = vsel %vm1930_vm3, %v2656_v6, 0.0  ;;  %v8950_v22 = vld [vmem:[%s10896_s2 + $0x60] sm:$0xff]  ;;  %v2757_v2 = vmul.f32 %v8974_v40, %v8797_v16  ;;  %v2027_v57 = vmul.f32 %v8890_v54, %v8822_v25  ;;  %v2547_v19 = vmul.f32 %v8930_v31, %v8813_v44 }
 0x4e6   :  { %v2653_v42 = vmul.f32 %v8950_v22, %v8797_v16  ;;  %v2730_v33 = vsel %vm1930_vm3, %v2708_v35, 0.0  ;;  %v2023_v16 = vmul.f32 %v8890_v54, %v8813_v44  ;;  %v2415_v54 = vsel %vm1930_vm3, %v2395_v59, 0.0 }
 0x4e7   :  { %v2773_v15 = vsel %vm1930_vm3, %v2757_v2, 0.0  ;;  %v2603_v10 = vmul.f32 %v8940_v58, %v8822_v25  ;;  %v2755_v2 = vmul.f32 %v8974_v40, %v8813_v44 }
 0x4e8   :  { %v2035_v29 = vsel %vm1930_vm3, %v2023_v16, 0.0 }
 0x4e9   :  { %2517 = vadd.xlane.f32.xlu1 %v2516_v23  ;;  %2419 = vadd.xlane.f32.xlu0 %v2418_v24  ;;  %v2669_v23 = vsel %vm1930_vm3, %v2653_v42, 0.0  ;;  %v2718_v24 = vsel %vm1930_vm3, %v2704_v8, 0.0  ;;  %v2623_v6 = vsel %vm1930_vm3, %v2603_v10, 0.0  ;;  %v2655_v42 = vmul.f32 %v8950_v22, %v8822_v25 }
 0x4ed   :  { %2569 = vadd.xlane.f32.xlu1 %v2568_v11  ;;  %2459 = vadd.xlane.f32.xlu0 %v2458_v37  ;;  %v2721_v37 = vsel %vm1930_vm3, %v2705_v14, 0.0  ;;  %v2707_v14 = vmul.f32 %v8962_v28, %v8822_v25 }
 0x4f1   :  { %2621 = vadd.xlane.f32.xlu1 %v2620_v45  ;;  %2471 = vadd.xlane.f32.xlu0 %v2470_v55  ;;  %v8981_v45 = vld [vmem:[%s10896_s2 + $0x88] sm:$0xff] }
 0x4f2   :  { %v2756_v55 = vmul.f32 %v8981_v45, %v8805_v26 }
 0x4f4   :  { %v2770_v49 = vsel %vm1930_vm3, %v2756_v55, 0.0 }
 0x4f5   :  { %2673 = vadd.xlane.f32.xlu1 %v2672_v46  ;;  %2511 = vadd.xlane.f32.xlu0 %v2510_v62  ;;  %v2758_v46 = vmul.f32 %v8981_v45, %v8827_v50  ;;  %v2047_v50 = vsel %vm1930_vm3, %v2027_v57, 0.0 }
 0x4f7   :  { %v2776_v26 = vsel %vm1930_vm3, %v2758_v46, 0.0  ;;  %v2760_v46 = vmul.f32 %v8981_v45, %v8833_v63 }
 0x4f9   :  { %2725 = vadd.xlane.f32.xlu1 %v2724_v20  ;;  %2523 = vadd.xlane.f32.xlu0 %v2522_v21  ;;  %v2391_v20 = vmul.f32 %v8900_v48, %v8813_v44 }
 0x4fb   :  { %v2403_v38 = vsel %vm1930_vm3, %v2391_v20, 0.0 }
 0x4fd   :  { %2042 = vadd.xlane.f32.xlu1 %v2041_v36  ;;  %2563 = vadd.xlane.f32.xlu0 %v2562_v47  ;;  %v2443_v47 = vmul.f32 %v8910_v53, %v8813_v44 }
 0x4ff   :  { %v2455_v30 = vsel %vm1930_vm3, %v2443_v47, 0.0 }
 0x501   :  { %2410 = vadd.xlane.f32.xlu1 %v2409_v60  ;;  %2575 = vadd.xlane.f32.xlu0 %v2574_v13  ;;  %v2447_v60 = vmul.f32 %v8910_v53, %v8822_v25 }
 0x503   :  { %v2467_v48 = vsel %vm1930_vm3, %v2447_v60, 0.0 }
 0x505   :  { %2462 = vadd.xlane.f32.xlu1 %v2461_v32  ;;  %2615 = vadd.xlane.f32.xlu0 %v2614_v0  ;;  %v2507_v32 = vsel %vm1930_vm3, %v2495_v17, 0.0  ;;  %v2499_v0 = vmul.f32 %v8920_v34, %v8822_v25  ;;  %v2599_v34 = vmul.f32 %v8940_v58, %v8813_v44  ;;  %v2703_v58 = vmul.f32 %v8962_v28, %v8813_v44 }
 0x507   :  { %v2519_v53 = vsel %vm1930_vm3, %v2499_v0, 0.0 }
 0x509   :  { %2514 = vadd.xlane.f32.xlu1 %v2513_v43  ;;  %2627 = vadd.xlane.f32.xlu0 %v2626_v27  ;;  %v2559_v43 = vsel %vm1930_vm3, %v2547_v19, 0.0  ;;  %v2551_v27 = vmul.f32 %v8930_v31, %v8822_v25  ;;  %v2651_v31 = vmul.f32 %v8950_v22, %v8813_v44  ;;  %v2727_v22 = vsel %vm1930_vm3, %v2707_v14, 0.0 }
 0x50b   :  { %v2571_v3 = vsel %vm1930_vm3, %v2551_v27, 0.0  ;;  %v9122_v27 = vld [vmem:[%s10898_s8] sm:$0xff] }
 0x50d   :  { %2566 = vadd.xlane.f32.xlu1 %v2565_v12  ;;  %2667 = vadd.xlane.f32.xlu0 %v2666_v61  ;;  %v2611_v61 = vsel %vm1930_vm3, %v2599_v34, 0.0 }
 0x511   :  { %v8955_v41 = vpop.xlane.xlu1 %2033  ;;  %2618 = vadd.xlane.f32.xlu1 %v2617_v52  ;;  %2679 = vadd.xlane.f32.xlu0 %v2678_v5  ;;  %v2663_v5 = vsel %vm1930_vm3, %v2651_v31, 0.0 }
 0x515   :  { %v8967_v11 = vpop.xlane.xlu1 %2401  ;;  %2670 = vadd.xlane.f32.xlu1 %v2669_v23  ;;  %2719 = vadd.xlane.f32.xlu0 %v2718_v24  ;;  %v2675_v23 = vsel %vm1930_vm3, %v2655_v42, 0.0  ;;  %v2715_v24 = vsel %vm1930_vm3, %v2703_v58, 0.0 }
 0x519   :  { %v8985_v1 = vpop.xlane.xlu1 %2453  ;;  %2722 = vadd.xlane.f32.xlu1 %v2721_v37  ;;  %2731 = vadd.xlane.f32.xlu0 %v2730_v33 }
 0x51d   :  { %v8993_v62 = vpop.xlane.xlu1 %2505  ;;  %2774 = vadd.xlane.f32.xlu1 %v2773_v15  ;;  %2771 = vadd.xlane.f32.xlu0 %v2770_v49  ;;  %v2767_v15 = vsel %vm1930_vm3, %v2755_v2, 0.0  ;;  %v2759_v49 = vmul.f32 %v8974_v40, %v8822_v25 }
 0x51f   :  { %v2779_v28 = vsel %vm1930_vm3, %v2759_v49, 0.0 }
 0x521   :  { %v8999_v39 = vpop.xlane.xlu1 %2557  ;;  %2777 = vadd.xlane.f32.xlu1 %v2776_v26  ;;  %2036 = vadd.xlane.f32.xlu0 %v2035_v29  ;;  %v2782_v26 = vsel %vm1930_vm3, %v2760_v46, 0.0 }
 0x525   :  { %v9004_v21 = vpop.xlane.xlu1 %2609  ;;  %2048 = vadd.xlane.f32.xlu0 %v2047_v50 }
 0x529   :  { %v9009_v36 = vpop.xlane.xlu1 %2661  ;;  %2404 = vadd.xlane.f32.xlu0 %v2403_v38 }
 0x52d   :  { %v9014_v18 = vpop.xlane.xlu1 %2713  ;;  %2416 = vadd.xlane.f32.xlu0 %v2415_v54 }
 0x531   :  { %v9019_v13 = vpop.xlane.xlu1 %2765  ;;  %2456 = vadd.xlane.f32.xlu0 %v2455_v30 }
 0x535   :  { %2468 = vadd.xlane.f32.xlu0 %v2467_v48  ;;  %v9024_v4 = vpop.xlane.xlu1 %2030 }
 0x539   :  { %2508 = vadd.xlane.f32.xlu0 %v2507_v32  ;;  %v9029_v56 = vpop.xlane.xlu1 %2398 }
 0x53d   :  { %2520 = vadd.xlane.f32.xlu0 %v2519_v53  ;;  %v9037_v7 = vpop.xlane.xlu1 %2450 }
 0x541   :  { %2560 = vadd.xlane.f32.xlu0 %v2559_v43  ;;  %v9042_v12 = vpop.xlane.xlu1 %2502 }
 0x545   :  { %2572 = vadd.xlane.f32.xlu0 %v2571_v3  ;;  %v9050_v52 = vpop.xlane.xlu1 %2554 }
 0x549   :  { %2612 = vadd.xlane.f32.xlu0 %v2611_v61  ;;  %v9055_v8 = vpop.xlane.xlu1 %2606  ;;  %v11020_v61 = vld [vmem:[#allocation3_spill] sm:$0xff] }
 0x54a   :  { %v9130_v10 = vrot.slane %v9122_v27, %v11020_v61 }
 0x54c   :  { %v2058_v58 = vmul.f32 %v9130_v10, %v8955_v41  ;;  %v2057_v14 = vmul.f32 %v9130_v10, %v9024_v4 }
 0x54d   :  { %2624 = vadd.xlane.f32.xlu0 %v2623_v6  ;;  %v9063_v37 = vpop.xlane.xlu1 %2658  ;;  %v11021_v6 = vld [vmem:[#allocation2_spill] sm:$0xff] }
 0x54e   :  { %v9133_v31 = vsub.s32 1, %v11021_v6 }
 0x550   :  { %11022 = vst [vmem:[#allocation22_spill] sm:$0xff] %v9133_v31 }
 0x551   :  { %2664 = vadd.xlane.f32.xlu0 %v2663_v5  ;;  %v9068_v55 = vpop.xlane.xlu1 %2710 }
 0x555   :  { %2676 = vadd.xlane.f32.xlu0 %v2675_v23  ;;  %v9076_v16 = vpop.xlane.xlu1 %2762  ;;  %v9141_v23 = vrot.slane %v9122_v27, %v9133_v31 }
 0x556   :  { %v9079_v44 = vpop.xlane.xlu0 %2039 }
 0x557   :  { %v2426_v46 = vmul.f32 %v9141_v23, %v8967_v11  ;;  %v2425_v4 = vmul.f32 %v9141_v23, %v9029_v56 }
 0x559   :  { %v7266_v35 = vpop.f32.mrb[10].mxu0  ;;  %2716 = vadd.xlane.f32.xlu0 %v2715_v24  ;;  %v9146_v24 = vsub.s32 2, %v11021_v6 }
 0x55a   :  { %v2137_v33 = vpop.f32.mrb[11].mxu0 }
 0x55b   :  { %11023 = vst [vmem:[#allocation16_spill] sm:$0xff] %v9146_v24  ;;  %v9160_v41 = vrot.slane %v9122_v27, %v9146_v24  ;;  %v10950_v24 = vsub.s32 4, %v11021_v6 }
 0x55d   :  { %2728 = vadd.xlane.f32.xlu0 %v2727_v22  ;;  %v2143_v22 = vadd.f32 %v7266_v35, %v2058_v58  ;;  %v2478_v61 = vmul.f32 %v9160_v41, %v8985_v1  ;;  %v2477_v31 = vmul.f32 %v9160_v41, %v9037_v7  ;;  %v9186_v1 = vrot.slane %v9122_v27, %v10950_v24 }
 0x55f   :  { %v2434_v58 = vadd.f32 %v2426_v46, %v2143_v22  ;;  %v10951_v46 = vsub.s32 5, %v11021_v6 }
 0x561   :  { %2768 = vadd.xlane.f32.xlu0 %v2767_v15  ;;  %v2138_v15 = vadd.f32 %v2137_v33, %v2057_v14  ;;  %v2486_v56 = vadd.f32 %v2478_v61, %v2434_v58  ;;  %v2582_v58 = vmul.f32 %v9186_v1, %v8999_v39 }
 0x563   :  { %v2433_v33 = vadd.f32 %v2425_v4, %v2138_v15 }
 0x565   :  { %2780 = vadd.xlane.f32.xlu0 %v2779_v28  ;;  %v2485_v9 = vadd.f32 %v2477_v31, %v2433_v33 }
 0x569   :  { %2783 = vadd.xlane.f32.xlu0 %v2782_v26  ;;  %v10949_v26 = vsub.s32 3, %v11021_v6 }
 0x56a   :  { %v9081_v29 = vpop.xlane.xlu1 %2045 }
 0x56b   :  { %v9174_v11 = vrot.slane %v9122_v27, %v10949_v26  ;;  %v2062_v33 = vmul.f32 %v9130_v10, %v9081_v29 }
 0x56d   :  { %v2530_v15 = vmul.f32 %v9174_v11, %v8993_v62  ;;  %v2529_v4 = vmul.f32 %v9174_v11, %v9042_v12  ;;  %v9199_v62 = vrot.slane %v9122_v27, %v10951_v46  ;;  %v2581_v12 = vmul.f32 %v9186_v1, %v9050_v52 }
 0x56e   :  { %v9083_v57 = vpop.xlane.xlu1 %2413  ;;  %v9085_v50 = vpop.xlane.xlu0 %2051 }
 0x56f   :  { %v2538_v26 = vadd.f32 %v2530_v15, %v2486_v56  ;;  %v2537_v61 = vadd.f32 %v2529_v4, %v2485_v9  ;;  %v2430_v24 = vmul.f32 %v9141_v23, %v9083_v57 }
 0x571   :  { %v2590_v4 = vadd.f32 %v2582_v58, %v2538_v26  ;;  %v10952_v26 = vsub.s32 7, %v11021_v6 }
 0x572   :  { %v9087_v25 = vpop.xlane.xlu1 %2465  ;;  %v9089_v40 = vpop.xlane.xlu0 %2407 }
 0x573   :  { %v2482_v57 = vmul.f32 %v9160_v41, %v9087_v25 }
 0x576   :  { %v9091_v20 = vpop.xlane.xlu1 %2517  ;;  %v9093_v63 = vpop.xlane.xlu0 %2419 }
 0x57a   :  { %v9095_v45 = vpop.xlane.xlu1 %2569  ;;  %v9097_v38 = vpop.xlane.xlu0 %2459 }
 0x57e   :  { %v9099_v59 = vpop.xlane.xlu1 %2621  ;;  %v9101_v54 = vpop.xlane.xlu0 %2471 }
 0x582   :  { %v9103_v47 = vpop.xlane.xlu1 %2673  ;;  %v9105_v30 = vpop.xlane.xlu0 %2511 }
 0x586   :  { %v9107_v60 = vpop.xlane.xlu1 %2725  ;;  %v9109_v48 = vpop.xlane.xlu0 %2523 }
 0x58a   :  { %v2043_v17 = vpop.xlane.xlu1 %2042  ;;  %v9111_v32 = vpop.xlane.xlu0 %2563 }
 0x58b   :  { %v2061_v56 = vmul.f32 %v9130_v10, %v2043_v17  ;;  %v2634_v17 = vmul.f32 %v9199_v62, %v9004_v21 }
 0x58e   :  { %v2411_v0 = vpop.xlane.xlu1 %2410  ;;  %v9113_v53 = vpop.xlane.xlu0 %2575 }
 0x58f   :  { %v2429_v29 = vmul.f32 %v9141_v23, %v2411_v0 }
 0x592   :  { %v9115_v19 = vpop.xlane.xlu1 %2462  ;;  %v9117_v43 = vpop.xlane.xlu0 %2615 }
 0x596   :  { %v9124_v3 = vpop.xlane.xlu1 %2514  ;;  %v9126_v34 = vpop.xlane.xlu0 %2627 }
 0x597   :  { %v2533_v25 = vmul.f32 %v9174_v11, %v9124_v3 }
 0x59a   :  { %v9135_v5 = vpop.xlane.xlu0 %2667  ;;  %v9137_v42 = vpop.xlane.xlu1 %2566 }
 0x59b   :  { %v2585_v3 = vmul.f32 %v9186_v1, %v9137_v42  ;;  %v9259_v42 = vld [vmem:[%s10898_s8 + $0x8] ss:$0 sm:$0xff] }
 0x59e   :  { %v9150_v2 = vpop.f32.mrb[8].mxu1  ;;  %v9152_v49 = vpop.xlane.xlu0 %2679 }
 0x59f   :  { %v9154_v28 = vpop.f32.mrb[9].mxu1  ;;  %v9165_v35 = vpop.xlane.xlu1 %2618 }
 0x5a2   :  { %v9167_v14 = vpop.xlane.xlu0 %2719 }
 0x5a3   :  { %11024 = vst [vmem:[#allocation23_spill] sm:$0xff] %v9167_v14  ;;  %v2671_v51 = vpop.xlane.xlu1 %2670 }
 0x5a6   :  { %v9179_v22 = vpop.xlane.xlu0 %2731 }
 0x5a7   :  { %11025 = vst [vmem:[#allocation17_spill] sm:$0xff] %v9179_v22  ;;  %v2723_v15 = vpop.xlane.xlu1 %2722  ;;  %v2589_v22 = vadd.f32 %v2581_v12, %v2537_v61  ;;  %v2481_v61 = vmul.f32 %v9160_v41, %v9115_v19  ;;  %v2534_v12 = vmul.f32 %v9174_v11, %v9091_v20  ;;  %v2586_v20 = vmul.f32 %v9186_v1, %v9095_v45 }
 0x5aa   :  { %v9192_v31 = vpop.xlane.xlu0 %2771 }
 0x5ab   :  { %11026 = vst [vmem:[#allocation25_spill] sm:$0xff] %v9192_v31  ;;  %v11027_v31 = vsub.s32 6, %v11021_v6 }
 0x5ad   :  { %v7280_v9 = vpop.f32.mrb[12].mxu0  ;;  %v9211_v46 = vrot.slane %v9122_v27, %v11027_v31 }
 0x5ae   :  { %v2305_v39 = vadd.f32 %v7280_v9, %v2062_v33  ;;  %v2299_v7 = vpop.f32.mrb[13].mxu0  ;;  %v9214_v52 = vpop.xlane.xlu0 %2036  ;;  %v2633_v33 = vmul.f32 %v9199_v62, %v9055_v8 }
 0x5af   :  { %v2300_v14 = vadd.f32 %v2299_v7, %v2061_v56  ;;  %v2642_v7 = vadd.f32 %v2634_v17, %v2590_v4  ;;  %v2686_v19 = vmul.f32 %v9211_v46, %v9009_v36  ;;  %v2638_v17 = vmul.f32 %v9199_v62, %v9099_v59 }
 0x5b0   :  { %v2438_v58 = vadd.f32 %v2430_v24, %v2305_v39  ;;  %v2641_v9 = vadd.f32 %v2633_v33, %v2589_v22  ;;  %v2775_v24 = vpop.xlane.xlu1 %2774  ;;  %v2685_v22 = vmul.f32 %v9211_v46, %v9063_v37  ;;  %v2690_v37 = vmul.f32 %v9211_v46, %v9103_v47 }
 0x5b1   :  { %v2437_v31 = vadd.f32 %v2429_v29, %v2300_v14  ;;  %v9225_v0 = vpop.f32.mrb[10].mxu1  ;;  %v9240_v14 = vrot.slane %v9122_v27, %v10952_v26  ;;  %v2637_v27 = vmul.f32 %v9199_v62, %v9165_v35 }
 0x5b2   :  { %v2490_v21 = vadd.f32 %v2482_v57, %v2438_v58  ;;  %v9229_v56 = vpop.f32.mrb[11].mxu1  ;;  %v9233_v8 = vpop.xlane.xlu0 %2048  ;;  %v2694_v57 = vadd.f32 %v2686_v19, %v2642_v7  ;;  %v2693_v58 = vadd.f32 %v2685_v22, %v2641_v9  ;;  %v2689_v7 = vmul.f32 %v9211_v46, %v2671_v51 }
 0x5b3   :  { %v2489_v39 = vadd.f32 %v2481_v61, %v2437_v31  ;;  %v2738_v45 = vmul.f32 %v9240_v14, %v9014_v18  ;;  %v2737_v59 = vmul.f32 %v9240_v14, %v9068_v55  ;;  %v2741_v47 = vmul.f32 %v9240_v14, %v2723_v15 }
 0x5b4   :  { %v2542_v4 = vadd.f32 %v2534_v12, %v2490_v21  ;;  %v2778_v12 = vpop.xlane.xlu1 %2777  ;;  %v2742_v21 = vmul.f32 %v9240_v14, %v9107_v60  ;;  %v2789_v51 = vmul.f32 %v9259_v42, %v9076_v16  ;;  %v2793_v22 = vmul.f32 %v9259_v42, %v2775_v24 }
 0x5b5   :  { %v2541_v29 = vadd.f32 %v2533_v25, %v2489_v39  ;;  %v2746_v9 = vadd.f32 %v2738_v45, %v2694_v57  ;;  %v2745_v25 = vadd.f32 %v2737_v59, %v2693_v58  ;;  %v2794_v55 = vmul.f32 %v9259_v42, %v2778_v12 }
 0x5b6   :  { %v2594_v36 = vadd.f32 %v2586_v20, %v2542_v4  ;;  %v2405_v61 = vpop.xlane.xlu0 %2404  ;;  %v2790_v20 = vmul.f32 %v9259_v42, %v9019_v13  ;;  %v2060_v59 = vmul.f32 %v9130_v10, %v9079_v44  ;;  %v2480_v44 = vmul.f32 %v9160_v41, %v9097_v38 }
 0x5b7   :  { %v2593_v33 = vadd.f32 %v2585_v3, %v2541_v29  ;;  %v9277_v15 = vadd.f32 %v2789_v51, %v2745_v25  ;;  %v2532_v51 = vmul.f32 %v9174_v11, %v9105_v30  ;;  %v2536_v38 = vmul.f32 %v9174_v11, %v9109_v48 }
 0x5b8   :  { %v2646_v31 = vadd.f32 %v2638_v17, %v2594_v36  ;;  %v9273_v60 = vadd.f32 %v2790_v20, %v2746_v9  ;;  %v2432_v9 = vmul.f32 %v9141_v23, %v9093_v63  ;;  %v2427_v63 = vmul.f32 %v9141_v23, %v2405_v61 }
 0x5b9   :  { %v2645_v35 = vadd.f32 %v2637_v27, %v2593_v33  ;;  %v2584_v48 = vmul.f32 %v9186_v1, %v9111_v32  ;;  %v2636_v32 = vmul.f32 %v9199_v62, %v9117_v43  ;;  %v2688_v43 = vmul.f32 %v9211_v46, %v9135_v5 }
 0x5ba   :  { %v2698_v18 = vadd.f32 %v2690_v37, %v2646_v31  ;;  %v2417_v19 = vpop.xlane.xlu0 %2416 }
 0x5bb   :  { %v2697_v39 = vadd.f32 %v2689_v7, %v2645_v35  ;;  %v2064_v7 = vmul.f32 %v9130_v10, %v9085_v50  ;;  %v2224_v35 = vadd.f32 %v9150_v2, %v2060_v59  ;;  %v2484_v50 = vmul.f32 %v9160_v41, %v9101_v54 }
 0x5bc   :  { %v2750_v4 = vadd.f32 %v2742_v21, %v2698_v18  ;;  %v2428_v18 = vmul.f32 %v9141_v23, %v9089_v40  ;;  %v2059_v2 = vmul.f32 %v9130_v10, %v9214_v52 }
 0x5bd   :  { %v2749_v3 = vadd.f32 %v2741_v47, %v2697_v39  ;;  %v2386_v12 = vadd.f32 %v9225_v0, %v2064_v7  ;;  %v2063_v0 = vmul.f32 %v9130_v10, %v9233_v8 }
 0x5be   :  { %v9275_v29 = vadd.f32 %v2794_v55, %v2750_v4  ;;  %v2457_v17 = vpop.xlane.xlu0 %2456  ;;  %v2436_v25 = vadd.f32 %v2428_v18, %v2224_v35  ;;  %v2431_v55 = vmul.f32 %v9141_v23, %v2417_v19  ;;  %v2219_v54 = vadd.f32 %v9154_v28, %v2059_v2 }
 0x5bf   :  { %v9279_v36 = vadd.f32 %v2793_v22, %v2749_v3  ;;  %v2440_v47 = vadd.f32 %v2432_v9, %v2386_v12  ;;  %v2381_v52 = vadd.f32 %v9229_v56, %v2063_v0  ;;  %v2479_v22 = vmul.f32 %v9160_v41, %v2457_v17 }
 0x5c0   :  { %v2873_v13 = vcombine.low %v9273_v60, %v9275_v29  ;;  %v2874_v57 = vcombine.high %v9273_v60, %v9275_v29  ;;  %v2488_v20 = vadd.f32 %v2480_v44, %v2436_v25  ;;  %v2435_v61 = vadd.f32 %v2427_v63, %v2219_v54 }
 0x5c1   :  { %v2805_v16 = vcombine.low %v9277_v15, %v9279_v36  ;;  %v2806_v24 = vcombine.high %v9277_v15, %v9279_v36  ;;  %v2492_v40 = vadd.f32 %v2484_v50, %v2440_v47  ;;  %v2439_v7 = vadd.f32 %v2431_v55, %v2381_v52  ;;  %v11029_v52 = vld [vmem:[#allocation17_spill] sm:$0xff] }
 0x5c2   :  { %v2469_v58 = vpop.xlane.xlu0 %2468  ;;  %v2540_v8 = vadd.f32 %v2532_v51, %v2488_v20  ;;  %v2588_v28 = vmul.f32 %v9186_v1, %v9113_v53  ;;  %v2487_v56 = vadd.f32 %v2479_v22, %v2435_v61  ;;  %v2640_v53 = vmul.f32 %v9199_v62, %v9126_v34 }
 0x5c3   :  { %v2483_v10 = vmul.f32 %v9160_v41, %v2469_v58  ;;  %v2544_v3 = vadd.f32 %v2536_v38, %v2492_v40  ;;  %v2692_v34 = vmul.f32 %v9211_v46, %v9152_v49  ;;  %v11028_v38 = vld [vmem:[#allocation23_spill] sm:$0xff]  ;;  %v2744_v5 = vmul.f32 %v9240_v14, %v11029_v52 }
 0x5c4   :  { %v2592_v58 = vadd.f32 %v2584_v48, %v2540_v8  ;;  %v2740_v54 = vmul.f32 %v9240_v14, %v11028_v38 }
 0x5c5   :  { %v2491_v19 = vadd.f32 %v2483_v10, %v2439_v7  ;;  %v2596_v35 = vadd.f32 %v2588_v28, %v2544_v3  ;;  %v11030_v7 = vld [vmem:[#allocation25_spill] sm:$0xff] }
 0x5c6   :  { %v2509_v27 = vpop.xlane.xlu0 %2508 }
 0x5c7   :  { %v2531_v23 = vmul.f32 %v9174_v11, %v2509_v27  ;;  %v2648_v44 = vadd.f32 %v2640_v53, %v2596_v35 }
 0x5c9   :  { %v2539_v18 = vadd.f32 %v2531_v23, %v2487_v56  ;;  %v2700_v51 = vadd.f32 %v2692_v34, %v2648_v44  ;;  %v2792_v23 = vmul.f32 %v9259_v42, %v11030_v7 }
 0x5ca   :  { %v2521_v33 = vpop.xlane.xlu0 %2520 }
 0x5cb   :  { %v2535_v30 = vmul.f32 %v9174_v11, %v2521_v33 }
 0x5cd   :  { %v2543_v9 = vadd.f32 %v2535_v30, %v2491_v19  ;;  %v11031_v30 = vld [vmem:[#allocation11_spill] sm:$0xff] }
 0x5ce   :  { %v2561_v45 = vpop.xlane.xlu0 %2560  ;;  %v2813_v48 = vrot.slane %v2805_v16, %v11031_v30  ;;  %v2881_v36 = vrot.slane %v2873_v13, %v11031_v30 }
 0x5cf   :  { %v2583_v17 = vmul.f32 %v9186_v1, %v2561_v45 }
 0x5d1   :  { %v2591_v33 = vadd.f32 %v2583_v17, %v2539_v18 }
 0x5d2   :  { %v2573_v37 = vpop.xlane.xlu0 %2572 }
 0x5d3   :  { %v2587_v41 = vmul.f32 %v9186_v1, %v2573_v37  ;;  %v2644_v37 = vadd.f32 %v2636_v32, %v2592_v58 }
 0x5d5   :  { %v2595_v25 = vadd.f32 %v2587_v41, %v2543_v9  ;;  %v2696_v20 = vadd.f32 %v2688_v43, %v2644_v37  ;;  %v11032_v9 = vld [vmem:[#allocation14_spill] sm:$0xff] }
 0x5d6   :  { %v2613_v31 = vpop.xlane.xlu0 %2612 }
 0x5d7   :  { %v2635_v27 = vmul.f32 %v9199_v62, %v2613_v31  ;;  %v2748_v49 = vadd.f32 %v2740_v54, %v2696_v20 }
 0x5d9   :  { %v2643_v50 = vadd.f32 %v2635_v27, %v2591_v33  ;;  %v2800_v17 = vadd.f32 %v2792_v23, %v2748_v49  ;;  %v3108_v49 = vld [vmem:[%s10899_s4] sm:$0xff] }
 0x5da   :  { %v2625_v21 = vpop.xlane.xlu0 %2624 }
 0x5db   :  { %v2639_v11 = vmul.f32 %v9199_v62, %v2625_v21 }
 0x5dd   :  { %v2647_v2 = vadd.f32 %v2639_v11, %v2595_v25 }
 0x5de   :  { %v2665_v39 = vpop.xlane.xlu0 %2664 }
 0x5df   :  { %v2687_v45 = vmul.f32 %v9211_v46, %v2665_v39 }
 0x5e1   :  { %v2695_v62 = vadd.f32 %v2687_v45, %v2643_v50 }
 0x5e2   :  { %v2677_v4 = vpop.xlane.xlu0 %2676 }
 0x5e3   :  { %v2691_v1 = vmul.f32 %v9211_v46, %v2677_v4 }
 0x5e5   :  { %v2699_v0 = vadd.f32 %v2691_v1, %v2647_v2 }
 0x5e6   :  { %v2717_v59 = vpop.xlane.xlu0 %2716 }
 0x5e7   :  { %v2739_v31 = vmul.f32 %v9240_v14, %v2717_v59  ;;  %v2752_v59 = vadd.f32 %v2744_v5, %v2700_v51 }
 0x5e9   :  { %v2747_v4 = vadd.f32 %v2739_v31, %v2695_v62 }
 0x5ea   :  { %v2729_v12 = vpop.xlane.xlu0 %2728 }
 0x5eb   :  { %v2743_v21 = vmul.f32 %v9240_v14, %v2729_v12  ;;  %v2820_v14 = vrot.slane %v2806_v24, %v11031_v30  ;;  %v2888_v24 = vrot.slane %v2874_v57, %v11031_v30 }
 0x5ed   :  { %v2751_v63 = vadd.f32 %v2743_v21, %v2699_v0 }
 0x5ee   :  { %v2769_v47 = vpop.xlane.xlu0 %2768 }
 0x5ef   :  { %v2791_v39 = vmul.f32 %v9259_v42, %v2769_v47 }
 0x5f1   :  { %v2799_v22 = vadd.f32 %v2791_v39, %v2747_v4 }
 0x5f2   :  { %v2781_v40 = vpop.xlane.xlu0 %2780 }
 0x5f3   :  { %v2795_v55 = vmul.f32 %v9259_v42, %v2781_v40 }
 0x5f5   :  { %v2803_v10 = vadd.f32 %v2795_v55, %v2751_v63 }
 0x5f6   :  { %v2784_v46 = vpop.xlane.xlu0 %2783 }
 0x5f7   :  { %v2821_v8 = vcombine.low %v2799_v22, %v2803_v10  ;;  %v2822_v3 = vcombine.high %v2799_v22, %v2803_v10  ;;  %v2796_v61 = vmul.f32 %v9259_v42, %v2784_v46  ;;  %v3109_v46 = vld [vmem:[%s10899_s4 + $0x8] sm:$0xff] }
 0x5f9   :  { %v2829_v28 = vrot.slane %v2821_v8, %v11031_v30  ;;  %v2836_v56 = vrot.slane %v2822_v3, %v11031_v30  ;;  %v2804_v19 = vadd.f32 %v2796_v61, %v2752_v59 }
 0x5fb   :  { %v2837_v41 = vcombine.low %v2813_v48, %v2829_v28  ;;  %v2838_v58 = vcombine.high %v2813_v48, %v2829_v28  ;;  %v2853_v35 = vcombine.low %v2820_v14, %v2836_v56  ;;  %v2854_v42 = vcombine.high %v2820_v14, %v2836_v56  ;;  %v3110_v56 = vld [vmem:[%s10899_s4 + $0x10] sm:$0xff] }
 0x5fc   :  { %v2889_v12 = vcombine.low %v2800_v17, %v2804_v19  ;;  %v2890_v18 = vcombine.high %v2800_v17, %v2804_v19  ;;  %v7499_v28 = vpack.c.bf16 %v3109_v46, %v3108_v49  ;;  %v3111_v19 = vld [vmem:[%s10899_s4 + $0x18] sm:$0xff] }
 0x5fd   :  { %v2845_v27 = vrot.slane %v2837_v41, %v11032_v9  ;;  %v2852_v16 = vrot.slane %v2838_v58, %v11032_v9  ;;  %v2861_v11 = vrot.slane %v2853_v35, %v11032_v9  ;;  %v2868_v15 = vrot.slane %v2854_v42, %v11032_v9 }
 0x5fe   :  { %v2897_v32 = vrot.slane %v2889_v12, %v11031_v30  ;;  %v2904_v53 = vrot.slane %v2890_v18, %v11031_v30  ;;  %7500 = vmatprep.subr.bf16.mxu0 %v7499_v28  ;;  %v7503_v42 = vpack.c.bf16 %v3111_v19, %v3110_v56 }
 0x5ff   :  { %v2941_v33 = vcombine.low %v2845_v27, %v2852_v16  ;;  %v6973_v25 = vcombine.high %v2845_v27, %v2852_v16  ;;  %v2957_v45 = vcombine.low %v2861_v11, %v2868_v15  ;;  %v6974_v1 = vcombine.high %v2861_v11, %v2868_v15  ;;  %7502 = vmatpush3.bf16.msra.mxu0 %v7499_v28  ;;  %v11033_v11 = vld [vmem:[#allocation4_spill] sm:$0xff] }
 0x600   :  { %v2905_v37 = vcombine.low %v2881_v36, %v2897_v32  ;;  %v2906_v47 = vcombine.high %v2881_v36, %v2897_v32  ;;  %v2921_v44 = vcombine.low %v2888_v24, %v2904_v53  ;;  %v2922_v50 = vcombine.high %v2888_v24, %v2904_v53  ;;  %7504 = vmatprep.subr.bf16.mxu0 %v7503_v42 }
 0x601   :  { %v2948_v2 = vrot.slane %v2941_v33, %v11031_v30  ;;  %v2956_v13 = vrot.slane %v6973_v25, %v11031_v30  ;;  %v2964_v31 = vrot.slane %v2957_v45, %v11031_v30  ;;  %v2972_v60 = vrot.slane %v6974_v1, %v11031_v30 }
 0x602   :  { %v2913_v29 = vrot.slane %v2905_v37, %v11032_v9  ;;  %v2920_v57 = vrot.slane %v2906_v47, %v11032_v9  ;;  %v2929_v21 = vrot.slane %v2921_v44, %v11032_v9  ;;  %v2936_v43 = vrot.slane %v2922_v50, %v11032_v9 }
 0x603   :  { %v2973_v34 = vcombine.low %v2948_v2, %v2956_v13  ;;  %v2989_v62 = vcombine.low %v2964_v31, %v2972_v60  ;;  %v2974_v0 = vcombine.high %v2948_v2, %v2956_v13  ;;  %v2990_v39 = vcombine.high %v2964_v31, %v2972_v60  ;;  %7506 = vmatpush3.bf16.msra.mxu0 %v7503_v42 }
 0x604   :  { %v3009_v20 = vcombine.low %v2913_v29, %v2920_v57  ;;  %v6975_v40 = vcombine.high %v2913_v29, %v2920_v57  ;;  %v3025_v4 = vcombine.low %v2929_v21, %v2936_v43  ;;  %v6976_v63 = vcombine.high %v2929_v21, %v2936_v43  ;;  %v7880_v29 = vld [vmem:[%s10893_s0 + $0x8] sm:$0xff]  ;;  %v7881_v21 = vld [vmem:[%s10893_s0] sm:$0xff] }
 0x605   :  { %v2981_v55 = vrot.slane %v2973_v34, %v11032_v9  ;;  %v2997_v51 = vrot.slane %v2989_v62, %v11032_v9  ;;  %v2988_v38 = vrot.slane %v2974_v0, %v11032_v9  ;;  %v3004_v54 = vrot.slane %v2990_v39, %v11032_v9 }
 0x606   :  { %v3016_v52 = vrot.slane %v3009_v20, %v11031_v30  ;;  %v3024_v5 = vrot.slane %v6975_v40, %v11031_v30  ;;  %v3032_v22 = vrot.slane %v3025_v4, %v11031_v30  ;;  %v3040_v10 = vrot.slane %v6976_v63, %v11031_v30 }
 0x607   :  { %v3006_v8 = vcombine.high %v2981_v55, %v2997_v51  ;;  %v3008_v3 = vcombine.high %v2988_v38, %v3004_v54  ;;  %v3007_v59 = vcombine.low %v2988_v38, %v3004_v54  ;;  %v3005_v61 = vcombine.low %v2981_v55, %v2997_v51 }
 0x608   :  { %v3042_v7 = vcombine.high %v3016_v52, %v3024_v5  ;;  %v3058_v23 = vcombine.high %v3032_v22, %v3040_v10  ;;  %v3041_v48 = vcombine.low %v3016_v52, %v3024_v5  ;;  %v3057_v14 = vcombine.low %v3032_v22, %v3040_v10  ;;  %v7882_v52 = vld [vmem:[%s10894_s9] sm:$0x7] }
 0x609   :  { %v11034_v5 = vld [vmem:[#allocation22_spill] sm:$0xff] }
 0x60a   :  { %v3056_v17 = vrot.slane %v3042_v7, %v11032_v9  ;;  %v3072_v41 = vrot.slane %v3058_v23, %v11032_v9  ;;  %v3049_v58 = vrot.slane %v3041_v48, %v11032_v9  ;;  %v3065_v35 = vrot.slane %v3057_v14, %v11032_v9 }
 0x60b   :  { %v3229_v22 = vrot.slane %v7882_v52, %v11034_v5 }
 0x60c   :  { %v3075_v12 = vcombine.low %v3056_v17, %v3072_v41  ;;  %v3074_v18 = vcombine.high %v3049_v58, %v3065_v35  ;;  %v3076_v27 = vcombine.high %v3056_v17, %v3072_v41  ;;  %v3073_v16 = vcombine.low %v3049_v58, %v3065_v35 }
 0x60e   :  { %3089 = vrot.lane.b32.xlu1 %v3075_v12, %s7938_s20  ;;  %3081 = vrot.lane.b32.xlu0 %v3074_v18, %s7939_s21 }
 0x612   :  { %3079 = vrot.lane.b32.xlu1 %v3006_v8, %s7939_s21  ;;  %3095 = vrot.lane.b32.xlu0 %v3008_v3, %s7940_s22 }
 0x616   :  { %3087 = vrot.lane.b32.xlu1 %v3007_v59, %s7938_s20  ;;  %3113 = vrot.lane.b32.xlu0 %v11033_v11, %s7941_s23 }
 0x61a   :  { %3097 = vrot.lane.b32.xlu1 %v3076_v27, %s7940_s22 }
 0x680   :  { %v3090_v15 = vpop.permute.xlu1 %3089  ;;  %v3082_v36 = vpop.permute.xlu0 %3081 }
 0x681   :  { %v3102_v33 = vsel %vm1036_vm1, %v3073_v16, %v3082_v36 }
 0x682   :  { %v3104_v47 = vsel %vm1930_vm3, %v3102_v33, %v3090_v15 }
 0x684   :  { %v3080_v24 = vpop.permute.xlu1 %3079  ;;  %v3096_v25 = vpop.permute.xlu0 %3095 }
 0x685   :  { %v3101_v32 = vsel %vm1036_vm1, %v3005_v61, %v3080_v24 }
 0x688   :  { %v3088_v53 = vpop.permute.xlu1 %3087  ;;  %v3114_v50 = vpop.permute.xlu0 %3113 }
 0x689   :  { %v3103_v45 = vsel %vm1930_vm3, %v3101_v32, %v3088_v53  ;;  %v3274_v32 = vld [vmem:[%s10900_s5] sm:$0xff]  ;;  %v3275_v53 = vld [vmem:[%s10900_s5 + $0x8] sm:$0xff] }
 0x68a   :  { %v3106_v1 = vsel %vm3105_vm4, %v3103_v45, %v3096_v25  ;;  %v7507_v33 = vpack.c.bf16 %v3275_v53, %v3274_v32  ;;  %v3276_v25 = vld [vmem:[%s10900_s5 + $0x10] sm:$0xff]  ;;  %v3277_v45 = vld [vmem:[%s10900_s5 + $0x18] sm:$0xff] }
 0x68b   :  { %7296 = vmatprep.mubr.msk.f32.mxu0 %vm69_vm0, %v3106_v1  ;;  %v7511_v1 = vpack.c.bf16 %v3277_v45, %v3276_v25  ;;  %v7002_v25 = vld [vmem:[%s10895_s7 + $0x8] sm:$0xff] }
 0x68c   :  { %v3098_v37 = vpop.permute.xlu1 %3097  ;;  %7508 = vmatprep.subr.bf16.mxu1 %v7507_v33 }
 0x68d   :  { %v3107_v44 = vsel %vm3105_vm4, %v3104_v47, %v3098_v37  ;;  %7510 = vmatpush3.bf16.msra.mxu1 %v7507_v33  ;;  %v11035_v37 = vld [vmem:[#allocation16_spill] sm:$0xff] }
 0x68e   :  { %7297 = vmatmul.mubr.msk.f32.vlgmr.msra.gmra.mrb[14].mxu0 %vm69_vm0, %v3107_v44  ;;  %v3281_v47 = vrot.slane %v7882_v52, %v11035_v37  ;;  %7512 = vmatprep.subr.bf16.mxu1 %v7511_v1  ;;  %v3365_v44 = vld [vmem:[%s10901_s6] sm:$0xff] }
 0x691   :  { %7514 = vmatpush3.bf16.msra.mxu1 %v7511_v1 }
 0x761   :  { %v7298_v2 = vpop.f32.mrb[14].mxu0 }
 0x762   :  { %v3194_v13 = vadd.f32 %v7298_v2, %v3114_v50  ;;  %v3188_v31 = vpop.f32.mrb[15].mxu0  ;;  %v3367_v2 = vld [vmem:[%s10901_s6 + $0x10] sm:$0xff] }
 0x763   :  { %v3189_v60 = vadd.f32 %v3188_v31, %v3114_v50  ;;  %v3366_v50 = vld [vmem:[%s10901_s6 + $0x8] sm:$0xff]  ;;  %v3368_v31 = vld [vmem:[%s10901_s6 + $0x18] sm:$0xff] }
 0x764   :  { %v3198_v57 = vadd.f32 %v7880_v29, %v3194_v13  ;;  %v7515_v13 = vpack.c.bf16 %v3366_v50, %v3365_v44  ;;  %v3369_v29 = vld [vmem:[%s10901_s6 + $0x20] sm:$0xff] }
 0x765   :  { %v3197_v43 = vadd.f32 %v7881_v21, %v3189_v60  ;;  %v7519_v60 = vpack.c.bf16 %v3368_v31, %v3367_v2 }
 0x766   :  { %v3202_v34 = vsel %vm69_vm0, %v3198_v57, 0.0  ;;  %7516 = vmatprep.subr.bf16.mxu0 %v7515_v13 }
 0x767   :  { %3203 = vadd.xlane.f32.xlu0 %v3202_v34  ;;  %v3199_v62 = vsel %vm69_vm0, %v3197_v43, 0.0  ;;  %7518 = vmatpush3.bf16.msra.mxu0 %v7515_v13 }
 0x768   :  { %3200 = vadd.xlane.f32.xlu1 %v3199_v62  ;;  %7520 = vmatprep.subr.bf16.mxu0 %v7519_v60 }
 0x76b   :  { %7522 = vmatpush3.bf16.msra.mxu0 %v7519_v60 }
 0x7f4   :  { %v3204_v0 = vpop.xlane.xlu0 %3203 }
 0x7f5   :  { %v3207_v39 = vmul.f32 0.03125, %v3204_v0  ;;  %v3201_v20 = vpop.xlane.xlu1 %3200 }
 0x7f6   :  { %v3206_v40 = vmul.f32 0.03125, %v3201_v20 }
 0x7f7   :  { %v3209_v4 = vsub.f32 %v3198_v57, %v3207_v39  ;;  %v3370_v57 = vld [vmem:[%s10901_s6 + $0x28] sm:$0xff] }
 0x7f8   :  { %v3208_v63 = vsub.f32 %v3197_v43, %v3206_v40  ;;  %v7523_v21 = vpack.c.bf16 %v3370_v57, %v3369_v29 }
 0x7f9   :  { %v3211_v55 = vmul.f32 %v3209_v4, %v3209_v4 }
 0x7fa   :  { %v3210_v51 = vmul.f32 %v3208_v63, %v3208_v63  ;;  %7524 = vmatprep.subr.bf16.mxu0 %v7523_v21 }
 0x7fb   :  { %v3215_v38 = vsel %vm69_vm0, %v3211_v55, 0.0  ;;  %7526 = vmatpush3.bf16.msra.mxu0 %v7523_v21 }
 0x7fc   :  { %3216 = vadd.xlane.f32.xlu1 %v3215_v38  ;;  %v3212_v54 = vsel %vm69_vm0, %v3210_v51, 0.0 }
 0x7fd   :  { %3213 = vadd.xlane.f32.xlu0 %v3212_v54 }
 0x813   :  { %3233 = vrot.lane.b32.xlu0 %v3229_v22, %s7925_s17 }
 0x817   :  { %3269 = vrot.lane.b32.xlu0 %v3229_v22, %s7941_s23 }
 0x81b   :  { %3374 = vrot.lane.b32.xlu0 %v3281_v47, %s7937_s28 }
 0x889   :  { %v3217_v10 = vpop.xlane.xlu1 %3216 }
 0x88a   :  { %v3219_v49 = vmul.f32 0.03125, %v3217_v10  ;;  %v3214_v46 = vpop.xlane.xlu0 %3213 }
 0x88b   :  { %v3218_v8 = vmul.f32 0.03125, %v3214_v46  ;;  %v3372_v46 = vld [vmem:[%s10901_s6 + $0x38] sm:$0xff] }
 0x88c   :  { %v3221_v3 = vadd.f32 1e-06, %v3219_v49  ;;  %v3371_v49 = vld [vmem:[%s10901_s6 + $0x30] sm:$0xff] }
 0x88d   :  { %v3220_v59 = vadd.f32 1e-06, %v3218_v8  ;;  %v7527_v8 = vpack.c.bf16 %v3372_v46, %v3371_v49 }
 0x88e   :  { %7802 = vrsqrt.f32 %v3221_v3  ;;  %v3234_v14 = vpop.permute.xlu0 %3233  ;;  %v6984_v3 = vld [vmem:[%s10892_s3 + $0x20] sm:$0xff] }
 0x88f   :  { %7804 = vrsqrt.f32 %v3220_v59  ;;  %7528 = vmatprep.subr.bf16.mxu0 %v7527_v8  ;;  %v6985_v59 = vld [vmem:[%s10892_s3 + $0x28] sm:$0xff] }
 0x890   :  { %7530 = vmatpush3.bf16.msra.mxu0 %v7527_v8 }
 0x892   :  { %v3270_v52 = vpop.permute.xlu0 %3269 }
 0x898   :  { %v7803_v61 = vpop.eup %7802 }
 0x899   :  { %v7805_v7 = vpop.eup %7804  ;;  %v3225_v23 = vmul.f32 %v7803_v61, %v3209_v4  ;;  %v7531_v61 = vpack.c.bf16 %v6985_v59, %v6984_v3 }
 0x89a   :  { %v3224_v48 = vmul.f32 %v7805_v7, %v3208_v63 }
 0x89b   :  { %v3231_v56 = vmul.f32 %v3229_v22, %v3225_v23  ;;  %7532 = vmatprep.subr.bf16.mxu1 %v7531_v61 }
 0x89c   :  { %v3230_v28 = vmul.f32 %v3229_v22, %v3224_v48 }
 0x89d   :  { %v9438_v17 = vadd.f32 %v3234_v14, %v3231_v56 }
 0x89e   :  { %v9436_v19 = vadd.f32 %v3234_v14, %v3230_v28 }
 0x89f   :  { %v3241_v58 = vsel %vm69_vm0, %v9438_v17, 0.0 }
 0x8a0   :  { %v3238_v41 = vsel %vm69_vm0, %v9436_v19, 0.0 }
 0x8a1   :  { %3239 = vadd.xlane.f32.xlu1 %v3238_v41  ;;  %v6986_v41 = vld [vmem:[%s10892_s3 + $0x30] sm:$0xff] }
 0x8a5   :  { %3242 = vadd.xlane.f32.xlu1 %v3241_v58  ;;  %v6987_v58 = vld [vmem:[%s10892_s3 + $0x38] sm:$0xff] }
 0x92e   :  { %v3240_v35 = vpop.xlane.xlu1 %3239 }
 0x92f   :  { %v3244_v42 = vmul.f32 0.03125, %v3240_v35  ;;  %v7535_v35 = vpack.c.bf16 %v6987_v58, %v6986_v41 }
 0x931   :  { %v3246_v27 = vsub.f32 %v9436_v19, %v3244_v42  ;;  %v3375_v42 = vpop.permute.xlu0 %3374 }
 0x932   :  { %v3243_v12 = vpop.xlane.xlu1 %3242 }
 0x933   :  { %v3245_v18 = vmul.f32 0.03125, %v3243_v12  ;;  %v3248_v36 = vmul.f32 %v3246_v27, %v3246_v27 }
 0x935   :  { %v3247_v16 = vsub.f32 %v9438_v17, %v3245_v18  ;;  %v3250_v24 = vsel %vm69_vm0, %v3248_v36, 0.0 }
 0x937   :  { %v3249_v11 = vmul.f32 %v3247_v16, %v3247_v16 }
 0x939   :  { %v3253_v15 = vsel %vm69_vm0, %v3249_v11, 0.0 }
 0x93a   :  { %3254 = vadd.xlane.f32.xlu1 %v3253_v15 }
 0x93e   :  { %3251 = vadd.xlane.f32.xlu1 %v3250_v24 }
 0x94f   :  { %3264 = vrot.lane.b32.xlu1 %v3229_v22, %s7937_s28 }
 0x9c7   :  { %v3255_v43 = vpop.xlane.xlu1 %3254 }
 0x9c8   :  { %v3257_v34 = vmul.f32 0.03125, %v3255_v43 }
 0x9ca   :  { %v3259_v62 = vadd.f32 1e-06, %v3257_v34 }
 0x9cb   :  { %v3252_v0 = vpop.xlane.xlu1 %3251 }
 0x9cc   :  { %7806 = vrsqrt.f32 %v3259_v62  ;;  %v3256_v39 = vmul.f32 0.03125, %v3252_v0 }
 0x9ce   :  { %v3258_v20 = vadd.f32 1e-06, %v3256_v39 }
 0x9cf   :  { %v3265_v63 = vpop.permute.xlu1 %3264 }
 0x9d0   :  { %7808 = vrsqrt.f32 %v3258_v20 }
 0x9d6   :  { %v7807_v40 = vpop.eup %7806 }
 0x9d7   :  { %v3263_v4 = vmul.f32 %v7807_v40, %v3247_v16 }
 0x9d9   :  { %v3268_v38 = vmul.f32 %v3265_v63, %v3263_v4 }
 0x9da   :  { %v7809_v55 = vpop.eup %7808 }
 0x9db   :  { %v3262_v51 = vmul.f32 %v7809_v55, %v3246_v27  ;;  %v3273_v10 = vadd.f32 %v3270_v52, %v3268_v38 }
 0x9dd   :  { %v3267_v54 = vmul.f32 %v3265_v63, %v3262_v51 }
 0x9df   :  { %v3272_v22 = vadd.f32 %v3270_v52, %v3267_v54 }
 0x9e1   :  { %7307 = vmatprep.mubr.msk.f32.mxu1 %vm69_vm0, %v3272_v22 }
 0x9e2   :  { %7308 = vmatmul.mubr.msk.f32.vlgmr.msra.gmra.mrb[12].mxu1 %vm69_vm0, %v3273_v10 }
 0x9e3   :  { %7534 = vmatpush3.bf16.msra.mxu1 %v7531_v61 }
 0x9e4   :  { %7536 = vmatprep.subr.bf16.mxu1 %v7535_v35 }
 0x9e7   :  { %7538 = vmatpush3.bf16.msra.mxu1 %v7535_v35 }
 0x9e8   :  { %7340 = vmatprep.subr.mxu1 %v7002_v25 }
 0xab5   :  { %v7309_v7 = vpop.f32.mrb[12].mxu1 }
 0xab6   :  { %v3360_v23 = vadd.f32 %v7309_v7, %v3281_v47  ;;  %v3354_v48 = vpop.f32.mrb[13].mxu1 }
 0xab7   :  { %v3355_v14 = vadd.f32 %v3354_v48, %v3281_v47 }
 0xab8   :  { %v3364_v56 = vmax.f32 %v3360_v23, 0.0 }
 0xab9   :  { %v3363_v28 = vmax.f32 %v3355_v14, 0.0 }
 0xabb   :  { %7326 = vmatprep.mubr.msk.f32.mxu0 %vm3377_vm5, %v3363_v28 }
 0xabc   :  { %7327 = vmatmul.mubr.msk.f32.vlgmr.msra.gmra.mrb[16].mxu0 %vm3377_vm5, %v3364_v56 }
 0xb8f   :  { %v7328_v12 = vpop.f32.mrb[16].mxu0 }
 0xb90   :  { %v3456_v18 = vadd.f32 %v7328_v12, %v3375_v42  ;;  %v3450_v27 = vpop.f32.mrb[17].mxu0 }
 0xb91   :  { %v3451_v16 = vadd.f32 %v3450_v27, %v3375_v42 }
 0xb92   :  { %v9504_v11 = vadd.f32 %v3456_v18, %v9438_v17  ;;  %v11038_v17 = vld [vmem:[#allocation3_spill] sm:$0xff] }
 0xb93   :  { %v9507_v15 = vadd.f32 %v3451_v16, %v9436_v19  ;;  %v6983_v19 = vld [vmem:[%s10894_s9 + $0x4] sm:$0x7] }
 0xb94   :  { %11036 = vst [vmem:[#allocation19_spill] sm:$0xff] %v9504_v11  ;;  %3462 = vst.msk [vmem:[%s10902_s11 + $0x8] sm:$0xff] %vm69_vm0, %v9504_v11  ;;  %v9527_v36 = vrot.slane %v6983_v19, %v11038_v17 }
 0xb95   :  { %11037 = vst [vmem:[#allocation26_spill] sm:$0xff] %v9507_v15  ;;  %3461 = vst.msk [vmem:[%s10902_s11] sm:$0xff] %vm69_vm0, %v9507_v15  ;;  %7337 = vmatprep.mubr.msk.f32.mxu1 %vm69_vm0, %v9507_v15 }
 0xb96   :  { %7338 = vmatmul.mubr.msk.f32.vlgmr.msra.gmra.mrb[14].mxu1 %vm69_vm0, %v9504_v11  ;;  %11039 = vst [vmem:[#allocation20_spill] sm:$0xff] %v9527_v36  ;;  %v9953_v11 = vld [vmem:[%s10896_s2 + $0x28] sm:$0xff] }
 0xb97   :  { %7341 = vmatpush3.msra.mxu1 %v7002_v25 }
 0xc69   :  { %v7339_v24 = vpop.f32.mrb[14].mxu1 }
 0xc6a   :  { %v9530_v32 = vadd.f32 %v7339_v24, %v9527_v36  ;;  %v3546_v53 = vpop.f32.mrb[15].mxu1 }
 0xc6b   :  { %v9533_v33 = vadd.f32 %v3546_v53, %v9527_v36 }
 0xc6c   :  { %11040 = vst [vmem:[#allocation24_spill] sm:$0xff] %v9530_v32  ;;  %3559 = vrot.lane.b32.xlu0 %v9530_v32, %s7923_s13 }
 0xc6d   :  { %3569 = vrot.lane.b32.xlu1 %v9533_v33, %s7924_s16 }
 0xc70   :  { %3557 = vrot.lane.b32.xlu0 %v9533_v33, %s7923_s13 }
 0xc71   :  { %3565 = vrot.lane.b32.xlu1 %v9530_v32, %s7922_s12 }
 0xc74   :  { %3563 = vrot.lane.b32.xlu0 %v9533_v33, %s7922_s12 }
 0xc75   :  { %3847 = vrot.lane.b32.xlu1 %v9533_v33, %s7925_s17 }
 0xc78   :  { %3571 = vrot.lane.b32.xlu0 %v9530_v32, %s7924_s16 }
 0xc7c   :  { %3849 = vrot.lane.b32.xlu0 %v9530_v32, %s7925_s17 }
 0xcde   :  { %v9554_v45 = vpop.permute.xlu0 %3559 }
 0xcdf   :  { %11041 = vst [vmem:[#allocation6_spill] sm:$0xff] %v9554_v45  ;;  %v9556_v1 = vpop.permute.xlu1 %3569  ;;  %3853 = vrot.lane.b32.xlu0 %v9554_v45, %s7925_s17 }
 0xce0   :  { %11042 = vst [vmem:[#allocation10_spill] sm:$0xff] %v9556_v1 }
 0xce2   :  { %v9560_v47 = vpop.permute.xlu0 %3557 }
 0xce3   :  { %v9562_v44 = vpop.permute.xlu1 %3565  ;;  %3851 = vrot.lane.b32.xlu1 %v9560_v47, %s7925_s17  ;;  %v3591_v50 = vcombine.low %v9560_v47, %v9556_v1  ;;  %v3592_v2 = vcombine.high %v9560_v47, %v9556_v1 }
 0xce4   :  { %11043 = vst [vmem:[#allocation8_spill] sm:$0xff] %v9562_v44  ;;  %3857 = vrot.lane.b32.xlu0 %v9562_v44, %s7925_s17  ;;  %v3643_v34 = vcombine.low %v9530_v32, %v9562_v44  ;;  %v3644_v62 = vcombine.high %v9530_v32, %v9562_v44 }
 0xce5   :  { %v3599_v29 = vrot.slane %v3591_v50, %v11031_v30  ;;  %v3606_v57 = vrot.slane %v3592_v2, %v11031_v30 }
 0xce6   :  { %v9572_v13 = vpop.permute.xlu0 %3563  ;;  %v3651_v22 = vrot.slane %v3643_v34, %v11031_v30  ;;  %v3658_v10 = vrot.slane %v3644_v62, %v11031_v30 }
 0xce7   :  { %11044 = vst [vmem:[#allocation5_spill] sm:$0xff] %v9572_v13  ;;  %v3575_v31 = vcombine.low %v9533_v33, %v9572_v13  ;;  %v3576_v60 = vcombine.high %v9533_v33, %v9572_v13  ;;  %3855 = vrot.lane.b32.xlu1 %v9572_v13, %s7925_s17 }
 0xce9   :  { %v3583_v21 = vrot.slane %v3575_v31, %v11031_v30  ;;  %v3590_v43 = vrot.slane %v3576_v60, %v11031_v30 }
 0xcea   :  { %v9588_v0 = vpop.permute.xlu0 %3571 }
 0xceb   :  { %11045 = vst [vmem:[#allocation7_spill] sm:$0xff] %v9588_v0  ;;  %v3607_v39 = vcombine.low %v3583_v21, %v3599_v29  ;;  %v3608_v20 = vcombine.high %v3583_v21, %v3599_v29  ;;  %v3623_v40 = vcombine.low %v3590_v43, %v3606_v57  ;;  %v3624_v4 = vcombine.high %v3590_v43, %v3606_v57 }
 0xcec   :  { %3859 = vrot.lane.b32.xlu1 %v9556_v1, %s7925_s17  ;;  %v3659_v63 = vcombine.low %v9554_v45, %v9588_v0  ;;  %v3660_v55 = vcombine.high %v9554_v45, %v9588_v0  ;;  %3861 = vrot.lane.b32.xlu0 %v9588_v0, %s7925_s17 }
 0xced   :  { %v3615_v51 = vrot.slane %v3607_v39, %v11032_v9  ;;  %v3622_v38 = vrot.slane %v3608_v20, %v11032_v9  ;;  %v3631_v54 = vrot.slane %v3623_v40, %v11032_v9  ;;  %v3638_v52 = vrot.slane %v3624_v4, %v11032_v9 }
 0xcee   :  { %v3667_v49 = vrot.slane %v3659_v63, %v11031_v30  ;;  %v3674_v46 = vrot.slane %v3660_v55, %v11031_v30 }
 0xcef   :  { %v3711_v8 = vcombine.low %v3615_v51, %v3622_v38  ;;  %v6990_v3 = vcombine.high %v3615_v51, %v3622_v38  ;;  %v3727_v59 = vcombine.low %v3631_v54, %v3638_v52  ;;  %v6991_v61 = vcombine.high %v3631_v54, %v3638_v52 }
 0xcf0   :  { %v3675_v7 = vcombine.low %v3651_v22, %v3667_v49  ;;  %v3676_v23 = vcombine.high %v3651_v22, %v3667_v49  ;;  %v3691_v48 = vcombine.low %v3658_v10, %v3674_v46  ;;  %v3692_v14 = vcombine.high %v3658_v10, %v3674_v46 }
 0xcf1   :  { %v3718_v28 = vrot.slane %v3711_v8, %v11031_v30  ;;  %v3726_v56 = vrot.slane %v6990_v3, %v11031_v30  ;;  %v3734_v41 = vrot.slane %v3727_v59, %v11031_v30  ;;  %v3742_v58 = vrot.slane %v6991_v61, %v11031_v30  ;;  %v3850_v59 = vpop.permute.xlu0 %3849  ;;  %v3848_v61 = vpop.permute.xlu1 %3847 }
 0xcf2   :  { %v3683_v35 = vrot.slane %v3675_v7, %v11032_v9  ;;  %v3690_v42 = vrot.slane %v3676_v23, %v11032_v9  ;;  %v3699_v12 = vrot.slane %v3691_v48, %v11032_v9  ;;  %v3706_v18 = vrot.slane %v3692_v14, %v11032_v9 }
 0xcf3   :  { %v3743_v27 = vcombine.low %v3718_v28, %v3726_v56  ;;  %v3759_v16 = vcombine.low %v3734_v41, %v3742_v58  ;;  %v3744_v62 = vcombine.high %v3718_v28, %v3726_v56  ;;  %v3760_v39 = vcombine.high %v3734_v41, %v3742_v58 }
 0xcf4   :  { %v3779_v19 = vcombine.low %v3683_v35, %v3690_v42  ;;  %v6992_v24 = vcombine.high %v3683_v35, %v3690_v42  ;;  %v3795_v53 = vcombine.low %v3699_v12, %v3706_v18  ;;  %v6993_v25 = vcombine.high %v3699_v12, %v3706_v18 }
 0xcf5   :  { %v3751_v50 = vrot.slane %v3743_v27, %v11032_v9  ;;  %v3767_v2 = vrot.slane %v3759_v16, %v11032_v9  ;;  %v3758_v38 = vrot.slane %v3744_v62, %v11032_v9  ;;  %v3774_v54 = vrot.slane %v3760_v39, %v11032_v9 }
 0xcf6   :  { %v3786_v31 = vrot.slane %v3779_v19, %v11031_v30  ;;  %v3794_v60 = vrot.slane %v6992_v24, %v11031_v30  ;;  %v3802_v29 = vrot.slane %v3795_v53, %v11031_v30  ;;  %v3810_v57 = vrot.slane %v6993_v25, %v11031_v30 }
 0xcf7   :  { %v3775_v21 = vcombine.low %v3751_v50, %v3767_v2  ;;  %v3776_v51 = vcombine.high %v3751_v50, %v3767_v2  ;;  %v9635_v49 = vcombine.low %v3758_v38, %v3774_v54  ;;  %v9643_v8 = vcombine.high %v3758_v38, %v3774_v54 }
 0xcf8   :  { %v3811_v43 = vcombine.low %v3786_v31, %v3794_v60  ;;  %v3827_v34 = vcombine.low %v3802_v29, %v3810_v57  ;;  %v3812_v63 = vcombine.high %v3786_v31, %v3794_v60  ;;  %v3828_v55 = vcombine.high %v3802_v29, %v3810_v57 }
 0xcf9   :  { %7342 = vmatprep.mubr.msk.f32.mxu1 %vm1036_vm1, %v3775_v21  ;;  %7358 = vmatprep.mubr.msk.f32.mxu0 %vm1036_vm1, %v3775_v21 }
 0xcfa   :  { %v3819_v20 = vrot.slane %v3811_v43, %v11032_v9  ;;  %v3835_v40 = vrot.slane %v3827_v34, %v11032_v9  ;;  %v3826_v22 = vrot.slane %v3812_v63, %v11032_v9  ;;  %v3842_v10 = vrot.slane %v3828_v55, %v11032_v9 }
 0xcfc   :  { %v9624_v4 = vcombine.low %v3819_v20, %v3835_v40  ;;  %v9631_v52 = vcombine.high %v3819_v20, %v3835_v40  ;;  %v9641_v46 = vcombine.low %v3826_v22, %v3842_v10  ;;  %v9649_v3 = vcombine.high %v3826_v22, %v3842_v10 }
 0xcfe   :  { %7343 = vmatmul.mubr.msk.f32.vlgmr.msra.gmra.mrb[16].mxu1 %vm1036_vm1, %v9624_v4 }
 0xcff   :  { %7345 = vmatprep.mubr.msk.f32.mxu1 %vm1036_vm1, %v3776_v51 }
 0xd02   :  { %7346 = vmatmul.mubr.msk.f32.gmra.mrb[18].mxu1 %vm1036_vm1, %v9631_v52 }
 0xd03   :  { %7348 = vmatprep.mubr.msk.f32.mxu1 %vm1036_vm1, %v9635_v49 }
 0xd06   :  { %7349 = vmatmul.mubr.msk.f32.gmra.mrb[20].mxu1 %vm1036_vm1, %v9641_v46 }
 0xd07   :  { %7351 = vmatprep.mubr.msk.f32.mxu1 %vm1036_vm1, %v9643_v8 }
 0xd0a   :  { %7352 = vmatmul.mubr.msk.f32.gmra.mrb[22].mxu1 %vm1036_vm1, %v9649_v3 }
 0xd0b   :  { %7365 = vmatprep.mubr.msk.f32.mxu1 %vm1036_vm1, %v3776_v51 }
 0xd51   :  { %v3854_v7 = vpop.permute.xlu0 %3853 }
 0xd55   :  { %v3852_v23 = vpop.permute.xlu1 %3851 }
 0xd56   :  { %v3858_v14 = vpop.permute.xlu0 %3857 }
 0xd57   :  { %v3939_v41 = vcombine.low %v3850_v59, %v3858_v14  ;;  %v3940_v58 = vcombine.high %v3850_v59, %v3858_v14 }
 0xd59   :  { %v3856_v48 = vpop.permute.xlu1 %3855  ;;  %v3947_v50 = vrot.slane %v3939_v41, %v11031_v30  ;;  %v3954_v2 = vrot.slane %v3940_v58, %v11031_v30 }
 0xd5a   :  { %v3871_v28 = vcombine.low %v3848_v61, %v3856_v48  ;;  %v3872_v56 = vcombine.high %v3848_v61, %v3856_v48 }
 0xd5c   :  { %v3879_v19 = vrot.slane %v3871_v28, %v11031_v30  ;;  %v3886_v24 = vrot.slane %v3872_v56, %v11031_v30 }
 0xd5e   :  { %v3860_v35 = vpop.permute.xlu1 %3859  ;;  %v3862_v18 = vpop.permute.xlu0 %3861 }
 0xd5f   :  { %v3887_v42 = vcombine.low %v3852_v23, %v3860_v35  ;;  %v3888_v12 = vcombine.high %v3852_v23, %v3860_v35  ;;  %v3955_v27 = vcombine.low %v3854_v7, %v3862_v18  ;;  %v3956_v16 = vcombine.high %v3854_v7, %v3862_v18 }
 0xd61   :  { %v3895_v53 = vrot.slane %v3887_v42, %v11031_v30  ;;  %v3902_v25 = vrot.slane %v3888_v12, %v11031_v30  ;;  %v3963_v31 = vrot.slane %v3955_v27, %v11031_v30  ;;  %v3970_v60 = vrot.slane %v3956_v16, %v11031_v30 }
 0xd63   :  { %v3903_v29 = vcombine.low %v3879_v19, %v3895_v53  ;;  %v3904_v57 = vcombine.high %v3879_v19, %v3895_v53  ;;  %v3919_v21 = vcombine.low %v3886_v24, %v3902_v25  ;;  %v3920_v43 = vcombine.high %v3886_v24, %v3902_v25 }
 0xd64   :  { %v3971_v34 = vcombine.low %v3947_v50, %v3963_v31  ;;  %v3972_v62 = vcombine.high %v3947_v50, %v3963_v31  ;;  %v3987_v39 = vcombine.low %v3954_v2, %v3970_v60  ;;  %v3988_v20 = vcombine.high %v3954_v2, %v3970_v60 }
 0xd65   :  { %v3911_v40 = vrot.slane %v3903_v29, %v11032_v9  ;;  %v3918_v63 = vrot.slane %v3904_v57, %v11032_v9  ;;  %v3927_v55 = vrot.slane %v3919_v21, %v11032_v9  ;;  %v3934_v51 = vrot.slane %v3920_v43, %v11032_v9 }
 0xd66   :  { %v3979_v38 = vrot.slane %v3971_v34, %v11032_v9  ;;  %v3986_v54 = vrot.slane %v3972_v62, %v11032_v9  ;;  %v3995_v22 = vrot.slane %v3987_v39, %v11032_v9  ;;  %v4002_v10 = vrot.slane %v3988_v20, %v11032_v9 }
 0xd67   :  { %v4007_v59 = vcombine.low %v3911_v40, %v3918_v63  ;;  %v6994_v61 = vcombine.high %v3911_v40, %v3918_v63  ;;  %v4023_v7 = vcombine.low %v3927_v55, %v3934_v51  ;;  %v6995_v23 = vcombine.high %v3927_v55, %v3934_v51 }
 0xd68   :  { %v4075_v48 = vcombine.low %v3979_v38, %v3986_v54  ;;  %v6996_v14 = vcombine.high %v3979_v38, %v3986_v54  ;;  %v4091_v28 = vcombine.low %v3995_v22, %v4002_v10  ;;  %v6997_v56 = vcombine.high %v3995_v22, %v4002_v10 }
 0xd69   :  { %v4014_v41 = vrot.slane %v4007_v59, %v11031_v30  ;;  %v4022_v58 = vrot.slane %v6994_v61, %v11031_v30  ;;  %v4030_v35 = vrot.slane %v4023_v7, %v11031_v30  ;;  %v4038_v42 = vrot.slane %v6995_v23, %v11031_v30 }
 0xd6a   :  { %v4082_v12 = vrot.slane %v4075_v48, %v11031_v30  ;;  %v4090_v18 = vrot.slane %v6996_v14, %v11031_v30  ;;  %v4098_v27 = vrot.slane %v4091_v28, %v11031_v30  ;;  %v4106_v16 = vrot.slane %v6997_v56, %v11031_v30 }
 0xd6b   :  { %v4039_v19 = vcombine.low %v4014_v41, %v4022_v58  ;;  %v4055_v24 = vcombine.low %v4030_v35, %v4038_v42  ;;  %v4040_v53 = vcombine.high %v4014_v41, %v4022_v58  ;;  %v4056_v25 = vcombine.high %v4030_v35, %v4038_v42 }
 0xd6c   :  { %v4107_v50 = vcombine.low %v4082_v12, %v4090_v18  ;;  %v4123_v2 = vcombine.low %v4098_v27, %v4106_v16  ;;  %v4108_v31 = vcombine.high %v4082_v12, %v4090_v18  ;;  %v4124_v60 = vcombine.high %v4098_v27, %v4106_v16 }
 0xd6d   :  { %v4047_v29 = vrot.slane %v4039_v19, %v11032_v9  ;;  %v4063_v57 = vrot.slane %v4055_v24, %v11032_v9  ;;  %v4054_v21 = vrot.slane %v4040_v53, %v11032_v9  ;;  %v4070_v43 = vrot.slane %v4056_v25, %v11032_v9 }
 0xd6e   :  { %v4115_v34 = vrot.slane %v4107_v50, %v11032_v9  ;;  %v4131_v62 = vrot.slane %v4123_v2, %v11032_v9  ;;  %v4122_v39 = vrot.slane %v4108_v31, %v11032_v9  ;;  %v4138_v20 = vrot.slane %v4124_v60, %v11032_v9 }
 0xd6f   :  { %v4071_v40 = vcombine.low %v4047_v29, %v4063_v57  ;;  %v4072_v63 = vcombine.high %v4047_v29, %v4063_v57  ;;  %v4073_v55 = vcombine.low %v4054_v21, %v4070_v43  ;;  %v4074_v51 = vcombine.high %v4054_v21, %v4070_v43 }
 0xd70   :  { %v4139_v38 = vcombine.low %v4115_v34, %v4131_v62  ;;  %v4140_v54 = vcombine.high %v4115_v34, %v4131_v62  ;;  %v4141_v22 = vcombine.low %v4122_v39, %v4138_v20  ;;  %v4142_v10 = vcombine.high %v4122_v39, %v4138_v20 }
 0xd71   :  { %v11047_v28 = vmov 2   ;;  %v11048_v56 = vmov 3   ;;  %v11049_v41 = vmov 4   ;;  %v11051_v42 = vmov 0  }
 0xd72   :  { %v7539_v59 = vpack.c.bf16 %v4139_v38, %v4071_v40  ;;  %v7545_v61 = vpack.c.bf16 %v4140_v54, %v4072_v63  ;;  %v7551_v23 = vpack.c.bf16 %v4141_v22, %v4073_v55  ;;  %v7557_v48 = vpack.c.bf16 %v4142_v10, %v4074_v51  ;;  %v9864_v54 = vld [vmem:[%s10896_s2] sm:$0xff] }
 0xd73   :  { %v11052_v12 = vmov 6   ;;  %v11053_v18 = vmov 7   ;;  %v11054_v27 = vmov 8   ;;  %v11055_v16 = vmov 1  }
 0xd74   :  { %7541 = vmatprep.subr.msk.bf16.mxu0 %vm8200_vm2, %v7539_v59  ;;  %7547 = vmatprep.subr.msk.bf16.mxu1 %vm8200_vm2, %v7545_v61 }
 0xd75   :  { %7544 = vmatpush3.bf16.xpose.msk.msra.mxu0 %vm8200_vm2, %v7539_v59  ;;  %7550 = vmatpush3.bf16.xpose.msk.msra.mxu1 %vm8200_vm2, %v7545_v61  ;;  %v9870_v61 = vld [vmem:[%s10896_s2 + $0x10] sm:$0xff] }
 0xd76   :  { %7553 = vmatprep.subr.msk.bf16.mxu0 %vm8200_vm2, %v7551_v23  ;;  %7559 = vmatprep.subr.msk.bf16.mxu1 %vm8200_vm2, %v7557_v48 }
 0xd7c   :  { %7359 = vmatmul.mubr.msk.f32.vlgmr.msra.gmra.mrb[18].mxu0 %vm1036_vm1, %v9624_v4  ;;  %7366 = vmatmul.mubr.msk.f32.vlgmr.msra.gmra.mrb[24].mxu1 %vm1036_vm1, %v9631_v52 }
 0xd7d   :  { %7556 = vmatpush3.bf16.xpose.msk.msra.mxu0 %vm8200_vm2, %v7551_v23  ;;  %7372 = vmatprep.mubr.msk.f32.mxu0 %vm1036_vm1, %v9635_v49 }
 0xd7e   :  { %7562 = vmatpush3.bf16.xpose.msk.msra.mxu1 %vm8200_vm2, %v7557_v48  ;;  %7379 = vmatprep.mubr.msk.f32.mxu1 %vm1036_vm1, %v9643_v8  ;;  %v9877_v48 = vld [vmem:[%s10896_s2 + $0x20] sm:$0xff] }
 0xd84   :  { %7373 = vmatmul.mubr.msk.f32.vlgmr.msra.gmra.mrb[20].mxu0 %vm1036_vm1, %v9641_v46 }
 0xd85   :  { %7380 = vmatmul.mubr.msk.f32.vlgmr.msra.gmra.mrb[26].mxu1 %vm1036_vm1, %v9649_v3  ;;  %v11050_v3 = vmov 5  }
 0xdd1   :  { %v7344_v4 = vpop.f32.mrb[16].mxu1 }
 0xdd2   :  { %4947 = vperm.xlu1 %7701, %v7344_v4   ;;  %v4531_v52 = vpop.f32.mrb[17].mxu1  ;;  %4577 = vperm.xlu0 %7700, %v7344_v4  }
 0xdd5   :  { %v9714_v14 = vpop.f32.mrb[18].mxu1 }
 0xdd6   :  { %7702 = vset.pattern.permute.xlu1 %v11047_v28  ;;  %v9717_v49 = vpop.f32.mrb[19].mxu1  ;;  %7703 = vset.pattern.permute.xlu0 %v11048_v56 }
 0xdd7   :  { %4995 = vperm.xlu1 %7702, %v7344_v4   ;;  %5043 = vperm.xlu0 %7703, %v7344_v4  }
 0xdd9   :  { %v9720_v8 = vpop.f32.mrb[20].mxu1 }
 0xdda   :  { %v9722_v46 = vpop.f32.mrb[21].mxu1 }
 0xddb   :  { %7704 = vset.pattern.permute.xlu1 %v11049_v41  ;;  %7714 = vset.pattern.permute.xlu0 %v11050_v3 }
 0xddc   :  { %5091 = vperm.xlu1 %7704, %v7344_v4   ;;  %5135 = vperm.xlu0 %7714, %v4531_v52  }
 0xddd   :  { %v9726_v58 = vpop.f32.mrb[22].mxu1 }
 0xdde   :  { %v9728_v35 = vpop.f32.mrb[23].mxu1 }
 0xde0   :  { %7705 = vset.pattern.permute.xlu1 %v11050_v3  ;;  %7718 = vset.pattern.permute.xlu0 %v11051_v42 }
 0xde1   :  { %5139 = vperm.xlu1 %7705, %v7344_v4   ;;  %4587 = vperm.xlu0 %7718, %v9714_v14  }
 0xde5   :  { %7706 = vset.pattern.permute.xlu1 %v11052_v12  ;;  %7721 = vset.pattern.permute.xlu0 %v11048_v56 }
 0xde6   :  { %5187 = vperm.xlu1 %7706, %v7344_v4   ;;  %5051 = vperm.xlu0 %7721, %v9714_v14  }
 0xdea   :  { %7707 = vset.pattern.permute.xlu1 %v11053_v18  ;;  %7722 = vset.pattern.permute.xlu0 %v11049_v41 }
 0xdeb   :  { %5235 = vperm.xlu1 %7707, %v7344_v4   ;;  %5099 = vperm.xlu0 %7722, %v9714_v14  }
 0xdef   :  { %7708 = vset.pattern.permute.xlu1 %v11054_v27  ;;  %7723 = vset.pattern.permute.xlu0 %v11050_v3 }
 0xdf0   :  { %5283 = vperm.xlu1 %7708, %v7344_v4   ;;  %5147 = vperm.xlu0 %7723, %v9714_v14  }
 0xdf4   :  { %7709 = vset.pattern.permute.xlu1 %v11051_v42  ;;  %7724 = vset.pattern.permute.xlu0 %v11052_v12 }
 0xdf5   :  { %4572 = vperm.xlu1 %7709, %v4531_v52   ;;  %5195 = vperm.xlu0 %7724, %v9714_v14  }
 0xdf9   :  { %7710 = vset.pattern.permute.xlu1 %v11055_v16  ;;  %7726 = vset.pattern.permute.xlu0 %v11054_v27 }
 0xdfa   :  { %4943 = vperm.xlu1 %7710, %v4531_v52   ;;  %5291 = vperm.xlu0 %7726, %v9714_v14  }
 0xdfe   :  { %7711 = vset.pattern.permute.xlu1 %v11047_v28  ;;  %7727 = vset.pattern.permute.xlu0 %v11051_v42 }
 0xdff   :  { %4991 = vperm.xlu1 %7711, %v4531_v52   ;;  %4582 = vperm.xlu0 %7727, %v9717_v49  }
 0xe03   :  { %7712 = vset.pattern.permute.xlu1 %v11048_v56  ;;  %7728 = vset.pattern.permute.xlu0 %v11055_v16 }
 0xe04   :  { %5039 = vperm.xlu1 %7712, %v4531_v52   ;;  %4951 = vperm.xlu0 %7728, %v9717_v49  }
 0xe08   :  { %7713 = vset.pattern.permute.xlu1 %v11049_v41  ;;  %7729 = vset.pattern.permute.xlu0 %v11047_v28 }
 0xe09   :  { %5087 = vperm.xlu1 %7713, %v4531_v52   ;;  %4999 = vperm.xlu0 %7729, %v9717_v49  }
 0xe0d   :  { %7715 = vset.pattern.permute.xlu1 %v11052_v12  ;;  %5011 = vperm.xlu0 %7729, %v9720_v8  }
 0xe0e   :  { %5183 = vperm.xlu1 %7715, %v4531_v52  }
 0xe11   :  { %7738 = vset.pattern.permute.xlu0 %v11048_v56 }
 0xe12   :  { %7716 = vset.pattern.permute.xlu1 %v11053_v18  ;;  %5059 = vperm.xlu0 %7738, %v9720_v8  }
 0xe13   :  { %5231 = vperm.xlu1 %7716, %v4531_v52  }
 0xe16   :  { %7739 = vset.pattern.permute.xlu0 %v11049_v41 }
 0xe17   :  { %7717 = vset.pattern.permute.xlu1 %v11054_v27  ;;  %5107 = vperm.xlu0 %7739, %v9720_v8  }
 0xe18   :  { %5279 = vperm.xlu1 %7717, %v4531_v52  }
 0xe1b   :  { %7741 = vset.pattern.permute.xlu0 %v11052_v12 }
 0xe1c   :  { %7719 = vset.pattern.permute.xlu1 %v11055_v16  ;;  %5203 = vperm.xlu0 %7741, %v9720_v8  }
 0xe1d   :  { %4955 = vperm.xlu1 %7719, %v9714_v14  }
 0xe20   :  { %7742 = vset.pattern.permute.xlu0 %v11053_v18 }
 0xe21   :  { %7720 = vset.pattern.permute.xlu1 %v11047_v28  ;;  %5251 = vperm.xlu0 %7742, %v9720_v8  }
 0xe22   :  { %5003 = vperm.xlu1 %7720, %v9714_v14  }
 0xe25   :  { %7744 = vset.pattern.permute.xlu0 %v11055_v16 }
 0xe26   :  { %7725 = vset.pattern.permute.xlu1 %v11053_v18  ;;  %4959 = vperm.xlu0 %7744, %v9722_v46  }
 0xe27   :  { %5243 = vperm.xlu1 %7725, %v9714_v14   ;;  %v9884_v14 = vld [vmem:[%s10896_s2 + $0x30] sm:$0xff] }
 0xe2a   :  { %7749 = vset.pattern.permute.xlu0 %v11052_v12 }
 0xe2b   :  { %7730 = vset.pattern.permute.xlu1 %v11048_v56  ;;  %5199 = vperm.xlu0 %7749, %v9722_v46  }
 0xe2c   :  { %5047 = vperm.xlu1 %7730, %v9717_v49  }
 0xe2f   :  { %7752 = vset.pattern.permute.xlu0 %v11051_v42 }
 0xe30   :  { %7731 = vset.pattern.permute.xlu1 %v11049_v41  ;;  %4607 = vperm.xlu0 %7752, %v9726_v58  }
 0xe31   :  { %5095 = vperm.xlu1 %7731, %v9717_v49  }
 0xe34   :  { %7757 = vset.pattern.permute.xlu0 %v11050_v3 }
 0xe35   :  { %7732 = vset.pattern.permute.xlu1 %v11050_v3  ;;  %5163 = vperm.xlu0 %7757, %v9726_v58  }
 0xe36   :  { %5143 = vperm.xlu1 %7732, %v9717_v49  }
 0xe39   :  { %7762 = vset.pattern.permute.xlu0 %v11047_v28 }
 0xe3a   :  { %7733 = vset.pattern.permute.xlu1 %v11052_v12  ;;  %5015 = vperm.xlu0 %7762, %v9728_v35  }
 0xe3b   :  { %5191 = vperm.xlu1 %7733, %v9717_v49  }
 0xe3e   :  { %7763 = vset.pattern.permute.xlu0 %v11048_v56 }
 0xe3f   :  { %7734 = vset.pattern.permute.xlu1 %v11053_v18  ;;  %5063 = vperm.xlu0 %7763, %v9728_v35  }
 0xe40   :  { %5239 = vperm.xlu1 %7734, %v9717_v49  }
 0xe43   :  { %7764 = vset.pattern.permute.xlu0 %v11049_v41 }
 0xe44   :  { %7735 = vset.pattern.permute.xlu1 %v11054_v27  ;;  %5111 = vperm.xlu0 %7764, %v9728_v35  }
 0xe45   :  { %5287 = vperm.xlu1 %7735, %v9717_v49  }
 0xe48   :  { %7765 = vset.pattern.permute.xlu0 %v11050_v3 }
 0xe49   :  { %7736 = vset.pattern.permute.xlu1 %v11051_v42  ;;  %5159 = vperm.xlu0 %7765, %v9728_v35  }
 0xe4a   :  { %4597 = vperm.xlu1 %7736, %v9720_v8  }
 0xe4d   :  { %7768 = vset.pattern.permute.xlu0 %v11054_v27 }
 0xe4e   :  { %7737 = vset.pattern.permute.xlu1 %v11055_v16  ;;  %5303 = vperm.xlu0 %7768, %v9728_v35  }
 0xe4f   :  { %v9808_v19 = vpop.f32.mrb[18].mxu0  ;;  %v9810_v24 = vpop.f32.mrb[24].mxu1  ;;  %4963 = vperm.xlu1 %7737, %v9720_v8  }
 0xe50   :  { %v4690_v53 = vpop.f32.mrb[19].mxu0  ;;  %v9813_v25 = vpop.f32.mrb[25].mxu1 }
 0xe51   :  { %v9815_v50 = vpop.permute.xlu1 %4947  ;;  %v9850_v20 = vpop.permute.xlu0 %4577 }
 0xe53   :  { %7740 = vset.pattern.permute.xlu1 %v11050_v3 }
 0xe54   :  { %5155 = vperm.xlu1 %7740, %v9720_v8  }
 0xe56   :  { %v9819_v2 = vpop.permute.xlu1 %4995  ;;  %v9855_v63 = vpop.permute.xlu0 %5043 }
 0xe57   :  { %v9821_v31 = vpop.f32.mrb[20].mxu0 }
 0xe58   :  { %v9823_v60 = vpop.f32.mrb[26].mxu1  ;;  %v9825_v29 = vpop.f32.mrb[21].mxu0  ;;  %7743 = vset.pattern.permute.xlu1 %v11051_v42 }
 0xe59   :  { %v9827_v57 = vpop.f32.mrb[27].mxu1  ;;  %4592 = vperm.xlu1 %7743, %v9722_v46  }
 0xe5b   :  { %v9831_v21 = vpop.permute.xlu1 %5091  ;;  %v5136_v51 = vpop.permute.xlu0 %5135 }
 0xe5d   :  { %7745 = vset.pattern.permute.xlu1 %v11047_v28 }
 0xe5e   :  { %5007 = vperm.xlu1 %7745, %v9722_v46  }
 0xe60   :  { %v9835_v43 = vpop.permute.xlu1 %5139  ;;  %v4588_v59 = vpop.permute.xlu0 %4587 }
 0xe62   :  { %7746 = vset.pattern.permute.xlu1 %v11048_v56 }
 0xe63   :  { %5055 = vperm.xlu1 %7746, %v9722_v46  }
 0xe65   :  { %v9839_v34 = vpop.permute.xlu1 %5187 }
 0xe67   :  { %7747 = vset.pattern.permute.xlu1 %v11049_v41 }
 0xe68   :  { %5103 = vperm.xlu1 %7747, %v9722_v46  }
 0xe6a   :  { %v9843_v62 = vpop.permute.xlu1 %5235 }
 0xe6c   :  { %7748 = vset.pattern.permute.xlu1 %v11050_v3  ;;  %v9890_v3 = vld [vmem:[%s10896_s2 + $0x40] sm:$0xff] }
 0xe6d   :  { %5151 = vperm.xlu1 %7748, %v9722_v46  }
 0xe6f   :  { %v9847_v39 = vpop.permute.xlu1 %5283 }
 0xe71   :  { %7750 = vset.pattern.permute.xlu1 %v11053_v18 }
 0xe72   :  { %5247 = vperm.xlu1 %7750, %v9722_v46  }
 0xe74   :  { %v4573_v40 = vpop.permute.xlu1 %4572 }
 0xe75   :  { %v4610_v22 = vmul.f32 %v9864_v54, %v4573_v40 }
 0xe76   :  { %7751 = vset.pattern.permute.xlu1 %v11054_v27 }
 0xe77   :  { %5295 = vperm.xlu1 %7751, %v9722_v46   ;;  %v4691_v23 = vadd.f32 %v4690_v53, %v4610_v22  ;;  %v9899_v22 = vld [vmem:[%s10896_s2 + $0x50] sm:$0xff] }
 0xe79   :  { %v4944_v55 = vpop.permute.xlu1 %4943 }
 0xe7a   :  { %v4974_v7 = vmul.f32 %v9870_v61, %v4944_v55 }
 0xe7b   :  { %7753 = vset.pattern.permute.xlu1 %v11055_v16 }
 0xe7c   :  { %4971 = vperm.xlu1 %7753, %v9726_v58   ;;  %v4982_v52 = vadd.f32 %v4974_v7, %v4691_v23 }
 0xe7e   :  { %v4992_v38 = vpop.permute.xlu1 %4991 }
 0xe7f   :  { %v5022_v4 = vmul.f32 %v9877_v48, %v4992_v38 }
 0xe80   :  { %7754 = vset.pattern.permute.xlu1 %v11047_v28 }
 0xe81   :  { %5019 = vperm.xlu1 %7754, %v9726_v58   ;;  %v5030_v46 = vadd.f32 %v5022_v4, %v4982_v52 }
 0xe83   :  { %v5040_v10 = vpop.permute.xlu1 %5039 }
 0xe84   :  { %v5070_v28 = vmul.f32 %v9884_v14, %v5040_v10  ;;  %v5166_v10 = vmul.f32 %v9899_v22, %v5136_v51 }
 0xe85   :  { %7755 = vset.pattern.permute.xlu1 %v11048_v56  ;;  %v5052_v56 = vpop.permute.xlu0 %5051 }
 0xe86   :  { %5067 = vperm.xlu1 %7755, %v9726_v58   ;;  %v5078_v40 = vadd.f32 %v5070_v28, %v5030_v46  ;;  %v9912_v28 = vld [vmem:[%s10896_s2 + $0x70] sm:$0xff] }
 0xe88   :  { %v5088_v49 = vpop.permute.xlu1 %5087 }
 0xe89   :  { %v5118_v53 = vmul.f32 %v9890_v3, %v5088_v49  ;;  %v5100_v7 = vpop.permute.xlu0 %5099 }
 0xe8a   :  { %7756 = vset.pattern.permute.xlu1 %v11049_v41  ;;  %v9906_v41 = vld [vmem:[%s10896_s2 + $0x60] sm:$0xff] }
 0xe8b   :  { %5115 = vperm.xlu1 %7756, %v9726_v58   ;;  %v5126_v38 = vadd.f32 %v5118_v53, %v5078_v40 }
 0xe8d   :  { %v5184_v55 = vpop.permute.xlu1 %5183  ;;  %v5174_v23 = vadd.f32 %v5166_v10, %v5126_v38  ;;  %v5148_v51 = vpop.permute.xlu0 %5147 }
 0xe8e   :  { %v5214_v4 = vmul.f32 %v9906_v41, %v5184_v55  ;;  %v9920_v55 = vld [vmem:[%s10896_s2 + $0x80] sm:$0xff] }
 0xe8f   :  { %7758 = vset.pattern.permute.xlu1 %v11052_v12 }
 0xe90   :  { %5211 = vperm.xlu1 %7758, %v9726_v58   ;;  %v5222_v46 = vadd.f32 %v5214_v4, %v5174_v23 }
 0xe91   :  { %v5196_v4 = vpop.permute.xlu0 %5195 }
 0xe92   :  { %v5232_v52 = vpop.permute.xlu1 %5231 }
 0xe93   :  { %v5262_v49 = vmul.f32 %v9912_v28, %v5232_v52  ;;  %v9928_v52 = vld [vmem:[%s10896_s2 + $0x8] sm:$0xff] }
 0xe94   :  { %7759 = vset.pattern.permute.xlu1 %v11053_v18  ;;  %v4613_v23 = vmul.f32 %v9928_v52, %v4588_v59 }
 0xe95   :  { %5259 = vperm.xlu1 %7759, %v9726_v58   ;;  %v5270_v40 = vadd.f32 %v5262_v49, %v5222_v46  ;;  %v9934_v46 = vld [vmem:[%s10897_s1] sm:$0xff] }
 0xe97   :  { %v5280_v53 = vpop.permute.xlu1 %5279 }
 0xe98   :  { %v5310_v38 = vmul.f32 %v9920_v55, %v5280_v53 }
 0xe99   :  { %7760 = vset.pattern.permute.xlu1 %v11051_v42  ;;  %v9942_v42 = vld [vmem:[%s10896_s2 + $0x18] sm:$0xff] }
 0xe9a   :  { %v5318_v10 = vadd.f32 %v5310_v38, %v5270_v40  ;;  %4602 = vperm.xlu1 %7760, %v9728_v35   ;;  %v4777_v38 = vadd.f32 %v9810_v24, %v4613_v23  ;;  %v9967_v23 = vld [vmem:[%s10896_s2 + $0x48] sm:$0xff] }
 0xe9c   :  { %v4956_v49 = vpop.permute.xlu1 %4955  ;;  %v9937_v53 = vadd.f32 %v9934_v46, %v5318_v10  ;;  %v5292_v10 = vpop.permute.xlu0 %5291 }
 0xe9d   :  { %v4977_v40 = vmul.f32 %v9942_v42, %v4956_v49 }
 0xe9e   :  { %11056 = vst [vmem:[#allocation9_spill] sm:$0xff] %v9937_v53  ;;  %7761 = vset.pattern.permute.xlu1 %v11055_v16  ;;  %v5334_v59 = vsel %vm1930_vm3, %v9937_v53, -inf  ;;  %v9960_v16 = vld [vmem:[%s10896_s2 + $0x38] sm:$0xff] }
 0xe9f   :  { %4967 = vperm.xlu1 %7761, %v9728_v35   ;;  %5335 = vmax.xlane.f32.xlu0 %v5334_v59  ;;  %v4985_v15 = vadd.f32 %v4977_v40, %v4777_v38  ;;  %v5073_v59 = vmul.f32 %v9960_v16, %v5052_v56  ;;  %v5121_v40 = vmul.f32 %v9967_v23, %v5100_v7 }
 0xea0   :  { %v4583_v56 = vpop.permute.xlu0 %4582 }
 0xea1   :  { %v5004_v26 = vpop.permute.xlu1 %5003 }
 0xea2   :  { %v5025_v49 = vmul.f32 %v9953_v11, %v5004_v26 }
 0xea3   :  { %7766 = vset.pattern.permute.xlu1 %v11052_v12  ;;  %v9973_v12 = vld [vmem:[%s10896_s2 + $0x58] sm:$0xff] }
 0xea4   :  { %v5033_v24 = vadd.f32 %v5025_v49, %v4985_v15  ;;  %5207 = vperm.xlu1 %7766, %v9728_v35   ;;  %v5169_v36 = vmul.f32 %v9973_v12, %v5148_v51  ;;  %v9981_v49 = vld [vmem:[%s10896_s2 + $0x68] sm:$0xff]  ;;  %v9987_v51 = vld [vmem:[%s10896_s2 + $0x78] sm:$0xff] }
 0xea5   :  { %v5217_v7 = vmul.f32 %v9981_v49, %v5196_v4  ;;  %v4952_v4 = vpop.permute.xlu0 %4951 }
 0xea6   :  { %v5081_v26 = vadd.f32 %v5073_v59, %v5033_v24  ;;  %v5244_v38 = vpop.permute.xlu1 %5243 }
 0xea8   :  { %v5129_v15 = vadd.f32 %v5121_v40, %v5081_v26  ;;  %7767 = vset.pattern.permute.xlu1 %v11053_v18  ;;  %v5265_v40 = vmul.f32 %v9987_v51, %v5244_v38 }
 0xea9   :  { %5255 = vperm.xlu1 %7767, %v9728_v35   ;;  %v9994_v35 = vld [vmem:[%s10896_s2 + $0x88] sm:$0xff] }
 0xeaa   :  { %v5177_v59 = vadd.f32 %v5169_v36, %v5129_v15  ;;  %v5313_v18 = vmul.f32 %v9994_v35, %v5292_v10  ;;  %v4612_v10 = vmul.f32 %v9864_v54, %v4583_v56  ;;  %v5023_v56 = vmul.f32 %v9953_v11, %v9819_v2 }
 0xeab   :  { %v5048_v24 = vpop.permute.xlu1 %5047  ;;  %v5119_v2 = vmul.f32 %v9967_v23, %v9831_v21 }
 0xeac   :  { %v5225_v6 = vadd.f32 %v5217_v7, %v5177_v59  ;;  %v4611_v7 = vmul.f32 %v9928_v52, %v9850_v20  ;;  %v4976_v20 = vmul.f32 %v9870_v61, %v4952_v4  ;;  %v5072_v5 = vmul.f32 %v9884_v14, %v5048_v24 }
 0xead   :  { %7769 = vset.pattern.permute.xlu1 %v11054_v27  ;;  %v10004_v27 = vld [vmem:[%s10897_s1 + $0x8] sm:$0xff] }
 0xeae   :  { %v5273_v36 = vadd.f32 %v5265_v40, %v5225_v6  ;;  %5299 = vperm.xlu1 %7769, %v9720_v8   ;;  %v5000_v6 = vpop.permute.xlu0 %4999  ;;  %v4696_v59 = vadd.f32 %v9808_v19, %v4611_v7 }
 0xeb0   :  { %v5096_v26 = vpop.permute.xlu1 %5095  ;;  %v5321_v15 = vadd.f32 %v5313_v18, %v5273_v36  ;;  %v4772_v18 = vadd.f32 %v9813_v25, %v4612_v10  ;;  %v5024_v36 = vmul.f32 %v9877_v48, %v5000_v6  ;;  %v5071_v25 = vmul.f32 %v9960_v16, %v9855_v63 }
 0xeb1   :  { %v5120_v4 = vmul.f32 %v9890_v3, %v5096_v26  ;;  %v5167_v26 = vmul.f32 %v9973_v12, %v9835_v43  ;;  %v5215_v63 = vmul.f32 %v9981_v49, %v9839_v34 }
 0xeb2   :  { %5307 = vperm.xlu1 %7769, %v9726_v58   ;;  %v10007_v38 = vadd.f32 %v10004_v27, %v5321_v15  ;;  %v4975_v58 = vmul.f32 %v9942_v42, %v9815_v50  ;;  %v4984_v37 = vadd.f32 %v4976_v20, %v4772_v18 }
 0xeb4   :  { %11057 = vst [vmem:[#allocation12_spill] sm:$0xff] %v10007_v38  ;;  %v5343_v8 = vsel %vm1930_vm3, %v10007_v38, -inf  ;;  %v4983_v15 = vadd.f32 %v4975_v58, %v4696_v59  ;;  %v5032_v19 = vadd.f32 %v5024_v36, %v4984_v37  ;;  %v5263_v36 = vmul.f32 %v9987_v51, %v9843_v62 }
 0xeb5   :  { %v5144_v40 = vpop.permute.xlu1 %5143  ;;  %5344 = vmax.xlane.f32.xlu0 %v5343_v8 }
 0xeb6   :  { %v5031_v7 = vadd.f32 %v5023_v56, %v4983_v15  ;;  %v5080_v8 = vadd.f32 %v5072_v5, %v5032_v19  ;;  %v5168_v9 = vmul.f32 %v9899_v22, %v5144_v40  ;;  %v5311_v15 = vmul.f32 %v9994_v35, %v9847_v39 }
 0xeb8   :  { %v5128_v50 = vadd.f32 %v5120_v4, %v5080_v8  ;;  %v5079_v59 = vadd.f32 %v5071_v25, %v5031_v7 }
 0xeba   :  { %v5192_v17 = vpop.permute.xlu1 %5191  ;;  %v5176_v24 = vadd.f32 %v5168_v9, %v5128_v50  ;;  %v5127_v40 = vadd.f32 %v5119_v2, %v5079_v59  ;;  %v5012_v50 = vpop.permute.xlu0 %5011 }
 0xebb   :  { %v5216_v10 = vmul.f32 %v9906_v41, %v5192_v17 }
 0xebc   :  { %v5175_v18 = vadd.f32 %v5167_v26, %v5127_v40 }
 0xebd   :  { %v5224_v5 = vadd.f32 %v5216_v10, %v5176_v24 }
 0xebe   :  { %v5223_v9 = vadd.f32 %v5215_v63, %v5175_v18 }
 0xebf   :  { %v5240_v6 = vpop.permute.xlu1 %5239 }
 0xec0   :  { %v5264_v37 = vmul.f32 %v9912_v28, %v5240_v6  ;;  %v5271_v19 = vadd.f32 %v5263_v36, %v5223_v9  ;;  %v5060_v6 = vpop.permute.xlu0 %5059 }
 0xec1   :  { %v5075_v45 = vmul.f32 %v9960_v16, %v5060_v6 }
 0xec2   :  { %v5272_v58 = vadd.f32 %v5264_v37, %v5224_v5  ;;  %v5319_v4 = vadd.f32 %v5311_v15, %v5271_v19 }
 0xec4   :  { %v5288_v20 = vpop.permute.xlu1 %5287  ;;  %v10044_v8 = vadd.f32 %v10004_v27, %v5319_v4  ;;  %v5108_v24 = vpop.permute.xlu0 %5107 }
 0xec5   :  { %v5312_v17 = vmul.f32 %v9920_v55, %v5288_v20 }
 0xec6   :  { %11059 = vst [vmem:[#allocation18_spill] sm:$0xff] %v10044_v8  ;;  %v5337_v25 = vsel %vm1930_vm3, %v10044_v8, -inf }
 0xec7   :  { %v5320_v21 = vadd.f32 %v5312_v17, %v5272_v58 }
 0xec8   :  { %v10050_v26 = vpop.permute.xlu0 %5203 }
 0xec9   :  { %v4598_v56 = vpop.permute.xlu1 %4597  ;;  %v10039_v43 = vadd.f32 %v9934_v46, %v5320_v21 }
 0xeca   :  { %v4615_v19 = vmul.f32 %v9928_v52, %v4598_v56 }
 0xecb   :  { %11058 = vst [vmem:[#allocation13_spill] sm:$0xff] %v10039_v43  ;;  %v5340_v34 = vsel %vm1930_vm3, %v10039_v43, -inf  ;;  %v5027_v43 = vmul.f32 %v9953_v11, %v5012_v50 }
 0xecc   :  { %5341 = vmax.xlane.f32.xlu0 %v5340_v34  ;;  %v10054_v20 = vpop.permute.xlu0 %5251  ;;  %v4858_v30 = vadd.f32 %v9821_v31, %v4615_v19 }
 0xece   :  { %v4964_v7 = vpop.permute.xlu1 %4963 }
 0xecf   :  { %v4979_v4 = vmul.f32 %v9942_v42, %v4964_v7 }
 0xed0   :  { %v4960_v63 = vpop.permute.xlu0 %4959 }
 0xed1   :  { %v4987_v8 = vadd.f32 %v4979_v4, %v4858_v30  ;;  %v4978_v56 = vmul.f32 %v9870_v61, %v4960_v63 }
 0xed3   :  { %v10046_v62 = vpop.permute.xlu1 %5155  ;;  %v5035_v44 = vadd.f32 %v5027_v43, %v4987_v8 }
 0xed4   :  { %v5200_v17 = vpop.permute.xlu0 %5199 }
 0xed5   :  { %v5083_v32 = vadd.f32 %v5075_v45, %v5035_v44 }
 0xed6   :  { %5338 = vmax.xlane.f32.xlu1 %v5337_v25 }
 0xed8   :  { %v4593_v39 = vpop.permute.xlu1 %4592  ;;  %v4608_v21 = vpop.permute.xlu0 %4607 }
 0xed9   :  { %v4614_v38 = vmul.f32 %v9864_v54, %v4593_v39  ;;  %v4617_v31 = vmul.f32 %v9928_v52, %v4608_v21 }
 0xedb   :  { %v4853_v1 = vadd.f32 %v9825_v29, %v4614_v38  ;;  %v5123_v38 = vmul.f32 %v9967_v23, %v5108_v24 }
 0xedc   :  { %v5164_v15 = vpop.permute.xlu0 %5163 }
 0xedd   :  { %v5008_v10 = vpop.permute.xlu1 %5007  ;;  %v4986_v19 = vadd.f32 %v4978_v56, %v4853_v1  ;;  %v5131_v44 = vadd.f32 %v5123_v38, %v5083_v32 }
 0xede   :  { %v5026_v39 = vmul.f32 %v9877_v48, %v5008_v10 }
 0xee0   :  { %v5016_v25 = vpop.permute.xlu0 %5015  ;;  %v5034_v6 = vadd.f32 %v5026_v39, %v4986_v19 }
 0xee1   :  { %v5028_v45 = vmul.f32 %v9877_v48, %v5016_v25 }
 0xee2   :  { %v5056_v59 = vpop.permute.xlu1 %5055 }
 0xee3   :  { %v5074_v50 = vmul.f32 %v9884_v14, %v5056_v59 }
 0xee4   :  { %v5064_v53 = vpop.permute.xlu0 %5063 }
 0xee5   :  { %v5082_v63 = vadd.f32 %v5074_v50, %v5034_v6 }
 0xee7   :  { %v5104_v2 = vpop.permute.xlu1 %5103 }
 0xee8   :  { %v5112_v30 = vpop.permute.xlu0 %5111  ;;  %v5122_v1 = vmul.f32 %v9890_v3, %v5104_v2  ;;  %v5171_v2 = vmul.f32 %v9973_v12, %v10046_v62 }
 0xee9   :  { %v5124_v32 = vmul.f32 %v9890_v3, %v5112_v30 }
 0xeea   :  { %v5179_v39 = vadd.f32 %v5171_v2, %v5131_v44 }
 0xeec   :  { %v5152_v37 = vpop.permute.xlu1 %5151 }
 0xef1   :  { %v10052_v5 = vpop.permute.xlu1 %5247 }
 0xef6   :  { %v10056_v40 = vpop.permute.xlu1 %5295 }
 0xefb   :  { %v4972_v58 = vpop.permute.xlu1 %4971 }
 0xefc   :  { %v4981_v4 = vmul.f32 %v9942_v42, %v4972_v58  ;;  %v5170_v58 = vmul.f32 %v9899_v22, %v5152_v37 }
 0xf00   :  { %v5020_v18 = vpop.permute.xlu1 %5019 }
 0xf01   :  { %v5029_v10 = vmul.f32 %v9953_v11, %v5020_v18 }
 0xf05   :  { %v5068_v36 = vpop.permute.xlu1 %5067 }
 0xf06   :  { %v5077_v24 = vmul.f32 %v9960_v16, %v5068_v36 }
 0xf0a   :  { %v5116_v9 = vpop.permute.xlu1 %5115 }
 0xf0b   :  { %v5125_v25 = vmul.f32 %v9967_v23, %v5116_v9  ;;  %v5173_v9 = vmul.f32 %v9973_v12, %v5164_v15 }
 0xf0f   :  { %v10059_v34 = vpop.permute.xlu1 %5211 }
 0xf14   :  { %v10064_v0 = vpop.permute.xlu1 %5259 }
 0xf19   :  { %v4603_v13 = vpop.permute.xlu1 %4602 }
 0xf1a   :  { %v4616_v7 = vmul.f32 %v9864_v54, %v4603_v13  ;;  %v4939_v13 = vadd.f32 %v9823_v60, %v4617_v31  ;;  %v5160_v60 = vpop.permute.xlu0 %5159  ;;  %v5130_v31 = vadd.f32 %v5122_v1, %v5082_v63  ;;  %v5266_v1 = vmul.f32 %v9912_v28, %v10052_v5 }
 0xf1b   :  { %v5172_v36 = vmul.f32 %v9899_v22, %v5160_v60  ;;  %v5269_v5 = vmul.f32 %v9987_v51, %v10064_v0 }
 0xf1c   :  { %v4934_v43 = vadd.f32 %v9827_v57, %v4616_v7  ;;  %v4989_v21 = vadd.f32 %v4981_v4, %v4939_v13  ;;  %v5076_v57 = vmul.f32 %v9884_v14, %v5064_v53  ;;  %v5178_v37 = vadd.f32 %v5170_v58, %v5130_v31 }
 0xf1d   :  { %v5219_v53 = vmul.f32 %v9981_v49, %v10050_v26  ;;  %v5267_v26 = vmul.f32 %v9987_v51, %v10054_v20 }
 0xf1e   :  { %v4968_v29 = vpop.permute.xlu1 %4967  ;;  %v5037_v18 = vadd.f32 %v5029_v10, %v4989_v21  ;;  %v5304_v30 = vpop.permute.xlu0 %5303 }
 0xf1f   :  { %v4980_v8 = vmul.f32 %v9870_v61, %v4968_v29  ;;  %v5218_v29 = vmul.f32 %v9906_v41, %v5200_v17  ;;  %v5227_v13 = vadd.f32 %v5219_v53, %v5179_v39  ;;  %v5314_v17 = vmul.f32 %v9920_v55, %v10056_v40  ;;  %v11064_v53 = vld [vmem:[#allocation10_spill] sm:$0xff] }
 0xf20   :  { %v5085_v50 = vadd.f32 %v5077_v24, %v5037_v18  ;;  %v5316_v15 = vmul.f32 %v9920_v55, %v5304_v30  ;;  %v11067_v30 = vld [vmem:[#allocation18_spill] sm:$0xff] }
 0xf21   :  { %v4988_v59 = vadd.f32 %v4980_v8, %v4934_v43  ;;  %v5226_v6 = vadd.f32 %v5218_v29, %v5178_v37  ;;  %v5275_v24 = vadd.f32 %v5267_v26, %v5227_v13 }
 0xf22   :  { %v5133_v38 = vadd.f32 %v5125_v25, %v5085_v50 }
 0xf23   :  { %v5036_v56 = vadd.f32 %v5028_v45, %v4988_v59  ;;  %v5208_v7 = vpop.permute.xlu1 %5207  ;;  %v5221_v59 = vmul.f32 %v9981_v49, %v10059_v34  ;;  %v5274_v21 = vadd.f32 %v5266_v1, %v5226_v6 }
 0xf24   :  { %v5220_v8 = vmul.f32 %v9906_v41, %v5208_v7  ;;  %v5181_v44 = vadd.f32 %v5173_v9, %v5133_v38 }
 0xf25   :  { %v5084_v19 = vadd.f32 %v5076_v57, %v5036_v56  ;;  %v5322_v20 = vadd.f32 %v5314_v17, %v5274_v21 }
 0xf26   :  { %v5229_v7 = vadd.f32 %v5221_v59, %v5181_v44 }
 0xf27   :  { %v5132_v4 = vadd.f32 %v5124_v32, %v5084_v19  ;;  %v5330_v19 = vadd.f32 %v9934_v46, %v5322_v20 }
 0xf28   :  { %v5256_v62 = vpop.permute.xlu1 %5255  ;;  %v5277_v31 = vadd.f32 %v5269_v5, %v5229_v7 }
 0xf29   :  { %v5180_v43 = vadd.f32 %v5172_v36, %v5132_v4  ;;  %v5268_v45 = vmul.f32 %v9912_v28, %v5256_v62  ;;  %v5346_v37 = vsel %vm1930_vm3, %v5330_v19, -inf  ;;  %v11060_v36 = vld [vmem:[#allocation24_spill] sm:$0xff]  ;;  %v11065_v62 = vld [vmem:[#allocation9_spill] sm:$0xff] }
 0xf2a   :  { %v11063_v4 = vld [vmem:[#allocation8_spill] sm:$0xff] }
 0xf2b   :  { %v5228_v10 = vadd.f32 %v5220_v8, %v5180_v43  ;;  %v11066_v8 = vld [vmem:[#allocation13_spill] sm:$0xff] }
 0xf2c   :  { %v5336_v29 = vpop.xlane.xlu0 %5335 }
 0xf2d   :  { %v5276_v63 = vadd.f32 %v5268_v45, %v5228_v10  ;;  %v5300_v58 = vpop.permute.xlu1 %5299 }
 0xf2e   :  { %v5315_v57 = vmul.f32 %v9994_v35, %v5300_v58  ;;  %v11069_v58 = vld [vmem:[#allocation12_spill] sm:$0xff] }
 0xf2f   :  { %v5324_v56 = vadd.f32 %v5316_v15, %v5276_v63  ;;  %v11068_v63 = vld [vmem:[#allocation7_spill] sm:$0xff] }
 0xf30   :  { %v5323_v60 = vadd.f32 %v5315_v57, %v5275_v24 }
 0xf31   :  { %v5308_v40 = vpop.permute.xlu1 %5307  ;;  %v5332_v2 = vadd.f32 %v9934_v46, %v5324_v56  ;;  %v11061_v46 = vld [vmem:[#allocation6_spill] sm:$0xff] }
 0xf32   :  { %v5317_v34 = vmul.f32 %v9994_v35, %v5308_v40  ;;  %v5331_v18 = vadd.f32 %v10004_v27, %v5323_v60 }
 0xf33   :  { %v5352_v25 = vsel %vm1930_vm3, %v5332_v2, -inf }
 0xf34   :  { %v5325_v32 = vadd.f32 %v5317_v34, %v5277_v31  ;;  %5353 = vmax.xlane.f32.xlu0 %v5352_v25  ;;  %v5349_v0 = vsel %vm1930_vm3, %v5331_v18, -inf }
 0xf35   :  { %5350 = vmax.xlane.f32.xlu1 %v5349_v0 }
 0xf36   :  { %v5333_v39 = vadd.f32 %v10004_v27, %v5325_v32  ;;  %v11062_v27 = vld [vmem:[#allocation5_spill] sm:$0xff] }
 0xf38   :  { %v5355_v50 = vsel %vm1930_vm3, %v5333_v39, -inf }
 0xf39   :  { %5347 = vmax.xlane.f32.xlu1 %v5346_v37  ;;  %5356 = vmax.xlane.f32.xlu0 %v5355_v50 }
 0xf4a   :  { %4143 = vrot.lane.b32.xlu1 %v9533_v33, %s7937_s28  ;;  %v5345_v33 = vpop.xlane.xlu0 %5344 }
 0xf4b   :  { %v5361_v21 = vsub.f32 %v11069_v58, %v5345_v33 }
 0xf4d   :  { %v5372_v5 = vmul.f32 1.442695, %v5361_v21 }
 0xf4e   :  { %4147 = vrot.lane.b32.xlu1 %v9560_v47, %s7937_s28  ;;  %v5358_v47 = vsub.f32 %v11065_v62, %v5336_v29 }
 0xf4f   :  { %4145 = vrot.lane.b32.xlu0 %v11060_v36, %s7937_s28 }
 0xf50   :  { %v5366_v1 = vmul.f32 1.442695, %v5358_v47 }
 0xf52   :  { %4149 = vrot.lane.b32.xlu1 %v11061_v46, %s7937_s28 }
 0xf53   :  { %4151 = vrot.lane.b32.xlu0 %v11062_v27, %s7937_s28 }
 0xf56   :  { %4153 = vrot.lane.b32.xlu1 %v11063_v4, %s7937_s28 }
 0xf57   :  { %4155 = vrot.lane.b32.xlu0 %v11064_v53, %s7937_s28 }
 0xf59   :  { %v5342_v38 = vpop.xlane.xlu0 %5341 }
 0xf5a   :  { %v5360_v9 = vsub.f32 %v11066_v8, %v5342_v38 }
 0xf5c   :  { %v5370_v10 = vmul.f32 1.442695, %v5360_v9 }
 0xf63   :  { %v5339_v43 = vpop.xlane.xlu1 %5338 }
 0xf64   :  { %v5359_v13 = vsub.f32 %v11067_v30, %v5339_v43 }
 0xf66   :  { %v5368_v6 = vmul.f32 1.442695, %v5359_v13  ;;  %v11070_v13 = vld [vmem:[#allocation11_spill] sm:$0xff] }
 0xf68   :  { %7810 = vpow2.f32 %v5368_v6 }
 0xf69   :  { %7812 = vpow2.f32 %v5366_v1 }
 0xf6a   :  { %7814 = vpow2.f32 %v5370_v10 }
 0xf6b   :  { %7816 = vpow2.f32 %v5372_v5 }
 0xf72   :  { %v10134_v45 = vpop.eup %7810 }
 0xf73   :  { %v10136_v26 = vpop.eup %7812  ;;  %v5385_v17 = vsel %vm1930_vm3, %v10134_v45, 0.0 }
 0xf74   :  { %v10140_v44 = vpop.eup %7814  ;;  %v5382_v59 = vsel %vm1930_vm3, %v10136_v26, 0.0 }
 0xf75   :  { %v5388_v15 = vsel %vm1930_vm3, %v10140_v44, 0.0  ;;  %v10149_v24 = vpop.eup %7816 }
 0xf76   :  { %5386 = vadd.xlane.f32.xlu0 %v5385_v17  ;;  %v5391_v57 = vsel %vm1930_vm3, %v10149_v24, 0.0 }
 0xf7a   :  { %5383 = vadd.xlane.f32.xlu1 %v5382_v59  ;;  %5389 = vadd.xlane.f32.xlu0 %v5388_v15 }
 0xf8b   :  { %4157 = vrot.lane.b32.xlu1 %v11068_v63, %s7937_s28 }
 0xfaf   :  { %5392 = vadd.xlane.f32.xlu1 %v5391_v57  ;;  %v11071_v57 = vld [vmem:[#allocation14_spill] sm:$0xff] }
 0xfc1   :  { %v5354_v56 = vpop.xlane.xlu0 %5353 }
 0xfc2   :  { %v5351_v20 = vpop.xlane.xlu1 %5350  ;;  %v5364_v60 = vsub.f32 %v5332_v2, %v5354_v56 }
 0xfc3   :  { %v5363_v7 = vsub.f32 %v5331_v18, %v5351_v20 }
 0xfc4   :  { %v5378_v32 = vmul.f32 1.442695, %v5364_v60 }
 0xfc5   :  { %v5376_v40 = vmul.f32 1.442695, %v5363_v7 }
 0xfc6   :  { %v5348_v31 = vpop.xlane.xlu1 %5347  ;;  %v5357_v34 = vpop.xlane.xlu0 %5356 }
 0xfc7   :  { %7818 = vpow2.f32 %v5376_v40  ;;  %v5362_v25 = vsub.f32 %v5330_v19, %v5348_v31  ;;  %v5365_v37 = vsub.f32 %v5333_v39, %v5357_v34 }
 0xfc9   :  { %v5374_v0 = vmul.f32 1.442695, %v5362_v25  ;;  %v5380_v50 = vmul.f32 1.442695, %v5365_v37 }
 0xfca   :  { %v4146_v53 = vpop.permute.xlu0 %4145  ;;  %v4144_v29 = vpop.permute.xlu1 %4143 }
 0xfcb   :  { %7820 = vpow2.f32 %v5374_v0 }
 0xfcc   :  { %7822 = vpow2.f32 %v5378_v32 }
 0xfcd   :  { %7824 = vpow2.f32 %v5380_v50 }
 0xfce   :  { %v4152_v33 = vpop.permute.xlu0 %4151  ;;  %v4148_v38 = vpop.permute.xlu1 %4147 }
 0xfcf   :  { %v4167_v8 = vcombine.low %v4144_v29, %v4152_v33  ;;  %v4168_v9 = vcombine.high %v4144_v29, %v4152_v33 }
 0xfd1   :  { %v10153_v36 = vpop.eup %7818  ;;  %v4175_v10 = vrot.slane %v4167_v8, %v11070_v13  ;;  %v4182_v17 = vrot.slane %v4168_v9, %v11070_v13 }
 0xfd2   :  { %v5397_v46 = vsel %vm1930_vm3, %v10153_v36, 0.0  ;;  %v4156_v62 = vpop.permute.xlu0 %4155  ;;  %v4150_v30 = vpop.permute.xlu1 %4149 }
 0xfd3   :  { %5398 = vadd.xlane.f32.xlu1 %v5397_v46  ;;  %v4183_v47 = vcombine.low %v4148_v38, %v4156_v62  ;;  %v4184_v43 = vcombine.high %v4148_v38, %v4156_v62 }
 0xfd5   :  { %v10157_v18 = vpop.eup %7820  ;;  %v4191_v6 = vrot.slane %v4183_v47, %v11070_v13  ;;  %v4198_v1 = vrot.slane %v4184_v43, %v11070_v13 }
 0xfd6   :  { %v5394_v2 = vsel %vm1930_vm3, %v10157_v18, 0.0  ;;  %v10161_v27 = vpop.eup %7822  ;;  %v4154_v21 = vpop.permute.xlu1 %4153 }
 0xfd7   :  { %5395 = vadd.xlane.f32.xlu0 %v5394_v2  ;;  %v5400_v19 = vsel %vm1930_vm3, %v10161_v27, 0.0  ;;  %v10165_v39 = vpop.eup %7824  ;;  %v4199_v59 = vcombine.low %v4175_v10, %v4191_v6  ;;  %v4200_v15 = vcombine.high %v4175_v10, %v4191_v6  ;;  %v4215_v63 = vcombine.low %v4182_v17, %v4198_v1 }
 0xfd8   :  { %v5403_v4 = vsel %vm1930_vm3, %v10165_v39, 0.0  ;;  %v4216_v58 = vcombine.high %v4182_v17, %v4198_v1  ;;  %v4235_v31 = vcombine.low %v4146_v53, %v4154_v21  ;;  %v4236_v25 = vcombine.high %v4146_v53, %v4154_v21 }
 0xfd9   :  { %v4207_v56 = vrot.slane %v4199_v59, %v11071_v57  ;;  %v4214_v20 = vrot.slane %v4200_v15, %v11071_v57  ;;  %v4223_v7 = vrot.slane %v4215_v63, %v11071_v57 }
 0xfda   :  { %v4230_v60 = vrot.slane %v4216_v58, %v11071_v57  ;;  %v4250_v29 = vrot.slane %v4236_v25, %v11070_v13 }
 0xfdb   :  { %5401 = vadd.xlane.f32.xlu0 %v5400_v19  ;;  %v4303_v34 = vcombine.low %v4207_v56, %v4214_v20  ;;  %v6998_v32 = vcombine.high %v4207_v56, %v4214_v20  ;;  %v4243_v19 = vrot.slane %v4235_v31, %v11070_v13 }
 0xfdc   :  { %v4319_v0 = vcombine.low %v4223_v7, %v4230_v60  ;;  %v6999_v37 = vcombine.high %v4223_v7, %v4230_v60 }
 0xfdd   :  { %v4310_v62 = vrot.slane %v4303_v34, %v11070_v13  ;;  %v4318_v53 = vrot.slane %v6998_v32, %v11070_v13 }
 0xfde   :  { %v4326_v43 = vrot.slane %v4319_v0, %v11070_v13  ;;  %v4334_v8 = vrot.slane %v6999_v37, %v11070_v13 }
 0xfdf   :  { %5404 = vadd.xlane.f32.xlu0 %v5403_v4  ;;  %v4335_v56 = vcombine.low %v4310_v62, %v4318_v53  ;;  %v4336_v25 = vcombine.high %v4310_v62, %v4318_v53 }
 0xfe0   :  { %v4351_v31 = vcombine.low %v4326_v43, %v4334_v8  ;;  %v4352_v32 = vcombine.high %v4326_v43, %v4334_v8 }
 0xfe1   :  { %v4350_v62 = vrot.slane %v4336_v25, %v11071_v57 }
 0xfe2   :  { %v4366_v53 = vrot.slane %v4352_v32, %v11071_v57 }
 0xfe4   :  { %v4370_v25 = vcombine.high %v4350_v62, %v4366_v53 }
0x1003   :  { %v5387_v5 = vpop.xlane.xlu0 %5386 }
0x1004   :  { %7826 = vrcp.f32 %v5387_v5 }
0x1007   :  { %v5384_v40 = vpop.xlane.xlu1 %5383  ;;  %v5390_v20 = vpop.xlane.xlu0 %5389 }
0x1008   :  { %7828 = vrcp.f32 %v5384_v40 }
0x1009   :  { %7830 = vrcp.f32 %v5390_v20 }
0x100b   :  { %v4158_v50 = vpop.permute.xlu1 %4157 }
0x100c   :  { %v4251_v46 = vcombine.low %v4150_v30, %v4158_v50  ;;  %v4252_v2 = vcombine.high %v4150_v30, %v4158_v50 }
0x100e   :  { %v7827_v4 = vpop.eup %7826  ;;  %v4259_v33 = vrot.slane %v4251_v46, %v11070_v13  ;;  %v4266_v38 = vrot.slane %v4252_v2, %v11070_v13 }
0x100f   :  { %v10183_v47 = vmul.f32 %v7827_v4, %v10134_v45  ;;  %v4359_v4 = vrot.slane %v4351_v31, %v11071_v57 }
0x1010   :  { %v4267_v9 = vcombine.low %v4243_v19, %v4259_v33  ;;  %v4268_v30 = vcombine.high %v4243_v19, %v4259_v33  ;;  %v4283_v6 = vcombine.low %v4250_v29, %v4266_v38  ;;  %v4284_v1 = vcombine.high %v4250_v29, %v4266_v38 }
0x1011   :  { %v5426_v10 = vmul.f32 %v9928_v52, %v10183_v47  ;;  %v5794_v5 = vmul.f32 %v9942_v42, %v10183_v47  ;;  %v5846_v46 = vmul.f32 %v9953_v11, %v10183_v47  ;;  %v4343_v19 = vrot.slane %v4335_v56, %v11071_v57 }
0x1012   :  { %v7829_v17 = vpop.eup %7828  ;;  %v4275_v59 = vrot.slane %v4267_v9, %v11071_v57  ;;  %v4282_v15 = vrot.slane %v4268_v30, %v11071_v57  ;;  %v4291_v45 = vrot.slane %v4283_v6, %v11071_v57  ;;  %v4298_v63 = vrot.slane %v4284_v1, %v11071_v57 }
0x1013   :  { %v10195_v58 = vmul.f32 %v7829_v17, %v10136_v26  ;;  %v5436_v21 = vsel %vm1930_vm3, %v5426_v10, 0.0  ;;  %v5804_v50 = vsel %vm1930_vm3, %v5794_v5, 0.0  ;;  %v5856_v30 = vsel %vm1930_vm3, %v5846_v46, 0.0 }
0x1014   :  { %v4371_v7 = vcombine.low %v4275_v59, %v4282_v15  ;;  %v7000_v60 = vcombine.high %v4275_v59, %v4282_v15  ;;  %v4387_v40 = vcombine.low %v4291_v45, %v4298_v63  ;;  %5437 = vadd.xlane.f32.xlu1 %v5436_v21  ;;  %v7001_v34 = vcombine.high %v4291_v45, %v4298_v63 }
0x1015   :  { %7386 = vmatprep.mubr.msk.f32.mxu0 %vm1930_vm3, %v10195_v58  ;;  %v5898_v10 = vmul.f32 %v9960_v16, %v10183_v47  ;;  %v4367_v17 = vcombine.low %v4343_v19, %v4359_v4  ;;  %v4369_v15 = vcombine.low %v4350_v62, %v4366_v53  ;;  %v4368_v21 = vcombine.high %v4343_v19, %v4359_v4 }
0x1016   :  { %v4378_v26 = vrot.slane %v4371_v7, %v11070_v13  ;;  %v4386_v0 = vrot.slane %v7000_v60, %v11070_v13  ;;  %v4394_v37 = vrot.slane %v4387_v40, %v11070_v13  ;;  %v4402_v2 = vrot.slane %v7001_v34, %v11070_v13  ;;  %v7831_v60 = vpop.eup %7830 }
0x1017   :  { %v5908_v20 = vsel %vm1930_vm3, %v5898_v10, 0.0  ;;  %v5950_v7 = vmul.f32 %v9967_v23, %v10183_v47  ;;  %v6002_v32 = vmul.f32 %v9973_v12, %v10183_v47  ;;  %v6158_v19 = vmul.f32 %v9994_v35, %v10183_v47 }
0x1018   :  { %5805 = vadd.xlane.f32.xlu1 %v5804_v50  ;;  %v4403_v29 = vcombine.low %v4378_v26, %v4386_v0  ;;  %v4404_v33 = vcombine.high %v4378_v26, %v4386_v0  ;;  %v4419_v38 = vcombine.low %v4394_v37, %v4402_v2  ;;  %v4420_v43 = vcombine.high %v4394_v37, %v4402_v2 }
0x1019   :  { %v5960_v34 = vsel %vm1930_vm3, %v5950_v7, 0.0  ;;  %v10227_v26 = vmul.f32 %v7831_v60, %v10140_v44  ;;  %v6012_v37 = vsel %vm1930_vm3, %v6002_v32, 0.0  ;;  %v6054_v50 = vmul.f32 %v9981_v49, %v10183_v47 }
0x101a   :  { %v4411_v8 = vrot.slane %v4403_v29, %v11071_v57  ;;  %v4418_v9 = vrot.slane %v4404_v33, %v11071_v57  ;;  %v4427_v6 = vrot.slane %v4419_v38, %v11071_v57  ;;  %v4434_v1 = vrot.slane %v4420_v43, %v11071_v57 }
0x101b   :  { %v6064_v46 = vsel %vm1930_vm3, %v6054_v50, 0.0  ;;  %v6106_v44 = vmul.f32 %v9987_v51, %v10183_v47  ;;  %v6168_v4 = vsel %vm1930_vm3, %v6158_v19, 0.0  ;;  %v5425_v29 = vmul.f32 %v9864_v54, %v10195_v58 }
0x101c   :  { %5857 = vadd.xlane.f32.xlu1 %v5856_v30  ;;  %v4435_v59 = vcombine.low %v4411_v8, %v4427_v6  ;;  %v4437_v45 = vcombine.low %v4418_v9, %v4434_v1  ;;  %v4436_v63 = vcombine.high %v4411_v8, %v4427_v6  ;;  %v4438_v31 = vcombine.high %v4418_v9, %v4434_v1 }
0x101d   :  { %v6116_v2 = vsel %vm1930_vm3, %v6106_v44, 0.0  ;;  %v5433_v33 = vsel %vm1930_vm3, %v5425_v29, 0.0  ;;  %v5793_v38 = vmul.f32 %v9870_v61, %v10195_v58  ;;  %v5845_v53 = vmul.f32 %v9877_v48, %v10195_v58 }
0x101e   :  { %v7563_v5 = vpack.c.bf16 %v4435_v59, %v4367_v17  ;;  %v7571_v56 = vpack.c.bf16 %v4437_v45, %v4369_v15  ;;  %v7567_v40 = vpack.c.bf16 %v4436_v63, %v4368_v21  ;;  %v7575_v0 = vpack.c.bf16 %v4438_v31, %v4370_v25 }
0x101f   :  { %v5801_v62 = vsel %vm1930_vm3, %v5793_v38, 0.0  ;;  %v5897_v8 = vmul.f32 %v9884_v14, %v10195_v58  ;;  %v5949_v61 = vmul.f32 %v9890_v3, %v10195_v58  ;;  %v6001_v48 = vmul.f32 %v9899_v22, %v10195_v58 }
0x1020   :  { %5909 = vadd.xlane.f32.xlu1 %v5908_v20  ;;  %7564 = vmatprep.subr.bf16.mxu0 %v7563_v5  ;;  %v6053_v3 = vmul.f32 %v9906_v41, %v10195_v58  ;;  %v6157_v41 = vmul.f32 %v9920_v55, %v10195_v58  ;;  %v5427_v19 = vmul.f32 %v9864_v54, %v10227_v26 }
0x1021   :  { %7572 = vmatprep.subr.bf16.mxu1 %v7571_v56  ;;  %7566 = vmatpush3.bf16.msra.mxu0 %v7563_v5  ;;  %v5905_v9 = vsel %vm1930_vm3, %v5897_v8, 0.0  ;;  %v5957_v6 = vsel %vm1930_vm3, %v5949_v61, 0.0  ;;  %v6009_v10 = vsel %vm1930_vm3, %v6001_v48, 0.0  ;;  %v10334_v61 = vld [vmem:[%s10896_s2 + $0x30] sm:$0xff] }
0x1022   :  { %7574 = vmatpush3.bf16.msra.mxu1 %v7571_v56  ;;  %7568 = vmatprep.subr.bf16.mxu0 %v7567_v40  ;;  %v6061_v22 = vsel %vm1930_vm3, %v6053_v3, 0.0  ;;  %v6165_v56 = vsel %vm1930_vm3, %v6157_v41, 0.0  ;;  %v5439_v54 = vsel %vm1930_vm3, %v5427_v19, 0.0 }
0x1024   :  { %5961 = vadd.xlane.f32.xlu1 %v5960_v34  ;;  %7387 = vmatmul.mubr.msk.f32.vlgmr.msra.gmra.mrb[22].mxu0 %vm1930_vm3, %v10183_v47  ;;  %v5853_v47 = vsel %vm1930_vm3, %v5845_v53, 0.0 }
0x1025   :  { %7570 = vmatpush3.bf16.msra.mxu0 %v7567_v40  ;;  %7393 = vmatprep.mubr.msk.f32.mxu0 %vm1930_vm3, %v10227_v26 }
0x1026   :  { %7576 = vmatprep.subr.bf16.mxu0 %v7575_v0 }
0x1028   :  { %6013 = vadd.xlane.f32.xlu1 %v6012_v37 }
0x102c   :  { %6065 = vadd.xlane.f32.xlu1 %v6064_v46 }
0x1030   :  { %6117 = vadd.xlane.f32.xlu1 %v6116_v2 }
0x1034   :  { %6169 = vadd.xlane.f32.xlu1 %v6168_v4 }
0x1038   :  { %5434 = vadd.xlane.f32.xlu1 %v5433_v33 }
0x103c   :  { %v5393_v43 = vpop.xlane.xlu1 %5392  ;;  %5802 = vadd.xlane.f32.xlu1 %v5801_v62 }
0x103d   :  { %7832 = vrcp.f32 %v5393_v43 }
0x1040   :  { %5854 = vadd.xlane.f32.xlu1 %v5853_v47 }
0x1044   :  { %5906 = vadd.xlane.f32.xlu1 %v5905_v9 }
0x1047   :  { %v7833_v30 = vpop.eup %7832 }
0x1048   :  { %v5417_v1 = vmul.f32 %v7833_v30, %v10149_v24  ;;  %5958 = vadd.xlane.f32.xlu1 %v5957_v6  ;;  %v6105_v24 = vmul.f32 %v9912_v28, %v10195_v58 }
0x104a   :  { %7394 = vmatmul.mubr.msk.f32.vlgmr.msra.gmra.mrb[24].mxu0 %vm1930_vm3, %v5417_v1  ;;  %v5428_v14 = vmul.f32 %v9928_v52, %v5417_v1  ;;  %v5796_v59 = vmul.f32 %v9942_v42, %v5417_v1  ;;  %v5848_v45 = vmul.f32 %v9953_v11, %v5417_v1  ;;  %v6113_v63 = vsel %vm1930_vm3, %v6105_v24, 0.0 }
0x104b   :  { %7578 = vmatpush3.bf16.msra.mxu0 %v7575_v0  ;;  %v5900_v5 = vmul.f32 %v9960_v16, %v5417_v1  ;;  %v5952_v20 = vmul.f32 %v9967_v23, %v5417_v1  ;;  %v6004_v60 = vmul.f32 %v9973_v12, %v5417_v1  ;;  %v6056_v40 = vmul.f32 %v9981_v49, %v5417_v1 }
0x104c   :  { %6010 = vadd.xlane.f32.xlu1 %v6009_v10  ;;  %v5442_v17 = vsel %vm1930_vm3, %v5428_v14, 0.0  ;;  %v5810_v15 = vsel %vm1930_vm3, %v5796_v59, 0.0  ;;  %v5862_v21 = vsel %vm1930_vm3, %v5848_v45, 0.0  ;;  %v6108_v25 = vmul.f32 %v9987_v51, %v5417_v1  ;;  %v10354_v10 = vld [vmem:[%s10896_s2 + $0x40] sm:$0xff] }
0x104d   :  { %5443 = vadd.xlane.f32.xlu0 %v5442_v17  ;;  %v5914_v28 = vsel %vm1930_vm3, %v5900_v5, 0.0  ;;  %v5966_v7 = vsel %vm1930_vm3, %v5952_v20, 0.0  ;;  %v6018_v58 = vsel %vm1930_vm3, %v6004_v60, 0.0  ;;  %v6070_v34 = vsel %vm1930_vm3, %v6056_v40, 0.0  ;;  %v10403_v60 = vld [vmem:[%s10896_s2] sm:$0xff] }
0x104e   :  { %v6122_v0 = vsel %vm1930_vm3, %v6108_v25, 0.0  ;;  %v6160_v37 = vmul.f32 %v9994_v35, %v5417_v1  ;;  %v10300_v35 = vld [vmem:[%s10896_s2 + $0x10] sm:$0xff] }
0x1050   :  { %6062 = vadd.xlane.f32.xlu1 %v6061_v22  ;;  %v6174_v2 = vsel %vm1930_vm3, %v6160_v37, 0.0  ;;  %v7913_v37 = vld [vmem:[%s10896_s2 + $0x18] sm:$0xff] }
0x1051   :  { %5811 = vadd.xlane.f32.xlu0 %v5810_v15 }
0x1054   :  { %6114 = vadd.xlane.f32.xlu1 %v6113_v63 }
0x1055   :  { %5863 = vadd.xlane.f32.xlu0 %v5862_v21 }
0x1058   :  { %6166 = vadd.xlane.f32.xlu1 %v6165_v56 }
0x1059   :  { %5915 = vadd.xlane.f32.xlu0 %v5914_v28 }
0x105d   :  { %5967 = vadd.xlane.f32.xlu0 %v5966_v7  ;;  %v10396_v7 = vld [vmem:[%s10896_s2 + $0x80] sm:$0xff] }
0x1060   :  { %v5399_v55 = vpop.xlane.xlu1 %5398 }
0x1061   :  { %7834 = vrcp.f32 %v5399_v55  ;;  %6019 = vadd.xlane.f32.xlu0 %v6018_v58 }
0x1064   :  { %v5396_v31 = vpop.xlane.xlu0 %5395 }
0x1065   :  { %7836 = vrcp.f32 %v5396_v31  ;;  %6071 = vadd.xlane.f32.xlu0 %v6070_v34 }
0x1068   :  { %v5402_v32 = vpop.xlane.xlu0 %5401 }
0x1069   :  { %7838 = vrcp.f32 %v5402_v32  ;;  %6123 = vadd.xlane.f32.xlu0 %v6122_v0 }
0x106b   :  { %v7835_v50 = vpop.eup %7834 }
0x106c   :  { %v10290_v46 = vmul.f32 %v7835_v50, %v10153_v36  ;;  %v5405_v44 = vpop.xlane.xlu0 %5404  ;;  %v5795_v36 = vmul.f32 %v10300_v35, %v10227_v26 }
0x106d   :  { %7840 = vrcp.f32 %v5405_v44  ;;  %6175 = vadd.xlane.f32.xlu0 %v6174_v2 }
0x106e   :  { %v5430_v4 = vmul.f32 %v9928_v52, %v10290_v46  ;;  %v5798_v62 = vmul.f32 %v9942_v42, %v10290_v46  ;;  %v5807_v47 = vsel %vm1930_vm3, %v5795_v36, 0.0  ;;  %v5850_v8 = vmul.f32 %v9953_v11, %v10290_v46 }
0x106f   :  { %v7837_v29 = vpop.eup %7836  ;;  %v5902_v48 = vmul.f32 %v9960_v16, %v10290_v46  ;;  %v5951_v16 = vmul.f32 %v10354_v10, %v10227_v26  ;;  %v6006_v59 = vmul.f32 %v9973_v12, %v10290_v46  ;;  %v6058_v45 = vmul.f32 %v9981_v49, %v10290_v46  ;;  %v10376_v12 = vld [vmem:[%s10896_s2 + $0x60] sm:$0xff]  ;;  %v10387_v49 = vld [vmem:[%s10896_s2 + $0x70] sm:$0xff] }
0x1070   :  { %v10305_v33 = vmul.f32 %v7837_v29, %v10157_v18  ;;  %v5448_v38 = vsel %vm1930_vm3, %v5430_v4, 0.0  ;;  %v10318_v18 = vld [vmem:[%s10896_s2 + $0x20] sm:$0xff]  ;;  %v5816_v42 = vsel %vm1930_vm3, %v5798_v62, 0.0  ;;  %v5868_v6 = vsel %vm1930_vm3, %v5850_v8, 0.0  ;;  %v7914_v4 = vld [vmem:[%s10896_s2 + $0x28] sm:$0xff]  ;;  %v7915_v62 = vld [vmem:[%s10896_s2 + $0x38] sm:$0xff] }
0x1071   :  { %5449 = vadd.xlane.f32.xlu1 %v5448_v38  ;;  %5440 = vadd.xlane.f32.xlu0 %v5439_v54  ;;  %v5847_v53 = vmul.f32 %v10318_v18, %v10227_v26  ;;  %v5920_v1 = vsel %vm1930_vm3, %v5902_v48, 0.0  ;;  %v5963_v17 = vsel %vm1930_vm3, %v5951_v16, 0.0  ;;  %v6024_v24 = vsel %vm1930_vm3, %v6006_v59, 0.0  ;;  %v7916_v8 = vld [vmem:[%s10896_s2 + $0x48] sm:$0xff] }
0x1072   :  { %7400 = vmatprep.mubr.msk.f32.mxu1 %vm1930_vm3, %v10305_v33  ;;  %v6055_v63 = vmul.f32 %v10376_v12, %v10227_v26  ;;  %v6076_v41 = vsel %vm1930_vm3, %v6058_v45, 0.0  ;;  %v6110_v5 = vmul.f32 %v9987_v51, %v10290_v46  ;;  %v6107_v56 = vmul.f32 %v10387_v49, %v10227_v26  ;;  %v7918_v59 = vld [vmem:[%s10896_s2 + $0x68] sm:$0xff] }
0x1073   :  { %v7839_v52 = vpop.eup %7838  ;;  %7401 = vmatmul.mubr.msk.f32.vlgmr.msra.gmra.mrb[28].mxu1 %vm1930_vm3, %v10290_v46  ;;  %v5859_v11 = vsel %vm1930_vm3, %v5847_v53, 0.0  ;;  %v6159_v51 = vmul.f32 %v10396_v7, %v10227_v26  ;;  %v5429_v55 = vmul.f32 %v10403_v60, %v10305_v33  ;;  %v5797_v31 = vmul.f32 %v10300_v35, %v10305_v33 }
0x1074   :  { %v10323_v43 = vmul.f32 %v7839_v52, %v10161_v27  ;;  %v5899_v27 = vmul.f32 %v10334_v61, %v10227_v26  ;;  %v6067_v21 = vsel %vm1930_vm3, %v6055_v63, 0.0  ;;  %v6128_v28 = vsel %vm1930_vm3, %v6110_v5, 0.0 }
0x1075   :  { %5817 = vadd.xlane.f32.xlu1 %v5816_v42  ;;  %5808 = vadd.xlane.f32.xlu0 %v5807_v47  ;;  %v6119_v20 = vsel %vm1930_vm3, %v6107_v56, 0.0  ;;  %v6171_v58 = vsel %vm1930_vm3, %v6159_v51, 0.0  ;;  %v5445_v40 = vsel %vm1930_vm3, %v5429_v55, 0.0  ;;  %v5813_v25 = vsel %vm1930_vm3, %v5797_v31, 0.0 }
0x1076   :  { %7407 = vmatprep.mubr.msk.f32.mxu0 %vm1930_vm3, %v10323_v43  ;;  %v5911_v14 = vsel %vm1930_vm3, %v5899_v27, 0.0  ;;  %v5849_v0 = vmul.f32 %v10318_v18, %v10305_v33  ;;  %v5901_v19 = vmul.f32 %v10334_v61, %v10305_v33  ;;  %v5953_v54 = vmul.f32 %v10354_v10, %v10305_v33 }
0x1077   :  { %v7841_v9 = vpop.eup %7840  ;;  %v6057_v48 = vmul.f32 %v10376_v12, %v10305_v33  ;;  %v6161_v63 = vmul.f32 %v10396_v7, %v10305_v33  ;;  %v5431_v51 = vmul.f32 %v10403_v60, %v10323_v43  ;;  %v5799_v31 = vmul.f32 %v10300_v35, %v10323_v43 }
0x1078   :  { %v10339_v30 = vmul.f32 %v7841_v9, %v10165_v39  ;;  %v5954_v39 = vmul.f32 %v9967_v23, %v10290_v46  ;;  %v10365_v23 = vld [vmem:[%s10896_s2 + $0x50] sm:$0xff]  ;;  %v5865_v44 = vsel %vm1930_vm3, %v5849_v0, 0.0  ;;  %v5917_v36 = vsel %vm1930_vm3, %v5901_v19, 0.0 }
0x1079   :  { %5869 = vadd.xlane.f32.xlu1 %v5868_v6  ;;  %5860 = vadd.xlane.f32.xlu0 %v5859_v11  ;;  %v6003_v22 = vmul.f32 %v10365_v23, %v10227_v26  ;;  %v7912_v26 = vld [vmem:[%s10896_s2 + $0x8] sm:$0xff]  ;;  %v5969_v53 = vsel %vm1930_vm3, %v5953_v54, 0.0  ;;  %v6005_v47 = vmul.f32 %v10365_v23, %v10305_v33  ;;  %v6073_v16 = vsel %vm1930_vm3, %v6057_v48, 0.0 }
0x107a   :  { %7408 = vmatmul.mubr.msk.f32.vlgmr.msra.gmra.mrb[26].mxu0 %vm1930_vm3, %v10339_v30  ;;  %v5972_v3 = vsel %vm1930_vm3, %v5954_v39, 0.0  ;;  %v5432_v34 = vmul.f32 %v7912_v26, %v10339_v30  ;;  %v5800_v50 = vmul.f32 %v7913_v37, %v10339_v30  ;;  %v5852_v29 = vmul.f32 %v7914_v4, %v10339_v30  ;;  %v11072_v48 = vld [vmem:[#allocation3_spill] sm:$0xff] }
0x107b   :  { %v6015_v15 = vsel %vm1930_vm3, %v6003_v22, 0.0  ;;  %v5904_v52 = vmul.f32 %v7915_v62, %v10339_v30  ;;  %v5956_v9 = vmul.f32 %v7916_v8, %v10339_v30  ;;  %v6021_v6 = vsel %vm1930_vm3, %v6005_v47, 0.0 }
0x107c   :  { %v5454_v32 = vsel %vm1930_vm3, %v5432_v34, 0.0  ;;  %v5822_v2 = vsel %vm1930_vm3, %v5800_v50, 0.0  ;;  %v5874_v38 = vsel %vm1930_vm3, %v5852_v29, 0.0  ;;  %v6060_v22 = vmul.f32 %v7918_v59, %v10339_v30 }
0x107d   :  { %5921 = vadd.xlane.f32.xlu1 %v5920_v1  ;;  %5912 = vadd.xlane.f32.xlu0 %v5911_v14  ;;  %v5926_v42 = vsel %vm1930_vm3, %v5904_v52, 0.0  ;;  %v5978_v11 = vsel %vm1930_vm3, %v5956_v9, 0.0  ;;  %v7917_v1 = vld [vmem:[%s10896_s2 + $0x58] sm:$0xff]  ;;  %v6177_v56 = vsel %vm1930_vm3, %v6161_v63, 0.0  ;;  %v5851_v60 = vmul.f32 %v10318_v18, %v10323_v43 }
0x107e   :  { %v6008_v14 = vmul.f32 %v7917_v1, %v10339_v30  ;;  %v6082_v45 = vsel %vm1930_vm3, %v6060_v22, 0.0  ;;  %v5955_v37 = vmul.f32 %v10354_v10, %v10323_v43  ;;  %v6111_v10 = vmul.f32 %v10387_v49, %v10323_v43  ;;  %v11074_v22 = vld [vmem:[#allocation16_spill] sm:$0xff] }
0x1080   :  { %v5975_v18 = vsel %vm1930_vm3, %v5955_v37, 0.0 }
0x1081   :  { %5973 = vadd.xlane.f32.xlu1 %v5972_v3  ;;  %5964 = vadd.xlane.f32.xlu0 %v5963_v17  ;;  %v6030_v3 = vsel %vm1930_vm3, %v6008_v14, 0.0  ;;  %v6109_v17 = vmul.f32 %v10387_v49, %v10305_v33 }
0x1085   :  { %6025 = vadd.xlane.f32.xlu1 %v6024_v24  ;;  %6016 = vadd.xlane.f32.xlu0 %v6015_v15  ;;  %v6125_v15 = vsel %vm1930_vm3, %v6109_v17, 0.0 }
0x1089   :  { %6077 = vadd.xlane.f32.xlu1 %v6076_v41  ;;  %6068 = vadd.xlane.f32.xlu0 %v6067_v21  ;;  %v7919_v41 = vld [vmem:[%s10896_s2 + $0x78] sm:$0xff] }
0x108a   :  { %v6112_v21 = vmul.f32 %v7919_v41, %v10339_v30 }
0x108d   :  { %6129 = vadd.xlane.f32.xlu1 %v6128_v28  ;;  %6120 = vadd.xlane.f32.xlu0 %v6119_v20  ;;  %v6134_v28 = vsel %vm1930_vm3, %v6112_v21, 0.0  ;;  %v7920_v20 = vld [vmem:[%s10896_s2 + $0x88] sm:$0xff]  ;;  %v11075_v21 = vld [vmem:[#allocation2_spill] sm:$0xff] }
0x108e   :  { %v6162_v33 = vmul.f32 %v7920_v20, %v10290_v46  ;;  %v5819_v46 = vsel %vm1930_vm3, %v5799_v31, 0.0  ;;  %v6164_v54 = vmul.f32 %v7920_v20, %v10339_v30  ;;  %v11078_v37 = vsub.s32 5, %v11075_v21 }
0x1090   :  { %v6186_v62 = vsel %vm1930_vm3, %v6164_v54, 0.0  ;;  %v11080_v54 = vsub.s32 7, %v11075_v21 }
0x1091   :  { %6172 = vadd.xlane.f32.xlu0 %v6171_v58  ;;  %5446 = vadd.xlane.f32.xlu1 %v5445_v40  ;;  %v6180_v58 = vsel %vm1930_vm3, %v6162_v33, 0.0  ;;  %v5451_v40 = vsel %vm1930_vm3, %v5431_v51, 0.0 }
0x1095   :  { %5814 = vadd.xlane.f32.xlu1 %v5813_v25  ;;  %5455 = vadd.xlane.f32.xlu0 %v5454_v32  ;;  %v5871_v25 = vsel %vm1930_vm3, %v5851_v60, 0.0  ;;  %v5903_v32 = vmul.f32 %v10334_v61, %v10323_v43  ;;  %v6059_v61 = vmul.f32 %v10376_v12, %v10323_v43 }
0x1097   :  { %v5923_v35 = vsel %vm1930_vm3, %v5903_v32, 0.0  ;;  %v6079_v4 = vsel %vm1930_vm3, %v6059_v61, 0.0 }
0x1099   :  { %5866 = vadd.xlane.f32.xlu1 %v5865_v44  ;;  %5823 = vadd.xlane.f32.xlu0 %v5822_v2  ;;  %v6007_v44 = vmul.f32 %v10365_v23, %v10323_v43  ;;  %v6163_v23 = vmul.f32 %v10396_v7, %v10323_v43 }
0x109b   :  { %v6027_v2 = vsel %vm1930_vm3, %v6007_v44, 0.0 }
0x109d   :  { %5918 = vadd.xlane.f32.xlu1 %v5917_v36  ;;  %5875 = vadd.xlane.f32.xlu0 %v5874_v38  ;;  %v6131_v36 = vsel %vm1930_vm3, %v6111_v10, 0.0  ;;  %v6183_v38 = vsel %vm1930_vm3, %v6163_v23, 0.0  ;;  %v11079_v10 = vsub.s32 6, %v11075_v21 }
0x10a1   :  { %v10447_v27 = vpop.xlane.xlu1 %5437  ;;  %5970 = vadd.xlane.f32.xlu1 %v5969_v53  ;;  %5927 = vadd.xlane.f32.xlu0 %v5926_v42 }
0x10a5   :  { %v10457_v39 = vpop.xlane.xlu1 %5805  ;;  %6022 = vadd.xlane.f32.xlu1 %v6021_v6  ;;  %5979 = vadd.xlane.f32.xlu0 %v5978_v11  ;;  %v7027_v6 = vld [vmem:[%s10898_s8 + $0x10] sm:$0xff] }
0x10a6   :  { %v10543_v1 = vrot.slane %v7027_v6, %v11072_v48 }
0x10a8   :  { %v5462_v59 = vmul.f32 %v10543_v1, %v10447_v27 }
0x10a9   :  { %v10467_v24 = vpop.xlane.xlu1 %5857  ;;  %6074 = vadd.xlane.f32.xlu1 %v6073_v16  ;;  %6031 = vadd.xlane.f32.xlu0 %v6030_v3  ;;  %v11073_v16 = vld [vmem:[#allocation22_spill] sm:$0xff] }
0x10aa   :  { %v10546_v3 = vrot.slane %v7027_v6, %v11073_v16 }
0x10ac   :  { %v5830_v41 = vmul.f32 %v10546_v3, %v10457_v39 }
0x10ad   :  { %v10477_v5 = vpop.xlane.xlu1 %5909  ;;  %6126 = vadd.xlane.f32.xlu1 %v6125_v15  ;;  %6083 = vadd.xlane.f32.xlu0 %v6082_v45  ;;  %v10553_v15 = vrot.slane %v7027_v6, %v11074_v22 }
0x10af   :  { %v5882_v31 = vmul.f32 %v10553_v15, %v10467_v24 }
0x10b1   :  { %v10487_v55 = vpop.xlane.xlu1 %5961  ;;  %6178 = vadd.xlane.f32.xlu1 %v6177_v56  ;;  %6135 = vadd.xlane.f32.xlu0 %v6134_v28  ;;  %v11076_v56 = vsub.s32 3, %v11075_v21 }
0x10b3   :  { %v10560_v28 = vrot.slane %v7027_v6, %v11076_v56 }
0x10b5   :  { %v10493_v26 = vpop.xlane.xlu1 %6013  ;;  %6181 = vadd.xlane.f32.xlu1 %v6180_v58  ;;  %5452 = vadd.xlane.f32.xlu0 %v5451_v40 }
0x10b9   :  { %v10498_v34 = vpop.xlane.xlu1 %6065  ;;  %5820 = vadd.xlane.f32.xlu0 %v5819_v46  ;;  %v11077_v46 = vsub.s32 4, %v11075_v21 }
0x10bb   :  { %v10569_v60 = vrot.slane %v7027_v6, %v11077_v46 }
0x10bd   :  { %5872 = vadd.xlane.f32.xlu0 %v5871_v25  ;;  %v10503_v0 = vpop.xlane.xlu1 %6117 }
0x10c1   :  { %5924 = vadd.xlane.f32.xlu0 %v5923_v35  ;;  %v10508_v50 = vpop.xlane.xlu1 %6169  ;;  %v5934_v35 = vmul.f32 %v10560_v28, %v10477_v5 }
0x10c5   :  { %5976 = vadd.xlane.f32.xlu0 %v5975_v18  ;;  %v5435_v19 = vpop.xlane.xlu1 %5434  ;;  %v10576_v18 = vrot.slane %v7027_v6, %v11078_v37 }
0x10c6   :  { %v5461_v45 = vmul.f32 %v10543_v1, %v5435_v19 }
0x10c9   :  { %6028 = vadd.xlane.f32.xlu0 %v6027_v2  ;;  %v5803_v29 = vpop.xlane.xlu1 %5802 }
0x10ca   :  { %v5829_v51 = vmul.f32 %v10546_v3, %v5803_v29  ;;  %v10585_v29 = vrot.slane %v7027_v6, %v11079_v10 }
0x10cd   :  { %6080 = vadd.xlane.f32.xlu0 %v6079_v4  ;;  %v5855_v12 = vpop.xlane.xlu1 %5854  ;;  %v5986_v4 = vmul.f32 %v10569_v60, %v10487_v55 }
0x10ce   :  { %v5881_v25 = vmul.f32 %v10553_v15, %v5855_v12  ;;  %v10592_v12 = vrot.slane %v7027_v6, %v11080_v54 }
0x10d1   :  { %6132 = vadd.xlane.f32.xlu0 %v6131_v36  ;;  %v5907_v49 = vpop.xlane.xlu1 %5906 }
0x10d2   :  { %v5933_v2 = vmul.f32 %v10560_v28, %v5907_v49 }
0x10d5   :  { %6184 = vadd.xlane.f32.xlu0 %v6183_v38  ;;  %v5959_v42 = vpop.xlane.xlu1 %5958  ;;  %v6038_v38 = vmul.f32 %v10576_v18, %v10493_v26 }
0x10d6   :  { %v5985_v5 = vmul.f32 %v10569_v60, %v5959_v42  ;;  %v10602_v42 = vld [vmem:[%s10898_s8 + $0x18] ss:$0 sm:$0xff] }
0x10d9   :  { %6187 = vadd.xlane.f32.xlu0 %v6186_v62  ;;  %v6011_v43 = vpop.xlane.xlu1 %6010 }
0x10da   :  { %v10525_v52 = vpop.xlane.xlu0 %5443  ;;  %v6037_v49 = vmul.f32 %v10576_v18, %v6011_v43 }
0x10dd   :  { %v6063_v9 = vpop.xlane.xlu1 %6062 }
0x10de   :  { %v10527_v53 = vpop.xlane.xlu0 %5811  ;;  %v6089_v26 = vmul.f32 %v10585_v29, %v6063_v9 }
0x10df   :  { %v5832_v10 = vmul.f32 %v10546_v3, %v10527_v53 }
0x10e1   :  { %v6115_v14 = vpop.xlane.xlu1 %6114 }
0x10e2   :  { %v10529_v47 = vpop.xlane.xlu0 %5863  ;;  %v6141_v21 = vmul.f32 %v10592_v12, %v6115_v14 }
0x10e5   :  { %v6167_v58 = vpop.xlane.xlu1 %6166 }
0x10e6   :  { %v10531_v8 = vpop.xlane.xlu0 %5915 }
0x10ea   :  { %v10533_v7 = vpop.xlane.xlu0 %5967 }
0x10ee   :  { %v10535_v30 = vpop.xlane.xlu0 %6019 }
0x10f2   :  { %v10540_v11 = vpop.xlane.xlu0 %6071 }
0x10f6   :  { %v10548_v17 = vpop.xlane.xlu0 %6123 }
0x10f7   :  { %v7388_v63 = vpop.f32.mrb[22].mxu0 }
0x10f8   :  { %v5547_v20 = vadd.f32 %v7388_v63, %v5462_v59  ;;  %v5541_v33 = vpop.f32.mrb[23].mxu0 }
0x10f9   :  { %v5542_v40 = vadd.f32 %v5541_v33, %v5461_v45  ;;  %v6090_v45 = vmul.f32 %v10585_v29, %v10498_v34  ;;  %v6194_v34 = vmul.f32 %v10602_v42, %v10508_v50 }
0x10fa   :  { %v10563_v27 = vpop.xlane.xlu0 %6175  ;;  %v5838_v39 = vadd.f32 %v5830_v41, %v5547_v20  ;;  %v6142_v41 = vmul.f32 %v10592_v12, %v10503_v0 }
0x10fb   :  { %v5837_v32 = vadd.f32 %v5829_v51, %v5542_v40  ;;  %v6193_v40 = vmul.f32 %v10602_v42, %v6167_v58 }
0x10fc   :  { %v5890_v44 = vadd.f32 %v5882_v31, %v5838_v39 }
0x10fd   :  { %v5889_v61 = vadd.f32 %v5881_v25, %v5837_v32 }
0x10fe   :  { %v10579_v24 = vpop.xlane.xlu1 %5449  ;;  %v5441_v19 = vpop.xlane.xlu0 %5440  ;;  %v5942_v36 = vadd.f32 %v5934_v35, %v5890_v44 }
0x10ff   :  { %v5941_v23 = vadd.f32 %v5933_v2, %v5889_v61  ;;  %v5464_v2 = vmul.f32 %v10543_v1, %v10525_v52  ;;  %v5463_v61 = vmul.f32 %v10543_v1, %v5441_v19  ;;  %v5936_v19 = vmul.f32 %v10560_v28, %v10531_v8 }
0x1100   :  { %v5994_v62 = vadd.f32 %v5986_v4, %v5942_v36 }
0x1101   :  { %v5993_v48 = vadd.f32 %v5985_v5, %v5941_v23 }
0x1102   :  { %v10595_v55 = vpop.xlane.xlu1 %5817  ;;  %v5809_v59 = vpop.xlane.xlu0 %5808  ;;  %v6046_v63 = vadd.f32 %v6038_v38, %v5994_v62 }
0x1103   :  { %v6045_v6 = vadd.f32 %v6037_v49, %v5993_v48  ;;  %v5831_v38 = vmul.f32 %v10546_v3, %v5809_v59  ;;  %v5884_v49 = vmul.f32 %v10553_v15, %v10529_v47  ;;  %v5988_v59 = vmul.f32 %v10569_v60, %v10533_v7 }
0x1104   :  { %v6098_v43 = vadd.f32 %v6090_v45, %v6046_v63 }
0x1105   :  { %v6097_v56 = vadd.f32 %v6089_v26, %v6045_v6 }
0x1106   :  { %v10608_v20 = vpop.xlane.xlu1 %5869  ;;  %v5861_v33 = vpop.xlane.xlu0 %5860  ;;  %v6150_v51 = vadd.f32 %v6142_v41, %v6098_v43 }
0x1107   :  { %v6149_v31 = vadd.f32 %v6141_v21, %v6097_v56  ;;  %v5883_v45 = vmul.f32 %v10553_v15, %v5861_v33  ;;  %v6040_v56 = vmul.f32 %v10576_v18, %v10535_v30 }
0x1108   :  { %v10613_v46 = vadd.f32 %v6194_v34, %v6150_v51 }
0x1109   :  { %v10617_v0 = vadd.f32 %v6193_v40, %v6149_v31  ;;  %v6092_v40 = vmul.f32 %v10585_v29, %v10540_v11 }
0x110a   :  { %v10615_v9 = vpop.xlane.xlu1 %5921  ;;  %v5913_v39 = vpop.xlane.xlu0 %5912 }
0x110b   :  { %v5935_v53 = vmul.f32 %v10560_v28, %v5913_v39 }
0x110e   :  { %v10619_v25 = vpop.xlane.xlu1 %5973  ;;  %v5965_v14 = vpop.xlane.xlu0 %5964 }
0x110f   :  { %v5987_v21 = vmul.f32 %v10569_v60, %v5965_v14  ;;  %v6144_v14 = vmul.f32 %v10592_v12, %v10548_v17 }
0x1112   :  { %v10621_v32 = vpop.xlane.xlu1 %6025  ;;  %v6017_v35 = vpop.xlane.xlu0 %6016 }
0x1113   :  { %v6039_v34 = vmul.f32 %v10576_v18, %v6017_v35  ;;  %v6196_v35 = vmul.f32 %v10602_v42, %v10563_v27 }
0x1116   :  { %v10623_v37 = vpop.xlane.xlu1 %6077  ;;  %v6069_v50 = vpop.xlane.xlu0 %6068 }
0x111a   :  { %v10625_v44 = vpop.xlane.xlu1 %6129  ;;  %v6121_v58 = vpop.xlane.xlu0 %6120 }
0x111d   :  { %v7395_v4 = vpop.f32.mrb[24].mxu0 }
0x111e   :  { %v5628_v36 = vadd.f32 %v7395_v4, %v5464_v2  ;;  %v5622_v5 = vpop.f32.mrb[25].mxu0  ;;  %v5447_v23 = vpop.xlane.xlu1 %5446  ;;  %v6091_v2 = vmul.f32 %v10585_v29, %v6069_v50  ;;  %v6143_v4 = vmul.f32 %v10592_v12, %v6121_v58 }
0x111f   :  { %v5623_v54 = vadd.f32 %v5622_v5, %v5463_v61  ;;  %v6173_v62 = vpop.xlane.xlu0 %6172 }
0x1120   :  { %v5840_v48 = vadd.f32 %v5832_v10, %v5628_v36  ;;  %v6195_v11 = vmul.f32 %v10602_v42, %v6173_v62  ;;  %v5466_v62 = vmul.f32 %v10543_v1, %v10579_v24 }
0x1121   :  { %v5839_v52 = vadd.f32 %v5831_v38, %v5623_v54 }
0x1122   :  { %v5892_v63 = vadd.f32 %v5884_v49, %v5840_v48  ;;  %v5815_v26 = vpop.xlane.xlu1 %5814 }
0x1123   :  { %v5891_v6 = vadd.f32 %v5883_v45, %v5839_v52  ;;  %v5456_v41 = vpop.xlane.xlu0 %5455 }
0x1124   :  { %v5944_v43 = vadd.f32 %v5936_v19, %v5892_v63 }
0x1125   :  { %v5943_v47 = vadd.f32 %v5935_v53, %v5891_v6  ;;  %v5465_v53 = vmul.f32 %v10543_v1, %v5447_v23  ;;  %v5938_v23 = vmul.f32 %v10560_v28, %v10615_v9 }
0x1126   :  { %v5996_v33 = vadd.f32 %v5988_v59, %v5944_v43  ;;  %v5867_v39 = vpop.xlane.xlu1 %5866  ;;  %v5834_v43 = vmul.f32 %v10546_v3, %v10595_v55  ;;  %v5468_v55 = vmul.f32 %v10543_v1, %v5456_v41  ;;  %v6042_v41 = vmul.f32 %v10576_v18, %v10621_v32 }
0x1127   :  { %v5995_v8 = vadd.f32 %v5987_v21, %v5943_v47  ;;  %v5824_v51 = vpop.xlane.xlu0 %5823 }
0x1128   :  { %v6048_v31 = vadd.f32 %v6040_v56, %v5996_v33  ;;  %v5833_v33 = vmul.f32 %v10546_v3, %v5815_v26  ;;  %v5990_v26 = vmul.f32 %v10569_v60, %v10619_v25 }
0x1129   :  { %v6047_v7 = vadd.f32 %v6039_v34, %v5995_v8  ;;  %v5886_v8 = vmul.f32 %v10553_v15, %v10608_v20 }
0x112a   :  { %v6100_v61 = vadd.f32 %v6092_v40, %v6048_v31  ;;  %v5919_v38 = vpop.xlane.xlu1 %5918  ;;  %v5885_v31 = vmul.f32 %v10553_v15, %v5867_v39  ;;  %v5836_v39 = vmul.f32 %v10546_v3, %v5824_v51  ;;  %v6094_v51 = vmul.f32 %v10585_v29, %v10623_v37 }
0x112b   :  { %v6099_v30 = vadd.f32 %v6091_v2, %v6047_v7  ;;  %v5876_v10 = vpop.xlane.xlu0 %5875 }
0x112c   :  { %v6152_v36 = vadd.f32 %v6144_v14, %v6100_v61  ;;  %v5937_v14 = vmul.f32 %v10560_v28, %v5919_v38 }
0x112d   :  { %v6151_v5 = vadd.f32 %v6143_v4, %v6099_v30 }
0x112e   :  { %v10654_v54 = vadd.f32 %v6196_v35, %v6152_v36  ;;  %v5971_v48 = vpop.xlane.xlu1 %5970 }
0x112f   :  { %v10656_v50 = vadd.f32 %v6195_v11, %v6151_v5  ;;  %v10658_v49 = vpop.xlane.xlu0 %5927  ;;  %v5989_v36 = vmul.f32 %v10569_v60, %v5971_v48 }
0x1132   :  { %v6023_v45 = vpop.xlane.xlu1 %6022 }
0x1133   :  { %v10660_v17 = vpop.xlane.xlu0 %5979  ;;  %v6041_v25 = vmul.f32 %v10576_v18, %v6023_v45 }
0x1136   :  { %v6075_v19 = vpop.xlane.xlu1 %6074 }
0x1137   :  { %v10662_v58 = vpop.xlane.xlu0 %6031 }
0x113a   :  { %v6127_v6 = vpop.xlane.xlu1 %6126 }
0x113b   :  { %v10664_v52 = vpop.xlane.xlu0 %6083 }
0x113e   :  { %v6179_v61 = vpop.xlane.xlu1 %6178 }
0x113f   :  { %v10666_v27 = vpop.xlane.xlu0 %6135 }
0x1143   :  { %v5453_v63 = vpop.xlane.xlu0 %5452 }
0x1144   :  { %v5467_v20 = vmul.f32 %v10543_v1, %v5453_v63 }
0x1146   :  { %v7402_v59 = vpop.f32.mrb[28].mxu1 }
0x1147   :  { %v5709_v21 = vadd.f32 %v7402_v59, %v5466_v62  ;;  %v5821_v47 = vpop.xlane.xlu0 %5820  ;;  %v5703_v56 = vpop.f32.mrb[29].mxu1 }
0x1148   :  { %v5704_v34 = vadd.f32 %v5703_v56, %v5465_v53  ;;  %v5835_v62 = vmul.f32 %v10546_v3, %v5821_v47  ;;  %v6093_v56 = vmul.f32 %v10585_v29, %v6075_v19  ;;  %v6146_v3 = vmul.f32 %v10592_v12, %v10625_v44 }
0x1149   :  { %v5842_v40 = vadd.f32 %v5834_v43, %v5709_v21  ;;  %v5888_v21 = vmul.f32 %v10553_v15, %v5876_v10  ;;  %v5940_v10 = vmul.f32 %v10560_v28, %v10658_v49  ;;  %v6197_v19 = vmul.f32 %v10602_v42, %v6179_v61 }
0x114a   :  { %v5841_v24 = vadd.f32 %v5833_v33, %v5704_v34  ;;  %v6182_v33 = vpop.xlane.xlu1 %6181 }
0x114b   :  { %v5894_v2 = vadd.f32 %v5886_v8, %v5842_v40  ;;  %v5873_v7 = vpop.xlane.xlu0 %5872  ;;  %v6145_v8 = vmul.f32 %v10592_v12, %v6127_v6 }
0x114c   :  { %v5893_v4 = vadd.f32 %v5885_v31, %v5841_v24  ;;  %v5887_v34 = vmul.f32 %v10553_v15, %v5873_v7  ;;  %v6198_v24 = vmul.f32 %v10602_v42, %v6182_v33 }
0x114d   :  { %v5946_v30 = vadd.f32 %v5938_v23, %v5894_v2  ;;  %v7409_v35 = vpop.f32.mrb[26].mxu0 }
0x114e   :  { %v5945_v9 = vadd.f32 %v5937_v14, %v5893_v4  ;;  %v5790_v5 = vadd.f32 %v7409_v35, %v5468_v55  ;;  %v5784_v11 = vpop.f32.mrb[27].mxu0 }
0x114f   :  { %v5998_v38 = vadd.f32 %v5990_v26, %v5946_v30  ;;  %v5785_v53 = vadd.f32 %v5784_v11, %v5467_v20  ;;  %v5925_v59 = vpop.xlane.xlu0 %5924  ;;  %v5992_v20 = vmul.f32 %v10569_v60, %v10660_v17 }
0x1150   :  { %v5997_v1 = vadd.f32 %v5989_v36, %v5945_v9  ;;  %v5844_v63 = vadd.f32 %v5836_v39, %v5790_v5  ;;  %v5939_v15 = vmul.f32 %v10560_v28, %v5925_v59  ;;  %v6044_v9 = vmul.f32 %v10576_v18, %v10662_v58 }
0x1151   :  { %v6050_v43 = vadd.f32 %v6042_v41, %v5998_v38  ;;  %v5843_v48 = vadd.f32 %v5835_v62, %v5785_v53 }
0x1152   :  { %v6049_v32 = vadd.f32 %v6041_v25, %v5997_v1  ;;  %v5896_v31 = vadd.f32 %v5888_v21, %v5844_v63  ;;  %v6148_v25 = vmul.f32 %v10592_v12, %v10666_v27 }
0x1153   :  { %v6102_v47 = vadd.f32 %v6094_v51, %v6050_v43  ;;  %v5977_v45 = vpop.xlane.xlu0 %5976  ;;  %v5895_v37 = vadd.f32 %v5887_v34, %v5843_v48 }
0x1154   :  { %v6101_v40 = vadd.f32 %v6093_v56, %v6049_v32  ;;  %v5948_v55 = vadd.f32 %v5940_v10, %v5896_v31  ;;  %v5991_v30 = vmul.f32 %v10569_v60, %v5977_v45  ;;  %v6096_v60 = vmul.f32 %v10585_v29, %v10664_v52 }
0x1155   :  { %v6154_v23 = vadd.f32 %v6146_v3, %v6102_v47  ;;  %v5947_v14 = vadd.f32 %v5939_v15, %v5895_v37 }
0x1156   :  { %v6153_v2 = vadd.f32 %v6145_v8, %v6101_v40  ;;  %v6000_v28 = vadd.f32 %v5992_v20, %v5948_v55 }
0x1157   :  { %v6029_v7 = vpop.xlane.xlu0 %6028  ;;  %v6206_v44 = vadd.f32 %v6198_v24, %v6154_v23  ;;  %v5999_v39 = vadd.f32 %v5991_v30, %v5947_v14 }
0x1158   :  { %v6205_v4 = vadd.f32 %v6197_v19, %v6153_v2  ;;  %v6043_v36 = vmul.f32 %v10576_v18, %v6029_v7  ;;  %v6052_v41 = vadd.f32 %v6044_v9, %v6000_v28 }
0x1159   :  { %v6277_v6 = vcombine.low %v10613_v46, %v6206_v44  ;;  %v6278_v26 = vcombine.high %v10613_v46, %v6206_v44 }
0x115a   :  { %v6209_v49 = vcombine.low %v10617_v0, %v6205_v4  ;;  %v6210_v61 = vcombine.high %v10617_v0, %v6205_v4  ;;  %v6051_v11 = vadd.f32 %v6043_v36, %v5999_v39  ;;  %v6104_v59 = vadd.f32 %v6096_v60, %v6052_v41 }
0x115b   :  { %v6081_v35 = vpop.xlane.xlu0 %6080  ;;  %v6285_v8 = vrot.slane %v6277_v6, %v11070_v13  ;;  %v6292_v40 = vrot.slane %v6278_v26, %v11070_v13 }
0x115c   :  { %v6095_v5 = vmul.f32 %v10585_v29, %v6081_v35  ;;  %v6156_v51 = vadd.f32 %v6148_v25, %v6104_v59  ;;  %v6217_v29 = vrot.slane %v6209_v49, %v11070_v13  ;;  %v6224_v52 = vrot.slane %v6210_v61, %v11070_v13  ;;  %v7043_v59 = vld [vmem:[%s10899_s4 + $0x28] sm:$0xff] }
0x115e   :  { %v6103_v38 = vadd.f32 %v6095_v5, %v6051_v11 }
0x115f   :  { %v6133_v46 = vpop.xlane.xlu0 %6132 }
0x1160   :  { %v6147_v17 = vmul.f32 %v10592_v12, %v6133_v46 }
0x1162   :  { %v6155_v62 = vadd.f32 %v6147_v17, %v6103_v38 }
0x1163   :  { %v6185_v0 = vpop.xlane.xlu0 %6184 }
0x1164   :  { %v6199_v53 = vmul.f32 %v10602_v42, %v6185_v0 }
0x1166   :  { %v6207_v18 = vadd.f32 %v6199_v53, %v6155_v62  ;;  %v7042_v53 = vld [vmem:[%s10899_s4 + $0x20] sm:$0xff] }
0x1167   :  { %v6188_v58 = vpop.xlane.xlu0 %6187 }
0x1168   :  { %v6225_v1 = vcombine.low %v10656_v50, %v6207_v18  ;;  %v6226_v63 = vcombine.high %v10656_v50, %v6207_v18  ;;  %v6200_v43 = vmul.f32 %v10602_v42, %v6188_v58 }
0x116a   :  { %v6233_v48 = vrot.slane %v6225_v1, %v11070_v13  ;;  %v6240_v21 = vrot.slane %v6226_v63, %v11070_v13  ;;  %v6208_v56 = vadd.f32 %v6200_v43, %v6156_v51 }
0x116c   :  { %v6241_v33 = vcombine.low %v6217_v29, %v6233_v48  ;;  %v6242_v12 = vcombine.high %v6217_v29, %v6233_v48  ;;  %v6257_v27 = vcombine.low %v6224_v52, %v6240_v21  ;;  %v6258_v32 = vcombine.high %v6224_v52, %v6240_v21  ;;  %v7045_v48 = vld [vmem:[%s10899_s4 + $0x38] sm:$0xff] }
0x116d   :  { %v6293_v34 = vcombine.low %v10654_v54, %v6208_v56  ;;  %v6294_v50 = vcombine.high %v10654_v54, %v6208_v56  ;;  %v7579_v52 = vpack.c.bf16 %v7043_v59, %v7042_v53 }
0x116e   :  { %v6249_v3 = vrot.slane %v6241_v33, %v11071_v57  ;;  %v6256_v42 = vrot.slane %v6242_v12, %v11071_v57  ;;  %v6265_v47 = vrot.slane %v6257_v27, %v11071_v57  ;;  %v6272_v45 = vrot.slane %v6258_v32, %v11071_v57 }
0x116f   :  { %v6301_v31 = vrot.slane %v6293_v34, %v11070_v13  ;;  %v6308_v37 = vrot.slane %v6294_v50, %v11070_v13  ;;  %7580 = vmatprep.subr.bf16.mxu1 %v7579_v52 }
0x1170   :  { %v6345_v24 = vcombine.low %v6249_v3, %v6256_v42  ;;  %v7038_v23 = vcombine.high %v6249_v3, %v6256_v42  ;;  %v6361_v10 = vcombine.low %v6265_v47, %v6272_v45  ;;  %v7039_v54 = vcombine.high %v6265_v47, %v6272_v45  ;;  %7582 = vmatpush3.bf16.msra.mxu1 %v7579_v52 }
0x1171   :  { %v6309_v19 = vcombine.low %v6285_v8, %v6301_v31  ;;  %v6310_v2 = vcombine.high %v6285_v8, %v6301_v31  ;;  %v6325_v15 = vcombine.low %v6292_v40, %v6308_v37  ;;  %v6326_v7 = vcombine.high %v6292_v40, %v6308_v37 }
0x1172   :  { %v6352_v44 = vrot.slane %v6345_v24, %v11070_v13  ;;  %v6360_v55 = vrot.slane %v7038_v23, %v11070_v13  ;;  %v6368_v14 = vrot.slane %v6361_v10, %v11070_v13  ;;  %v6376_v4 = vrot.slane %v7039_v54, %v11070_v13 }
0x1173   :  { %v6317_v6 = vrot.slane %v6309_v19, %v11071_v57  ;;  %v6324_v26 = vrot.slane %v6310_v2, %v11071_v57  ;;  %v6333_v20 = vrot.slane %v6325_v15, %v11071_v57  ;;  %v6340_v30 = vrot.slane %v6326_v7, %v11071_v57 }
0x1174   :  { %v6377_v49 = vcombine.low %v6352_v44, %v6360_v55  ;;  %v6393_v61 = vcombine.low %v6368_v14, %v6376_v4  ;;  %v6378_v35 = vcombine.high %v6352_v44, %v6360_v55  ;;  %v6394_v28 = vcombine.high %v6368_v14, %v6376_v4  ;;  %v11082_v14 = vld [vmem:[#allocation19_spill] sm:$0xff] }
0x1175   :  { %v6413_v39 = vcombine.low %v6317_v6, %v6324_v26  ;;  %v7040_v36 = vcombine.high %v6317_v6, %v6324_v26  ;;  %v6429_v9 = vcombine.low %v6333_v20, %v6340_v30  ;;  %v7041_v5 = vcombine.high %v6333_v20, %v6340_v30  ;;  %v11083_v6 = vld [vmem:[#allocation26_spill] sm:$0xff] }
0x1176   :  { %v6385_v46 = vrot.slane %v6377_v49, %v11071_v57  ;;  %v6401_v11 = vrot.slane %v6393_v61, %v11071_v57  ;;  %v6392_v17 = vrot.slane %v6378_v35, %v11071_v57  ;;  %v6408_v41 = vrot.slane %v6394_v28, %v11071_v57 }
0x1177   :  { %v6420_v60 = vrot.slane %v6413_v39, %v11070_v13  ;;  %v6428_v38 = vrot.slane %v7040_v36, %v11070_v13  ;;  %v6436_v0 = vrot.slane %v6429_v9, %v11070_v13  ;;  %v6444_v62 = vrot.slane %v7041_v5, %v11070_v13  ;;  %v7044_v13 = vld [vmem:[%s10899_s4 + $0x30] sm:$0xff] }
0x1178   :  { %v6410_v25 = vcombine.high %v6385_v46, %v6401_v11  ;;  %v6412_v18 = vcombine.high %v6392_v17, %v6408_v41  ;;  %v6411_v58 = vcombine.low %v6392_v17, %v6408_v41  ;;  %v6409_v1 = vcombine.low %v6385_v46, %v6401_v11  ;;  %v7921_v17 = vld [vmem:[%s10894_s9 + $0x4] sm:$0x7] }
0x1179   :  { %v6446_v63 = vcombine.high %v6420_v60, %v6428_v38  ;;  %v6462_v51 = vcombine.high %v6436_v0, %v6444_v62  ;;  %v6445_v43 = vcombine.low %v6420_v60, %v6428_v38  ;;  %v6461_v29 = vcombine.low %v6436_v0, %v6444_v62  ;;  %v10805_v38 = vld [vmem:[%s10903_s10] ss:$0 sm:$0xff] }
0x117a   :  { %v7583_v27 = vpack.c.bf16 %v7045_v48, %v7044_v13  ;;  %v6632_v41 = vrot.slane %v7921_v17, %v11073_v16  ;;  %v10798_v60 = vrot.slane %v7921_v17, %v11074_v22  ;;  %v6875_v0 = vmul.f32 %v10805_v38, %v11083_v6 }
0x117b   :  { %v6460_v21 = vrot.slane %v6446_v63, %v11071_v57  ;;  %v6476_v56 = vrot.slane %v6462_v51, %v11071_v57  ;;  %v6453_v33 = vrot.slane %v6445_v43, %v11071_v57  ;;  %v6469_v12 = vrot.slane %v6461_v29, %v11071_v57  ;;  %v11081_v57 = vld [vmem:[#allocation20_spill] sm:$0xff] }
0x117c   :  { %7584 = vmatprep.subr.bf16.mxu1 %v7583_v27  ;;  %v6877_v16 = vsel %vm69_vm0, %v6875_v0, 0.0 }
0x117d   :  { %v6479_v32 = vcombine.low %v6460_v21, %v6476_v56  ;;  %v6478_v34 = vcombine.high %v6453_v33, %v6469_v12  ;;  %v6480_v50 = vcombine.high %v6460_v21, %v6476_v56  ;;  %v6477_v3 = vcombine.low %v6453_v33, %v6469_v12  ;;  %7586 = vmatpush3.bf16.msra.mxu1 %v7583_v27 }
0x117f   :  { %6493 = vrot.lane.b32.xlu1 %v6479_v32, %s7938_s20  ;;  %6485 = vrot.lane.b32.xlu0 %v6478_v34, %s7939_s21 }
0x1183   :  { %6483 = vrot.lane.b32.xlu1 %v6410_v25, %s7939_s21  ;;  %6499 = vrot.lane.b32.xlu0 %v6412_v18, %s7940_s22 }
0x1187   :  { %6491 = vrot.lane.b32.xlu1 %v6411_v58, %s7938_s20  ;;  %6517 = vrot.lane.b32.xlu0 %v11081_v57, %s7941_s23 }
0x118b   :  { %6501 = vrot.lane.b32.xlu1 %v6480_v50, %s7940_s22 }
0x11f1   :  { %v6494_v42 = vpop.permute.xlu1 %6493  ;;  %v6486_v47 = vpop.permute.xlu0 %6485 }
0x11f2   :  { %v6506_v31 = vsel %vm1036_vm1, %v6477_v3, %v6486_v47 }
0x11f3   :  { %v6508_v54 = vsel %vm1930_vm3, %v6506_v31, %v6494_v42 }
0x11f5   :  { %v6484_v45 = vpop.permute.xlu1 %6483  ;;  %v6500_v37 = vpop.permute.xlu0 %6499 }
0x11f6   :  { %v6505_v8 = vsel %vm1036_vm1, %v6409_v1, %v6484_v45  ;;  %v7048_v45 = vld [vmem:[%s10900_s5 + $0x20] sm:$0xff] }
0x11f9   :  { %v6492_v40 = vpop.permute.xlu1 %6491  ;;  %v6518_v2 = vpop.permute.xlu0 %6517 }
0x11fa   :  { %v6507_v24 = vsel %vm1930_vm3, %v6505_v8, %v6492_v40  ;;  %v7049_v8 = vld [vmem:[%s10900_s5 + $0x28] sm:$0xff]  ;;  %v7050_v40 = vld [vmem:[%s10900_s5 + $0x30] sm:$0xff] }
0x11fb   :  { %v6509_v23 = vsel %vm3105_vm4, %v6507_v24, %v6500_v37  ;;  %v7587_v31 = vpack.c.bf16 %v7049_v8, %v7048_v45  ;;  %v7051_v37 = vld [vmem:[%s10900_s5 + $0x38] sm:$0xff] }
0x11fc   :  { %7418 = vmatprep.mubr.msk.f32.mxu1 %vm69_vm0, %v6509_v23  ;;  %v7591_v24 = vpack.c.bf16 %v7051_v37, %v7050_v40  ;;  %v6876_v23 = vmul.f32 %v10805_v38, %v11082_v14 }
0x11fd   :  { %v6502_v10 = vpop.permute.xlu1 %6501  ;;  %7588 = vmatprep.subr.bf16.mxu0 %v7587_v31 }
0x11fe   :  { %v6510_v19 = vsel %vm3105_vm4, %v6508_v54, %v6502_v10  ;;  %7590 = vmatpush3.bf16.msra.mxu0 %v7587_v31  ;;  %v6880_v10 = vsel %vm69_vm0, %v6876_v23, 0.0  ;;  %v7054_v54 = vld [vmem:[%s10901_s6 + $0x40] sm:$0xff] }
0x11ff   :  { %7419 = vmatmul.mubr.msk.f32.vlgmr.msra.gmra.mrb[30].mxu1 %vm69_vm0, %v6510_v19  ;;  %7592 = vmatprep.subr.bf16.mxu0 %v7591_v24  ;;  %v7055_v19 = vld [vmem:[%s10901_s6 + $0x48] sm:$0xff] }
0x1202   :  { %7594 = vmatpush3.bf16.msra.mxu0 %v7591_v24 }
0x12d2   :  { %v7420_v15 = vpop.f32.mrb[30].mxu1 }
0x12d3   :  { %v6598_v7 = vadd.f32 %v7420_v15, %v6518_v2  ;;  %v6592_v44 = vpop.f32.mrb[31].mxu1  ;;  %v7595_v15 = vpack.c.bf16 %v7055_v19, %v7054_v54 }
0x12d4   :  { %v6593_v55 = vadd.f32 %v6592_v44, %v6518_v2  ;;  %v7056_v2 = vld [vmem:[%s10901_s6 + $0x50] sm:$0xff] }
0x12d5   :  { %v6602_v4 = vadd.f32 %v6598_v7, %v11082_v14  ;;  %v7057_v7 = vld [vmem:[%s10901_s6 + $0x58] sm:$0xff]  ;;  %7596 = vmatprep.subr.bf16.mxu1 %v7595_v15 }
0x12d6   :  { %v6601_v26 = vadd.f32 %v6593_v55, %v11083_v6  ;;  %v7599_v44 = vpack.c.bf16 %v7057_v7, %v7056_v2  ;;  %v7058_v55 = vld [vmem:[%s10901_s6 + $0x60] sm:$0xff]  ;;  %7598 = vmatpush3.bf16.msra.mxu1 %v7595_v15 }
0x12d7   :  { %v6606_v20 = vsel %vm69_vm0, %v6602_v4, 0.0 }
0x12d8   :  { %6607 = vadd.xlane.f32.xlu0 %v6606_v20  ;;  %v6603_v30 = vsel %vm69_vm0, %v6601_v26, 0.0  ;;  %7600 = vmatprep.subr.bf16.mxu1 %v7599_v44 }
0x12d9   :  { %6604 = vadd.xlane.f32.xlu1 %v6603_v30 }
0x12da   :  { %7602 = vmatpush3.bf16.msra.mxu1 %v7599_v44 }
0x1365   :  { %v6608_v49 = vpop.xlane.xlu0 %6607 }
0x1366   :  { %v6610_v61 = vmul.f32 0.03125, %v6608_v49  ;;  %v6605_v35 = vpop.xlane.xlu1 %6604 }
0x1367   :  { %v6609_v28 = vmul.f32 0.03125, %v6605_v35 }
0x1368   :  { %v6612_v39 = vsub.f32 %v6602_v4, %v6610_v61  ;;  %v7059_v4 = vld [vmem:[%s10901_s6 + $0x68] sm:$0xff] }
0x1369   :  { %v6611_v36 = vsub.f32 %v6601_v26, %v6609_v28  ;;  %v7603_v26 = vpack.c.bf16 %v7059_v4, %v7058_v55 }
0x136a   :  { %v6614_v9 = vmul.f32 %v6612_v39, %v6612_v39 }
0x136b   :  { %v6613_v5 = vmul.f32 %v6611_v36, %v6611_v36  ;;  %7604 = vmatprep.subr.bf16.mxu1 %v7603_v26 }
0x136c   :  { %v6618_v46 = vsel %vm69_vm0, %v6614_v9, 0.0  ;;  %7606 = vmatpush3.bf16.msra.mxu1 %v7603_v26 }
0x136d   :  { %6619 = vadd.xlane.f32.xlu1 %v6618_v46  ;;  %v6615_v11 = vsel %vm69_vm0, %v6613_v5, 0.0 }
0x136e   :  { %6616 = vadd.xlane.f32.xlu0 %v6615_v11 }
0x1384   :  { %6636 = vrot.lane.b32.xlu0 %v6632_v41, %s7925_s17 }
0x1388   :  { %6672 = vrot.lane.b32.xlu0 %v6632_v41, %s7941_s23 }
0x138c   :  { %6779 = vrot.lane.b32.xlu0 %v10798_v60, %s7937_s28 }
0x13ab   :  { %6878 = vadd.xlane.f32.xlu0 %v6877_v16 }
0x13fa   :  { %v6620_v62 = vpop.xlane.xlu1 %6619 }
0x13fb   :  { %v6622_v53 = vmul.f32 0.03125, %v6620_v62  ;;  %v6617_v59 = vpop.xlane.xlu0 %6616  ;;  %v7060_v62 = vld [vmem:[%s10901_s6 + $0x70] sm:$0xff] }
0x13fc   :  { %v6621_v25 = vmul.f32 0.03125, %v6617_v59 }
0x13fd   :  { %v6624_v22 = vadd.f32 1e-06, %v6622_v53  ;;  %v7061_v53 = vld [vmem:[%s10901_s6 + $0x78] sm:$0xff] }
0x13fe   :  { %v6623_v18 = vadd.f32 1e-06, %v6621_v25  ;;  %v7607_v59 = vpack.c.bf16 %v7061_v53, %v7060_v62 }
0x13ff   :  { %7842 = vrsqrt.f32 %v6624_v22  ;;  %v6637_v43 = vpop.permute.xlu0 %6636 }
0x1400   :  { %7844 = vrsqrt.f32 %v6623_v18  ;;  %7608 = vmatprep.subr.bf16.mxu1 %v7607_v59 }
0x1401   :  { %7610 = vmatpush3.bf16.msra.mxu1 %v7607_v59 }
0x1409   :  { %v7843_v58 = vpop.eup %7842 }
0x140a   :  { %v7845_v1 = vpop.eup %7844  ;;  %v6628_v63 = vmul.f32 %v7843_v58, %v6612_v39 }
0x140b   :  { %v6627_v51 = vmul.f32 %v7845_v1, %v6611_v36 }
0x140c   :  { %v6634_v52 = vmul.f32 %v6632_v41, %v6628_v63 }
0x140d   :  { %v6633_v29 = vmul.f32 %v6632_v41, %v6627_v51 }
0x140e   :  { %v10812_v48 = vadd.f32 %v6637_v43, %v6634_v52 }
0x140f   :  { %v10810_v13 = vadd.f32 %v6637_v43, %v6633_v29 }
0x1410   :  { %v6644_v56 = vsel %vm69_vm0, %v10812_v48, 0.0 }
0x1411   :  { %v6641_v21 = vsel %vm69_vm0, %v10810_v13, 0.0 }
0x1412   :  { %6642 = vadd.xlane.f32.xlu1 %v6641_v21 }
0x1416   :  { %6645 = vadd.xlane.f32.xlu1 %v6644_v56 }
0x149f   :  { %v6643_v33 = vpop.xlane.xlu1 %6642 }
0x14a0   :  { %v6647_v12 = vmul.f32 0.03125, %v6643_v33 }
0x14a2   :  { %v6649_v34 = vsub.f32 %v10810_v13, %v6647_v12 }
0x14a3   :  { %v6646_v27 = vpop.xlane.xlu1 %6645 }
0x14a4   :  { %v6648_v32 = vmul.f32 0.03125, %v6646_v27  ;;  %v6651_v42 = vmul.f32 %v6649_v34, %v6649_v34 }
0x14a6   :  { %v6650_v50 = vsub.f32 %v10812_v48, %v6648_v32  ;;  %v6653_v47 = vsel %vm69_vm0, %v6651_v42, 0.0 }
0x14a8   :  { %v6652_v3 = vmul.f32 %v6650_v50, %v6650_v50 }
0x14aa   :  { %v6656_v57 = vsel %vm69_vm0, %v6652_v3, 0.0 }
0x14ab   :  { %6657 = vadd.xlane.f32.xlu1 %v6656_v57 }
0x14af   :  { %6654 = vadd.xlane.f32.xlu1 %v6653_v47 }
0x14c0   :  { %6667 = vrot.lane.b32.xlu1 %v6632_v41, %s7937_s28  ;;  %v6673_v41 = vpop.permute.xlu0 %6672 }
0x14c4   :  { %v6780_v51 = vpop.permute.xlu0 %6779 }
0x14e4   :  { %6881 = vadd.xlane.f32.xlu1 %v6880_v10 }
0x1538   :  { %v6658_v20 = vpop.xlane.xlu1 %6657 }
0x1539   :  { %v6660_v30 = vmul.f32 0.03125, %v6658_v20 }
0x153b   :  { %v6662_v49 = vadd.f32 1e-06, %v6660_v30 }
0x153c   :  { %v6655_v61 = vpop.xlane.xlu1 %6654 }
0x153d   :  { %7846 = vrsqrt.f32 %v6662_v49  ;;  %v6659_v35 = vmul.f32 0.03125, %v6655_v61 }
0x153f   :  { %v6661_v28 = vadd.f32 1e-06, %v6659_v35 }
0x1540   :  { %v6668_v9 = vpop.permute.xlu1 %6667 }
0x1541   :  { %7848 = vrsqrt.f32 %v6661_v28 }
0x1547   :  { %v7847_v39 = vpop.eup %7846 }
0x1548   :  { %v6666_v36 = vmul.f32 %v7847_v39, %v6650_v50 }
0x154a   :  { %v6671_v11 = vmul.f32 %v6668_v9, %v6666_v36 }
0x154b   :  { %v7849_v5 = vpop.eup %7848 }
0x154c   :  { %v6665_v46 = vmul.f32 %v7849_v5, %v6649_v34  ;;  %v6676_v16 = vadd.f32 %v6673_v41, %v6671_v11 }
0x154e   :  { %v6670_v17 = vmul.f32 %v6668_v9, %v6665_v46 }
0x1550   :  { %v6675_v0 = vadd.f32 %v6673_v41, %v6670_v17 }
0x1552   :  { %7429 = vmatprep.mubr.msk.f32.mxu0 %vm69_vm0, %v6675_v0 }
0x1553   :  { %7430 = vmatmul.mubr.msk.f32.vlgmr.msra.gmra.mrb[28].mxu0 %vm69_vm0, %v6676_v16 }
0x1571   :  { %v6882_v57 = vpop.xlane.xlu1 %6881 }
0x1626   :  { %v7431_v25 = vpop.f32.mrb[28].mxu0 }
0x1627   :  { %v6764_v22 = vadd.f32 %v7431_v25, %v10798_v60  ;;  %v6758_v18 = vpop.f32.mrb[29].mxu0 }
0x1628   :  { %v6759_v58 = vadd.f32 %v6758_v18, %v10798_v60 }
0x1629   :  { %v6768_v63 = vmax.f32 %v6764_v22, 0.0 }
0x162a   :  { %v6767_v1 = vmax.f32 %v6759_v58, 0.0 }
0x162c   :  { %7448 = vmatprep.mubr.msk.f32.mxu1 %vm3377_vm5, %v6767_v1 }
0x162d   :  { %7449 = vmatmul.mubr.msk.f32.vlgmr.msra.gmra.mrb[32].mxu1 %vm3377_vm5, %v6768_v63 }
0x1700   :  { %v7450_v43 = vpop.f32.mrb[32].mxu1 }
0x1701   :  { %v6860_v29 = vadd.f32 %v7450_v43, %v6780_v51  ;;  %v6854_v52 = vpop.f32.mrb[33].mxu1 }
0x1702   :  { %v6855_v21 = vadd.f32 %v6854_v52, %v6780_v51 }
0x1703   :  { %v6864_v56 = vadd.f32 %v6860_v29, %v10812_v48 }
0x1704   :  { %v6863_v33 = vadd.f32 %v6855_v21, %v10810_v13  ;;  %v6879_v13 = vpop.xlane.xlu0 %6878 }
0x1705   :  { %7065 = vst.msk [vmem:[%s10902_s11 + $0x18] sm:$0xff] %vm69_vm0, %v6864_v56  ;;  %v6884_v27 = vmul.f32 %v10805_v38, %v6864_v56 }
0x1706   :  { %7064 = vst.msk [vmem:[%s10902_s11 + $0x10] sm:$0xff] %vm69_vm0, %v6863_v33  ;;  %v6883_v60 = vmul.f32 %v10805_v38, %v6863_v33 }
0x1707   :  { %v6888_v48 = vsel %vm69_vm0, %v6884_v27, 0.0 }
0x1708   :  { %v6885_v12 = vsel %vm69_vm0, %v6883_v60, 0.0 }
0x1709   :  { %6886 = vadd.xlane.f32.xlu0 %v6885_v12 }
0x170d   :  { %6889 = vadd.xlane.f32.xlu0 %v6888_v48 }
0x1796   :  { %v6887_v32 = vpop.xlane.xlu0 %6886 }
0x1797   :  { %v6891_v34 = vmax.f32 %v6879_v13, %v6887_v32 }
0x1799   :  { %v6893_v50 = vsub.f32 %v6879_v13, %v6891_v34  ;;  %v6899_v3 = vsub.f32 %v6887_v32, %v6891_v34 }
0x179a   :  { %v6890_v42 = vpop.xlane.xlu0 %6889 }
0x179b   :  { %v6895_v47 = vmul.f32 1.442695, %v6893_v50  ;;  %v6901_v45 = vmul.f32 1.442695, %v6899_v3  ;;  %v6892_v8 = vmax.f32 %v6882_v57, %v6890_v42 }
0x179d   :  { %7850 = vpow2.f32 %v6895_v47  ;;  %v6894_v40 = vsub.f32 %v6882_v57, %v6892_v8  ;;  %v6900_v31 = vsub.f32 %v6890_v42, %v6892_v8 }
0x179e   :  { %7852 = vpow2.f32 %v6901_v45 }
0x179f   :  { %v6897_v37 = vmul.f32 1.442695, %v6894_v40  ;;  %v6903_v38 = vmul.f32 1.442695, %v6900_v31 }
0x17a1   :  { %7854 = vpow2.f32 %v6897_v37 }
0x17a2   :  { %7856 = vpow2.f32 %v6903_v38 }
0x17a7   :  { %v7851_v24 = vpop.eup %7850 }
0x17a8   :  { %v7853_v23 = vpop.eup %7852 }
0x17a9   :  { %v6905_v10 = vadd.f32 %v7853_v23, %v7851_v24 }
0x17ab   :  { %v7855_v54 = vpop.eup %7854  ;;  %7858 = vrcp.f32 %v6905_v10 }
0x17ac   :  { %v7857_v19 = vpop.eup %7856 }
0x17ad   :  { %v6906_v2 = vadd.f32 %v7857_v19, %v7855_v54 }
0x17af   :  { %7860 = vrcp.f32 %v6906_v2 }
0x17b5   :  { %v7859_v15 = vpop.eup %7858 }
0x17b6   :  { %v6909_v7 = vmul.f32 %v7859_v15, %v7851_v24  ;;  %v6913_v44 = vmul.f32 %v7859_v15, %v7853_v23 }
0x17b8   :  { %v6911_v55 = vmul.f32 %v6909_v7, %v11083_v6  ;;  %v6915_v4 = vmul.f32 %v6913_v44, %v6863_v33 }
0x17b9   :  { %v7861_v26 = vpop.eup %7860 }
0x17ba   :  { %v6917_v20 = vadd.f32 %v6915_v4, %v6911_v55  ;;  %v6910_v30 = vmul.f32 %v7861_v26, %v7855_v54  ;;  %v6914_v49 = vmul.f32 %v7861_v26, %v7857_v19 }
0x17bc   :  { %7067 = vst.msk [vmem:[%s10902_s11 + $0x20] sm:$0xff] %vm69_vm0, %v6917_v20  ;;  %v6912_v61 = vmul.f32 %v6910_v30, %v11082_v14  ;;  %v6916_v35 = vmul.f32 %v6914_v49, %v6864_v56 }
0x17be   :  { %v6918_v28 = vadd.f32 %v6916_v35, %v6912_v61 }
0x17c0   :  { %7068 = vst.msk [vmem:[%s10902_s11 + $0x28] sm:$0xff] %vm69_vm0, %v6918_v28 }

</bundles_post_ra>
